<compile_context>
chip_gen: v5e
topology: v5e:2x2
jax: 0.10.0
libtpu: 0.0.40
codegen_flags: <defaults>
</compile_context>

<pallas_src>
import jax
import jax.numpy as jnp
from jax.experimental import pallas as pl
from jax.experimental.pallas import tpu as pltpu


def pattern_lstm_kernel(seq_ref, wx_ref, wh_ref, out_ref, xp_ref):
    # seq_ref: (T*M, H1+2) f32  time-major rows [features | holiday_flag | 1.0]
    #                           row index = t*M + (b*N + n)
    # wx_ref : (H1+2, 4*H2) f32 rows = [W_x^T ; w_flag ; b_ih + b_hh], gate order i,f,g,o
    # wh_ref : (H2, 4*H2)   f32 transposed hidden->gate weights
    # out_ref: (M, H2)      final hidden state h_T
    # xp_ref : VMEM scratch (T*M, 4*H2) f32  precomputed input-side gate pre-activations
    TM = seq_ref.shape[0]
    M, H2 = out_ref.shape
    G = 4 * H2
    T = TM // M

    # --- input projection for all timesteps: one lane-dense bf16 MXU matmul ------
    # Biases and the holiday-flag contribution are folded in through the augmented
    # columns/rows, so the recurrence has no per-step additive term.
    xp_ref[...] = jnp.dot(seq_ref[...].astype(jnp.bfloat16),
                          wx_ref[...].astype(jnp.bfloat16),
                          preferred_element_type=jnp.float32)

    # Loop-invariant recurrent weights, resident in bf16 (2 vregs) for all steps.
    wh = wh_ref[...].astype(jnp.bfloat16)

    # --- t = 0: h = c = 0, so the recurrent matmul and f*c vanish ----------------
    g0 = xp_ref[0:M, :]
    i_g = jax.nn.sigmoid(g0[:, 0 * H2:1 * H2])
    g_g = jnp.tanh(g0[:, 2 * H2:3 * H2])
    o_g = jax.nn.sigmoid(g0[:, 3 * H2:4 * H2])
    c = i_g * g_g
    h = o_g * jnp.tanh(c)

    # --- t = 1 .. T-1: statically unrolled recurrence -----------------------------
    for t in range(1, T):
        g = (xp_ref[t * M:(t + 1) * M, :]
             + jnp.dot(h.astype(jnp.bfloat16), wh,
                       preferred_element_type=jnp.float32))
        i_g = jax.nn.sigmoid(g[:, 0 * H2:1 * H2])
        f_g = jax.nn.sigmoid(g[:, 1 * H2:2 * H2])
        g_g = jnp.tanh(g[:, 2 * H2:3 * H2])
        o_g = jax.nn.sigmoid(g[:, 3 * H2:4 * H2])
        c = f_g * c + i_g * g_g
        h = o_g * jnp.tanh(c)

    out_ref[...] = h.astype(out_ref.dtype)


def pattern_lstm(Z1, holiday_flag, params):
    """PatternLSTM.forward: Z1 (B, H1, T, N), holiday_flag (B,) -> (B, N, H2)."""
    w_ih, w_hh, b_ih, b_hh = params          # (4H2, H1+1), (4H2, H2), (4H2,), (4H2,)
    B, H1, T, N = Z1.shape
    H2 = w_hh.shape[1]
    M = B * N
    G = 4 * H2

    # (B, H1, T, N) -> (T, B, N, H1) -> (T*M, H1); row index = t*M + (b*N + n)
    seq = jnp.transpose(Z1, (2, 0, 3, 1)).reshape(T * M, H1)
    # Augment every row with [holiday_flag, 1.0] so the flag term and both biases
    # are applied by the projection matmul (no per-step additive term in-kernel).
    flag_col = jnp.broadcast_to(holiday_flag[None, :, None], (T, B, N)).reshape(T * M, 1)
    ones_col = jnp.ones((T * M, 1), seq.dtype)
    seq_aug = jnp.concatenate([seq, flag_col.astype(seq.dtype), ones_col], axis=1)

    wx_aug = jnp.concatenate([
        jnp.transpose(w_ih[:, :H1]),          # (H1, G)  feature weights
        w_ih[:, H1][None, :],                 # (1,  G)  holiday-flag column
        (b_ih + b_hh)[None, :],               # (1,  G)  folded biases
    ], axis=0)                                # (H1+2, G)
    wh = jnp.transpose(w_hh)                  # (H2, G)

    flops = 2 * T * M * (H1 + 2) * G + 2 * (T - 1) * M * H2 * G
    transcendentals = 5 * T * M * H2
    bytes_accessed = 4 * (T * M * (H1 + 2) + (H1 + 2) * G + H2 * G + M * H2)

    h_last = pl.pallas_call(
        pattern_lstm_kernel,
        out_shape=jax.ShapeDtypeStruct((M, H2), jnp.float32),
        in_specs=[
            pl.BlockSpec(memory_space=pltpu.MemorySpace.VMEM),
            pl.BlockSpec(memory_space=pltpu.MemorySpace.VMEM),
            pl.BlockSpec(memory_space=pltpu.MemorySpace.VMEM),
        ],
        out_specs=pl.BlockSpec(memory_space=pltpu.MemorySpace.VMEM),
        scratch_shapes=[pltpu.VMEM((T * M, G), jnp.float32)],
        cost_estimate=pl.CostEstimate(
            flops=flops,
            transcendentals=transcendentals,
            bytes_accessed=bytes_accessed,
        ),
    )(seq_aug, wx_aug, wh)

    return h_last.reshape(B, N, H2)


# ----------------------- pure-JAX reference (for checking) -----------------------
def _pattern_lstm_ref(Z1, holiday_flag, params):
    w_ih, w_hh, b_ih, b_hh = params
    B, H1, T, N = Z1.shape
    H2 = w_hh.shape[1]
    seq = jnp.transpose(Z1, (0, 3, 2, 1)).reshape(B * N, T, H1)
    wf = jnp.broadcast_to(holiday_flag[:, None], (B, N)).reshape(B * N, 1)
    wf_seq = jnp.broadcast_to(wf[:, None, :], (B * N, T, 1))
    x = jnp.concatenate([seq, wf_seq], axis=2)          # (B*N, T, H1+1)

    hp = jax.lax.Precision.HIGHEST

    def cell(carry, xt):
        h, c = carry
        g = (jnp.dot(xt, w_ih.T, precision=hp)
             + jnp.dot(h, w_hh.T, precision=hp)
             + b_ih + b_hh)
        i_g = jax.nn.sigmoid(g[:, 0 * H2:1 * H2])
        f_g = jax.nn.sigmoid(g[:, 1 * H2:2 * H2])
        g_g = jnp.tanh(g[:, 2 * H2:3 * H2])
        o_g = jax.nn.sigmoid(g[:, 3 * H2:4 * H2])
        c = f_g * c + i_g * g_g
        h = o_g * jnp.tanh(c)
        return (h, c), None

    h0 = jnp.zeros((B * N, H2), jnp.float32)
    c0 = jnp.zeros((B * N, H2), jnp.float32)
    (h, _), _ = jax.lax.scan(cell, (h0, c0), jnp.swapaxes(x, 0, 1))
    return h.reshape(B, N, H2)


if __name__ == "__main__":
    # Small shapes consistent with the module: B=2, hidden1=32, T=12 (seq_len), N=16, hidden2=32.
    B, HIDDEN1, T, N, HIDDEN2 = 2, 32, 12, 16, 32

    key = jax.random.PRNGKey(0)
    kz, kf, k1, k2, k3, k4 = jax.random.split(key, 6)

    Z1 = jax.random.normal(kz, (B, HIDDEN1, T, N), jnp.float32)
    holiday_flag = (jax.random.uniform(kf, (B,)) > 0.5).astype(jnp.float32)

    w_ih = jax.random.normal(k1, (4 * HIDDEN2, HIDDEN1 + 1), jnp.float32) * 0.1
    w_hh = jax.random.normal(k2, (4 * HIDDEN2, HIDDEN2), jnp.float32) * 0.1
    b_ih = jax.random.normal(k3, (4 * HIDDEN2,), jnp.float32) * 0.1
    b_hh = jax.random.normal(k4, (4 * HIDDEN2,), jnp.float32) * 0.1
    params = (w_ih, w_hh, b_ih, b_hh)

    out = jax.jit(pattern_lstm)(Z1, holiday_flag, params)
    out = jax.block_until_ready(out)

    ref = _pattern_lstm_ref(Z1, holiday_flag, params)
    assert out.shape == (B, N, HIDDEN2)
    # Tolerance accounts for bf16 MXU operands inside the kernel vs. the f32 reference.
    assert jnp.allclose(out, ref, atol=3e-2, rtol=3e-2), "mismatch vs. JAX reference"

    print("KERNEL_OK")
</pallas_src>

<mosaic_0001>
module attributes {stable_mosaic.version = 11 : i64} {
  func.func @pattern_lstm_kernel(%arg0: memref<384x34xf32, #tpu.memory_space<vmem>>, %arg1: memref<34x128xf32, #tpu.memory_space<vmem>>, %arg2: memref<32x128xf32, #tpu.memory_space<vmem>>, %arg3: memref<32x32xf32, #tpu.memory_space<vmem>>, %arg4: memref<384x128xf32, #tpu.memory_space<vmem>>) attributes {dimension_semantics = [], scalar_prefetch = 0 : i64, scratch_operands = 1 : i64, tpu.core_type = #tpu.core_type<tc>} {
    %c0 = arith.constant 0 : index
    %c0_0 = arith.constant 0 : index
    %0 = vector.load %arg0[%c0, %c0_0] : memref<384x34xf32, #tpu.memory_space<vmem>>, vector<384x34xf32>
    %1 = arith.truncf %0 : vector<384x34xf32> to vector<384x34xbf16>
    %c0_1 = arith.constant 0 : index
    %c0_2 = arith.constant 0 : index
    %2 = vector.load %arg1[%c0_1, %c0_2] : memref<34x128xf32, #tpu.memory_space<vmem>>, vector<34x128xf32>
    %3 = arith.truncf %2 : vector<34x128xf32> to vector<34x128xbf16>
    %cst = arith.constant dense<0.000000e+00> : vector<384x128xf32>
    %4 = tpu.matmul %1, %3, %cst {dimension_numbers = #tpu.dot_dimension_numbers<[1], [0], [0], [1], [0, 0, 1, 1], [], []>} : vector<384x34xbf16>, vector<34x128xbf16>, vector<384x128xf32> -> vector<384x128xf32>
    %c0_3 = arith.constant 0 : index
    %c0_4 = arith.constant 0 : index
    %5 = vector.load %arg4[%c0_3, %c0_4] : memref<384x128xf32, #tpu.memory_space<vmem>>, vector<384x128xf32>
    tpu.vector_store %arg4[%c0_3, %c0_4], %4 {strides = array<i32>} : memref<384x128xf32, #tpu.memory_space<vmem>>, vector<384x128xf32>,
    %c0_5 = arith.constant 0 : index
    %c0_6 = arith.constant 0 : index
    %6 = vector.load %arg2[%c0_5, %c0_6] : memref<32x128xf32, #tpu.memory_space<vmem>>, vector<32x128xf32>
    %7 = arith.truncf %6 : vector<32x128xf32> to vector<32x128xbf16>
    %c0_7 = arith.constant 0 : index
    %c0_8 = arith.constant 0 : index
    %8 = vector.load %arg4[%c0_7, %c0_8] : memref<384x128xf32, #tpu.memory_space<vmem>>, vector<32x128xf32>
    %9 = vector.extract_strided_slice %8 {offsets = [0, 0], sizes = [32, 32], strides = [1, 1]} : vector<32x128xf32> to vector<32x32xf32>
    %10 = arith.negf %9 : vector<32x32xf32>
    %11 = math.exp %10 : vector<32x32xf32>
    %cst_9 = arith.constant 1.000000e+00 : f32
    %12 = vector.broadcast %cst_9 : f32 to vector<32x32xf32>
    %13 = arith.addf %12, %11 : vector<32x32xf32>
    %14 = arith.divf %12, %13 : vector<32x32xf32>
    %15 = vector.extract_strided_slice %8 {offsets = [0, 64], sizes = [32, 32], strides = [1, 1]} : vector<32x128xf32> to vector<32x32xf32>
    %16 = math.tanh %15 : vector<32x32xf32>
    %17 = vector.extract_strided_slice %8 {offsets = [0, 96], sizes = [32, 32], strides = [1, 1]} : vector<32x128xf32> to vector<32x32xf32>
    %18 = arith.negf %17 : vector<32x32xf32>
    %19 = math.exp %18 : vector<32x32xf32>
    %cst_10 = arith.constant 1.000000e+00 : f32
    %20 = vector.broadcast %cst_10 : f32 to vector<32x32xf32>
    %21 = arith.addf %20, %19 : vector<32x32xf32>
    %22 = arith.divf %20, %21 : vector<32x32xf32>
    %23 = arith.mulf %14, %16 : vector<32x32xf32>
    %24 = math.tanh %23 : vector<32x32xf32>
    %25 = arith.mulf %22, %24 : vector<32x32xf32>
    %c32 = arith.constant 32 : index
    %c0_11 = arith.constant 0 : index
    %26 = vector.load %arg4[%c32, %c0_11] : memref<384x128xf32, #tpu.memory_space<vmem>>, vector<32x128xf32>
    %27 = arith.truncf %25 : vector<32x32xf32> to vector<32x32xbf16>
    %cst_12 = arith.constant dense<0.000000e+00> : vector<32x128xf32>
    %28 = tpu.matmul %27, %7, %cst_12 {dimension_numbers = #tpu.dot_dimension_numbers<[1], [0], [0], [1], [0, 0, 1, 1], [], []>} : vector<32x32xbf16>, vector<32x128xbf16>, vector<32x128xf32> -> vector<32x128xf32>
    %29 = arith.addf %26, %28 : vector<32x128xf32>
    %30 = vector.extract_strided_slice %29 {offsets = [0, 0], sizes = [32, 32], strides = [1, 1]} : vector<32x128xf32> to vector<32x32xf32>
    %31 = arith.negf %30 : vector<32x32xf32>
    %32 = math.exp %31 : vector<32x32xf32>
    %cst_13 = arith.constant 1.000000e+00 : f32
    %33 = vector.broadcast %cst_13 : f32 to vector<32x32xf32>
    %34 = arith.addf %33, %32 : vector<32x32xf32>
    %35 = arith.divf %33, %34 : vector<32x32xf32>
    %36 = vector.extract_strided_slice %29 {offsets = [0, 32], sizes = [32, 32], strides = [1, 1]} : vector<32x128xf32> to vector<32x32xf32>
    %37 = arith.negf %36 : vector<32x32xf32>
    %38 = math.exp %37 : vector<32x32xf32>
    %cst_14 = arith.constant 1.000000e+00 : f32
    %39 = vector.broadcast %cst_14 : f32 to vector<32x32xf32>
    %40 = arith.addf %39, %38 : vector<32x32xf32>
    %41 = arith.divf %39, %40 : vector<32x32xf32>
    %42 = vector.extract_strided_slice %29 {offsets = [0, 64], sizes = [32, 32], strides = [1, 1]} : vector<32x128xf32> to vector<32x32xf32>
    %43 = math.tanh %42 : vector<32x32xf32>
    %44 = vector.extract_strided_slice %29 {offsets = [0, 96], sizes = [32, 32], strides = [1, 1]} : vector<32x128xf32> to vector<32x32xf32>
    %45 = arith.negf %44 : vector<32x32xf32>
    %46 = math.exp %45 : vector<32x32xf32>
    %cst_15 = arith.constant 1.000000e+00 : f32
    %47 = vector.broadcast %cst_15 : f32 to vector<32x32xf32>
    %48 = arith.addf %47, %46 : vector<32x32xf32>
    %49 = arith.divf %47, %48 : vector<32x32xf32>
    %50 = arith.mulf %41, %23 : vector<32x32xf32>
    %51 = arith.mulf %35, %43 : vector<32x32xf32>
    %52 = arith.addf %50, %51 : vector<32x32xf32>
    %53 = math.tanh %52 : vector<32x32xf32>
    %54 = arith.mulf %49, %53 : vector<32x32xf32>
    %c64 = arith.constant 64 : index
    %c0_16 = arith.constant 0 : index
    %55 = vector.load %arg4[%c64, %c0_16] : memref<384x128xf32, #tpu.memory_space<vmem>>, vector<32x128xf32>
    %56 = arith.truncf %54 : vector<32x32xf32> to vector<32x32xbf16>
    %cst_17 = arith.constant dense<0.000000e+00> : vector<32x128xf32>
    %57 = tpu.matmul %56, %7, %cst_17 {dimension_numbers = #tpu.dot_dimension_numbers<[1], [0], [0], [1], [0, 0, 1, 1], [], []>} : vector<32x32xbf16>, vector<32x128xbf16>, vector<32x128xf32> -> vector<32x128xf32>
    %58 = arith.addf %55, %57 : vector<32x128xf32>
    %59 = vector.extract_strided_slice %58 {offsets = [0, 0], sizes = [32, 32], strides = [1, 1]} : vector<32x128xf32> to vector<32x32xf32>
    %60 = arith.negf %59 : vector<32x32xf32>
    %61 = math.exp %60 : vector<32x32xf32>
    %cst_18 = arith.constant 1.000000e+00 : f32
    %62 = vector.broadcast %cst_18 : f32 to vector<32x32xf32>
    %63 = arith.addf %62, %61 : vector<32x32xf32>
    %64 = arith.divf %62, %63 : vector<32x32xf32>
    %65 = vector.extract_strided_slice %58 {offsets = [0, 32], sizes = [32, 32], strides = [1, 1]} : vector<32x128xf32> to vector<32x32xf32>
    %66 = arith.negf %65 : vector<32x32xf32>
    %67 = math.exp %66 : vector<32x32xf32>
    %cst_19 = arith.constant 1.000000e+00 : f32
    %68 = vector.broadcast %cst_19 : f32 to vector<32x32xf32>
    %69 = arith.addf %68, %67 : vector<32x32xf32>
    %70 = arith.divf %68, %69 : vector<32x32xf32>
    %71 = vector.extract_strided_slice %58 {offsets = [0, 64], sizes = [32, 32], strides = [1, 1]} : vector<32x128xf32> to vector<32x32xf32>
    %72 = math.tanh %71 : vector<32x32xf32>
    %73 = vector.extract_strided_slice %58 {offsets = [0, 96], sizes = [32, 32], strides = [1, 1]} : vector<32x128xf32> to vector<32x32xf32>
    %74 = arith.negf %73 : vector<32x32xf32>
    %75 = math.exp %74 : vector<32x32xf32>
    %cst_20 = arith.constant 1.000000e+00 : f32
    %76 = vector.broadcast %cst_20 : f32 to vector<32x32xf32>
    %77 = arith.addf %76, %75 : vector<32x32xf32>
    %78 = arith.divf %76, %77 : vector<32x32xf32>
    %79 = arith.mulf %70, %52 : vector<32x32xf32>
    %80 = arith.mulf %64, %72 : vector<32x32xf32>
    %81 = arith.addf %79, %80 : vector<32x32xf32>
    %82 = math.tanh %81 : vector<32x32xf32>
    %83 = arith.mulf %78, %82 : vector<32x32xf32>
    %c96 = arith.constant 96 : index
    %c0_21 = arith.constant 0 : index
    %84 = vector.load %arg4[%c96, %c0_21] : memref<384x128xf32, #tpu.memory_space<vmem>>, vector<32x128xf32>
    %85 = arith.truncf %83 : vector<32x32xf32> to vector<32x32xbf16>
    %cst_22 = arith.constant dense<0.000000e+00> : vector<32x128xf32>
    %86 = tpu.matmul %85, %7, %cst_22 {dimension_numbers = #tpu.dot_dimension_numbers<[1], [0], [0], [1], [0, 0, 1, 1], [], []>} : vector<32x32xbf16>, vector<32x128xbf16>, vector<32x128xf32> -> vector<32x128xf32>
    %87 = arith.addf %84, %86 : vector<32x128xf32>
    %88 = vector.extract_strided_slice %87 {offsets = [0, 0], sizes = [32, 32], strides = [1, 1]} : vector<32x128xf32> to vector<32x32xf32>
    %89 = arith.negf %88 : vector<32x32xf32>
    %90 = math.exp %89 : vector<32x32xf32>
    %cst_23 = arith.constant 1.000000e+00 : f32
    %91 = vector.broadcast %cst_23 : f32 to vector<32x32xf32>
    %92 = arith.addf %91, %90 : vector<32x32xf32>
    %93 = arith.divf %91, %92 : vector<32x32xf32>
    %94 = vector.extract_strided_slice %87 {offsets = [0, 32], sizes = [32, 32], strides = [1, 1]} : vector<32x128xf32> to vector<32x32xf32>
    %95 = arith.negf %94 : vector<32x32xf32>
    %96 = math.exp %95 : vector<32x32xf32>
    %cst_24 = arith.constant 1.000000e+00 : f32
    %97 = vector.broadcast %cst_24 : f32 to vector<32x32xf32>
    %98 = arith.addf %97, %96 : vector<32x32xf32>
    %99 = arith.divf %97, %98 : vector<32x32xf32>
    %100 = vector.extract_strided_slice %87 {offsets = [0, 64], sizes = [32, 32], strides = [1, 1]} : vector<32x128xf32> to vector<32x32xf32>
    %101 = math.tanh %100 : vector<32x32xf32>
    %102 = vector.extract_strided_slice %87 {offsets = [0, 96], sizes = [32, 32], strides = [1, 1]} : vector<32x128xf32> to vector<32x32xf32>
    %103 = arith.negf %102 : vector<32x32xf32>
    %104 = math.exp %103 : vector<32x32xf32>
    %cst_25 = arith.constant 1.000000e+00 : f32
    %105 = vector.broadcast %cst_25 : f32 to vector<32x32xf32>
    %106 = arith.addf %105, %104 : vector<32x32xf32>
    %107 = arith.divf %105, %106 : vector<32x32xf32>
    %108 = arith.mulf %99, %81 : vector<32x32xf32>
    %109 = arith.mulf %93, %101 : vector<32x32xf32>
    %110 = arith.addf %108, %109 : vector<32x32xf32>
    %111 = math.tanh %110 : vector<32x32xf32>
    %112 = arith.mulf %107, %111 : vector<32x32xf32>
    %c128 = arith.constant 128 : index
    %c0_26 = arith.constant 0 : index
    %113 = vector.load %arg4[%c128, %c0_26] : memref<384x128xf32, #tpu.memory_space<vmem>>, vector<32x128xf32>
    %114 = arith.truncf %112 : vector<32x32xf32> to vector<32x32xbf16>
    %cst_27 = arith.constant dense<0.000000e+00> : vector<32x128xf32>
    %115 = tpu.matmul %114, %7, %cst_27 {dimension_numbers = #tpu.dot_dimension_numbers<[1], [0], [0], [1], [0, 0, 1, 1], [], []>} : vector<32x32xbf16>, vector<32x128xbf16>, vector<32x128xf32> -> vector<32x128xf32>
    %116 = arith.addf %113, %115 : vector<32x128xf32>
    %117 = vector.extract_strided_slice %116 {offsets = [0, 0], sizes = [32, 32], strides = [1, 1]} : vector<32x128xf32> to vector<32x32xf32>
    %118 = arith.negf %117 : vector<32x32xf32>
    %119 = math.exp %118 : vector<32x32xf32>
    %cst_28 = arith.constant 1.000000e+00 : f32
    %120 = vector.broadcast %cst_28 : f32 to vector<32x32xf32>
    %121 = arith.addf %120, %119 : vector<32x32xf32>
    %122 = arith.divf %120, %121 : vector<32x32xf32>
    %123 = vector.extract_strided_slice %116 {offsets = [0, 32], sizes = [32, 32], strides = [1, 1]} : vector<32x128xf32> to vector<32x32xf32>
    %124 = arith.negf %123 : vector<32x32xf32>
    %125 = math.exp %124 : vector<32x32xf32>
    %cst_29 = arith.constant 1.000000e+00 : f32
    %126 = vector.broadcast %cst_29 : f32 to vector<32x32xf32>
    %127 = arith.addf %126, %125 : vector<32x32xf32>
    %128 = arith.divf %126, %127 : vector<32x32xf32>
    %129 = vector.extract_strided_slice %116 {offsets = [0, 64], sizes = [32, 32], strides = [1, 1]} : vector<32x128xf32> to vector<32x32xf32>
    %130 = math.tanh %129 : vector<32x32xf32>
    %131 = vector.extract_strided_slice %116 {offsets = [0, 96], sizes = [32, 32], strides = [1, 1]} : vector<32x128xf32> to vector<32x32xf32>
    %132 = arith.negf %131 : vector<32x32xf32>
    %133 = math.exp %132 : vector<32x32xf32>
    %cst_30 = arith.constant 1.000000e+00 : f32
    %134 = vector.broadcast %cst_30 : f32 to vector<32x32xf32>
    %135 = arith.addf %134, %133 : vector<32x32xf32>
    %136 = arith.divf %134, %135 : vector<32x32xf32>
    %137 = arith.mulf %128, %110 : vector<32x32xf32>
    %138 = arith.mulf %122, %130 : vector<32x32xf32>
    %139 = arith.addf %137, %138 : vector<32x32xf32>
    %140 = math.tanh %139 : vector<32x32xf32>
    %141 = arith.mulf %136, %140 : vector<32x32xf32>
    %c160 = arith.constant 160 : index
    %c0_31 = arith.constant 0 : index
    %142 = vector.load %arg4[%c160, %c0_31] : memref<384x128xf32, #tpu.memory_space<vmem>>, vector<32x128xf32>
    %143 = arith.truncf %141 : vector<32x32xf32> to vector<32x32xbf16>
    %cst_32 = arith.constant dense<0.000000e+00> : vector<32x128xf32>
    %144 = tpu.matmul %143, %7, %cst_32 {dimension_numbers = #tpu.dot_dimension_numbers<[1], [0], [0], [1], [0, 0, 1, 1], [], []>} : vector<32x32xbf16>, vector<32x128xbf16>, vector<32x128xf32> -> vector<32x128xf32>
    %145 = arith.addf %142, %144 : vector<32x128xf32>
    %146 = vector.extract_strided_slice %145 {offsets = [0, 0], sizes = [32, 32], strides = [1, 1]} : vector<32x128xf32> to vector<32x32xf32>
    %147 = arith.negf %146 : vector<32x32xf32>
    %148 = math.exp %147 : vector<32x32xf32>
    %cst_33 = arith.constant 1.000000e+00 : f32
    %149 = vector.broadcast %cst_33 : f32 to vector<32x32xf32>
    %150 = arith.addf %149, %148 : vector<32x32xf32>
    %151 = arith.divf %149, %150 : vector<32x32xf32>
    %152 = vector.extract_strided_slice %145 {offsets = [0, 32], sizes = [32, 32], strides = [1, 1]} : vector<32x128xf32> to vector<32x32xf32>
    %153 = arith.negf %152 : vector<32x32xf32>
    %154 = math.exp %153 : vector<32x32xf32>
    %cst_34 = arith.constant 1.000000e+00 : f32
    %155 = vector.broadcast %cst_34 : f32 to vector<32x32xf32>
    %156 = arith.addf %155, %154 : vector<32x32xf32>
    %157 = arith.divf %155, %156 : vector<32x32xf32>
    %158 = vector.extract_strided_slice %145 {offsets = [0, 64], sizes = [32, 32], strides = [1, 1]} : vector<32x128xf32> to vector<32x32xf32>
    %159 = math.tanh %158 : vector<32x32xf32>
    %160 = vector.extract_strided_slice %145 {offsets = [0, 96], sizes = [32, 32], strides = [1, 1]} : vector<32x128xf32> to vector<32x32xf32>
    %161 = arith.negf %160 : vector<32x32xf32>
    %162 = math.exp %161 : vector<32x32xf32>
    %cst_35 = arith.constant 1.000000e+00 : f32
    %163 = vector.broadcast %cst_35 : f32 to vector<32x32xf32>
    %164 = arith.addf %163, %162 : vector<32x32xf32>
    %165 = arith.divf %163, %164 : vector<32x32xf32>
    %166 = arith.mulf %157, %139 : vector<32x32xf32>
    %167 = arith.mulf %151, %159 : vector<32x32xf32>
    %168 = arith.addf %166, %167 : vector<32x32xf32>
    %169 = math.tanh %168 : vector<32x32xf32>
    %170 = arith.mulf %165, %169 : vector<32x32xf32>
    %c192 = arith.constant 192 : index
    %c0_36 = arith.constant 0 : index
    %171 = vector.load %arg4[%c192, %c0_36] : memref<384x128xf32, #tpu.memory_space<vmem>>, vector<32x128xf32>
    %172 = arith.truncf %170 : vector<32x32xf32> to vector<32x32xbf16>
    %cst_37 = arith.constant dense<0.000000e+00> : vector<32x128xf32>
    %173 = tpu.matmul %172, %7, %cst_37 {dimension_numbers = #tpu.dot_dimension_numbers<[1], [0], [0], [1], [0, 0, 1, 1], [], []>} : vector<32x32xbf16>, vector<32x128xbf16>, vector<32x128xf32> -> vector<32x128xf32>
    %174 = arith.addf %171, %173 : vector<32x128xf32>
    %175 = vector.extract_strided_slice %174 {offsets = [0, 0], sizes = [32, 32], strides = [1, 1]} : vector<32x128xf32> to vector<32x32xf32>
    %176 = arith.negf %175 : vector<32x32xf32>
    %177 = math.exp %176 : vector<32x32xf32>
    %cst_38 = arith.constant 1.000000e+00 : f32
    %178 = vector.broadcast %cst_38 : f32 to vector<32x32xf32>
    %179 = arith.addf %178, %177 : vector<32x32xf32>
    %180 = arith.divf %178, %179 : vector<32x32xf32>
    %181 = vector.extract_strided_slice %174 {offsets = [0, 32], sizes = [32, 32], strides = [1, 1]} : vector<32x128xf32> to vector<32x32xf32>
    %182 = arith.negf %181 : vector<32x32xf32>
    %183 = math.exp %182 : vector<32x32xf32>
    %cst_39 = arith.constant 1.000000e+00 : f32
    %184 = vector.broadcast %cst_39 : f32 to vector<32x32xf32>
    %185 = arith.addf %184, %183 : vector<32x32xf32>
    %186 = arith.divf %184, %185 : vector<32x32xf32>
    %187 = vector.extract_strided_slice %174 {offsets = [0, 64], sizes = [32, 32], strides = [1, 1]} : vector<32x128xf32> to vector<32x32xf32>
    %188 = math.tanh %187 : vector<32x32xf32>
    %189 = vector.extract_strided_slice %174 {offsets = [0, 96], sizes = [32, 32], strides = [1, 1]} : vector<32x128xf32> to vector<32x32xf32>
    %190 = arith.negf %189 : vector<32x32xf32>
    %191 = math.exp %190 : vector<32x32xf32>
    %cst_40 = arith.constant 1.000000e+00 : f32
    %192 = vector.broadcast %cst_40 : f32 to vector<32x32xf32>
    %193 = arith.addf %192, %191 : vector<32x32xf32>
    %194 = arith.divf %192, %193 : vector<32x32xf32>
    %195 = arith.mulf %186, %168 : vector<32x32xf32>
    %196 = arith.mulf %180, %188 : vector<32x32xf32>
    %197 = arith.addf %195, %196 : vector<32x32xf32>
    %198 = math.tanh %197 : vector<32x32xf32>
    %199 = arith.mulf %194, %198 : vector<32x32xf32>
    %c224 = arith.constant 224 : index
    %c0_41 = arith.constant 0 : index
    %200 = vector.load %arg4[%c224, %c0_41] : memref<384x128xf32, #tpu.memory_space<vmem>>, vector<32x128xf32>
    %201 = arith.truncf %199 : vector<32x32xf32> to vector<32x32xbf16>
    %cst_42 = arith.constant dense<0.000000e+00> : vector<32x128xf32>
    %202 = tpu.matmul %201, %7, %cst_42 {dimension_numbers = #tpu.dot_dimension_numbers<[1], [0], [0], [1], [0, 0, 1, 1], [], []>} : vector<32x32xbf16>, vector<32x128xbf16>, vector<32x128xf32> -> vector<32x128xf32>
    %203 = arith.addf %200, %202 : vector<32x128xf32>
    %204 = vector.extract_strided_slice %203 {offsets = [0, 0], sizes = [32, 32], strides = [1, 1]} : vector<32x128xf32> to vector<32x32xf32>
    %205 = arith.negf %204 : vector<32x32xf32>
    %206 = math.exp %205 : vector<32x32xf32>
    %cst_43 = arith.constant 1.000000e+00 : f32
    %207 = vector.broadcast %cst_43 : f32 to vector<32x32xf32>
    %208 = arith.addf %207, %206 : vector<32x32xf32>
    %209 = arith.divf %207, %208 : vector<32x32xf32>
    %210 = vector.extract_strided_slice %203 {offsets = [0, 32], sizes = [32, 32], strides = [1, 1]} : vector<32x128xf32> to vector<32x32xf32>
    %211 = arith.negf %210 : vector<32x32xf32>
    %212 = math.exp %211 : vector<32x32xf32>
    %cst_44 = arith.constant 1.000000e+00 : f32
    %213 = vector.broadcast %cst_44 : f32 to vector<32x32xf32>
    %214 = arith.addf %213, %212 : vector<32x32xf32>
    %215 = arith.divf %213, %214 : vector<32x32xf32>
    %216 = vector.extract_strided_slice %203 {offsets = [0, 64], sizes = [32, 32], strides = [1, 1]} : vector<32x128xf32> to vector<32x32xf32>
    %217 = math.tanh %216 : vector<32x32xf32>
    %218 = vector.extract_strided_slice %203 {offsets = [0, 96], sizes = [32, 32], strides = [1, 1]} : vector<32x128xf32> to vector<32x32xf32>
    %219 = arith.negf %218 : vector<32x32xf32>
    %220 = math.exp %219 : vector<32x32xf32>
    %cst_45 = arith.constant 1.000000e+00 : f32
    %221 = vector.broadcast %cst_45 : f32 to vector<32x32xf32>
    %222 = arith.addf %221, %220 : vector<32x32xf32>
    %223 = arith.divf %221, %222 : vector<32x32xf32>
    %224 = arith.mulf %215, %197 : vector<32x32xf32>
    %225 = arith.mulf %209, %217 : vector<32x32xf32>
    %226 = arith.addf %224, %225 : vector<32x32xf32>
    %227 = math.tanh %226 : vector<32x32xf32>
    %228 = arith.mulf %223, %227 : vector<32x32xf32>
    %c256 = arith.constant 256 : index
    %c0_46 = arith.constant 0 : index
    %229 = vector.load %arg4[%c256, %c0_46] : memref<384x128xf32, #tpu.memory_space<vmem>>, vector<32x128xf32>
    %230 = arith.truncf %228 : vector<32x32xf32> to vector<32x32xbf16>
    %cst_47 = arith.constant dense<0.000000e+00> : vector<32x128xf32>
    %231 = tpu.matmul %230, %7, %cst_47 {dimension_numbers = #tpu.dot_dimension_numbers<[1], [0], [0], [1], [0, 0, 1, 1], [], []>} : vector<32x32xbf16>, vector<32x128xbf16>, vector<32x128xf32> -> vector<32x128xf32>
    %232 = arith.addf %229, %231 : vector<32x128xf32>
    %233 = vector.extract_strided_slice %232 {offsets = [0, 0], sizes = [32, 32], strides = [1, 1]} : vector<32x128xf32> to vector<32x32xf32>
    %234 = arith.negf %233 : vector<32x32xf32>
    %235 = math.exp %234 : vector<32x32xf32>
    %cst_48 = arith.constant 1.000000e+00 : f32
    %236 = vector.broadcast %cst_48 : f32 to vector<32x32xf32>
    %237 = arith.addf %236, %235 : vector<32x32xf32>
    %238 = arith.divf %236, %237 : vector<32x32xf32>
    %239 = vector.extract_strided_slice %232 {offsets = [0, 32], sizes = [32, 32], strides = [1, 1]} : vector<32x128xf32> to vector<32x32xf32>
    %240 = arith.negf %239 : vector<32x32xf32>
    %241 = math.exp %240 : vector<32x32xf32>
    %cst_49 = arith.constant 1.000000e+00 : f32
    %242 = vector.broadcast %cst_49 : f32 to vector<32x32xf32>
    %243 = arith.addf %242, %241 : vector<32x32xf32>
    %244 = arith.divf %242, %243 : vector<32x32xf32>
    %245 = vector.extract_strided_slice %232 {offsets = [0, 64], sizes = [32, 32], strides = [1, 1]} : vector<32x128xf32> to vector<32x32xf32>
    %246 = math.tanh %245 : vector<32x32xf32>
    %247 = vector.extract_strided_slice %232 {offsets = [0, 96], sizes = [32, 32], strides = [1, 1]} : vector<32x128xf32> to vector<32x32xf32>
    %248 = arith.negf %247 : vector<32x32xf32>
    %249 = math.exp %248 : vector<32x32xf32>
    %cst_50 = arith.constant 1.000000e+00 : f32
    %250 = vector.broadcast %cst_50 : f32 to vector<32x32xf32>
    %251 = arith.addf %250, %249 : vector<32x32xf32>
    %252 = arith.divf %250, %251 : vector<32x32xf32>
    %253 = arith.mulf %244, %226 : vector<32x32xf32>
    %254 = arith.mulf %238, %246 : vector<32x32xf32>
    %255 = arith.addf %253, %254 : vector<32x32xf32>
    %256 = math.tanh %255 : vector<32x32xf32>
    %257 = arith.mulf %252, %256 : vector<32x32xf32>
    %c288 = arith.constant 288 : index
    %c0_51 = arith.constant 0 : index
    %258 = vector.load %arg4[%c288, %c0_51] : memref<384x128xf32, #tpu.memory_space<vmem>>, vector<32x128xf32>
    %259 = arith.truncf %257 : vector<32x32xf32> to vector<32x32xbf16>
    %cst_52 = arith.constant dense<0.000000e+00> : vector<32x128xf32>
    %260 = tpu.matmul %259, %7, %cst_52 {dimension_numbers = #tpu.dot_dimension_numbers<[1], [0], [0], [1], [0, 0, 1, 1], [], []>} : vector<32x32xbf16>, vector<32x128xbf16>, vector<32x128xf32> -> vector<32x128xf32>
    %261 = arith.addf %258, %260 : vector<32x128xf32>
    %262 = vector.extract_strided_slice %261 {offsets = [0, 0], sizes = [32, 32], strides = [1, 1]} : vector<32x128xf32> to vector<32x32xf32>
    %263 = arith.negf %262 : vector<32x32xf32>
    %264 = math.exp %263 : vector<32x32xf32>
    %cst_53 = arith.constant 1.000000e+00 : f32
    %265 = vector.broadcast %cst_53 : f32 to vector<32x32xf32>
    %266 = arith.addf %265, %264 : vector<32x32xf32>
    %267 = arith.divf %265, %266 : vector<32x32xf32>
    %268 = vector.extract_strided_slice %261 {offsets = [0, 32], sizes = [32, 32], strides = [1, 1]} : vector<32x128xf32> to vector<32x32xf32>
    %269 = arith.negf %268 : vector<32x32xf32>
    %270 = math.exp %269 : vector<32x32xf32>
    %cst_54 = arith.constant 1.000000e+00 : f32
    %271 = vector.broadcast %cst_54 : f32 to vector<32x32xf32>
    %272 = arith.addf %271, %270 : vector<32x32xf32>
    %273 = arith.divf %271, %272 : vector<32x32xf32>
    %274 = vector.extract_strided_slice %261 {offsets = [0, 64], sizes = [32, 32], strides = [1, 1]} : vector<32x128xf32> to vector<32x32xf32>
    %275 = math.tanh %274 : vector<32x32xf32>
    %276 = vector.extract_strided_slice %261 {offsets = [0, 96], sizes = [32, 32], strides = [1, 1]} : vector<32x128xf32> to vector<32x32xf32>
    %277 = arith.negf %276 : vector<32x32xf32>
    %278 = math.exp %277 : vector<32x32xf32>
    %cst_55 = arith.constant 1.000000e+00 : f32
    %279 = vector.broadcast %cst_55 : f32 to vector<32x32xf32>
    %280 = arith.addf %279, %278 : vector<32x32xf32>
    %281 = arith.divf %279, %280 : vector<32x32xf32>
    %282 = arith.mulf %273, %255 : vector<32x32xf32>
    %283 = arith.mulf %267, %275 : vector<32x32xf32>
    %284 = arith.addf %282, %283 : vector<32x32xf32>
    %285 = math.tanh %284 : vector<32x32xf32>
    %286 = arith.mulf %281, %285 : vector<32x32xf32>
    %c320 = arith.constant 320 : index
    %c0_56 = arith.constant 0 : index
    %287 = vector.load %arg4[%c320, %c0_56] : memref<384x128xf32, #tpu.memory_space<vmem>>, vector<32x128xf32>
    %288 = arith.truncf %286 : vector<32x32xf32> to vector<32x32xbf16>
    %cst_57 = arith.constant dense<0.000000e+00> : vector<32x128xf32>
    %289 = tpu.matmul %288, %7, %cst_57 {dimension_numbers = #tpu.dot_dimension_numbers<[1], [0], [0], [1], [0, 0, 1, 1], [], []>} : vector<32x32xbf16>, vector<32x128xbf16>, vector<32x128xf32> -> vector<32x128xf32>
    %290 = arith.addf %287, %289 : vector<32x128xf32>
    %291 = vector.extract_strided_slice %290 {offsets = [0, 0], sizes = [32, 32], strides = [1, 1]} : vector<32x128xf32> to vector<32x32xf32>
    %292 = arith.negf %291 : vector<32x32xf32>
    %293 = math.exp %292 : vector<32x32xf32>
    %cst_58 = arith.constant 1.000000e+00 : f32
    %294 = vector.broadcast %cst_58 : f32 to vector<32x32xf32>
    %295 = arith.addf %294, %293 : vector<32x32xf32>
    %296 = arith.divf %294, %295 : vector<32x32xf32>
    %297 = vector.extract_strided_slice %290 {offsets = [0, 32], sizes = [32, 32], strides = [1, 1]} : vector<32x128xf32> to vector<32x32xf32>
    %298 = arith.negf %297 : vector<32x32xf32>
    %299 = math.exp %298 : vector<32x32xf32>
    %cst_59 = arith.constant 1.000000e+00 : f32
    %300 = vector.broadcast %cst_59 : f32 to vector<32x32xf32>
    %301 = arith.addf %300, %299 : vector<32x32xf32>
    %302 = arith.divf %300, %301 : vector<32x32xf32>
    %303 = vector.extract_strided_slice %290 {offsets = [0, 64], sizes = [32, 32], strides = [1, 1]} : vector<32x128xf32> to vector<32x32xf32>
    %304 = math.tanh %303 : vector<32x32xf32>
    %305 = vector.extract_strided_slice %290 {offsets = [0, 96], sizes = [32, 32], strides = [1, 1]} : vector<32x128xf32> to vector<32x32xf32>
    %306 = arith.negf %305 : vector<32x32xf32>
    %307 = math.exp %306 : vector<32x32xf32>
    %cst_60 = arith.constant 1.000000e+00 : f32
    %308 = vector.broadcast %cst_60 : f32 to vector<32x32xf32>
    %309 = arith.addf %308, %307 : vector<32x32xf32>
    %310 = arith.divf %308, %309 : vector<32x32xf32>
    %311 = arith.mulf %302, %284 : vector<32x32xf32>
    %312 = arith.mulf %296, %304 : vector<32x32xf32>
    %313 = arith.addf %311, %312 : vector<32x32xf32>
    %314 = math.tanh %313 : vector<32x32xf32>
    %315 = arith.mulf %310, %314 : vector<32x32xf32>
    %c352 = arith.constant 352 : index
    %c0_61 = arith.constant 0 : index
    %316 = vector.load %arg4[%c352, %c0_61] : memref<384x128xf32, #tpu.memory_space<vmem>>, vector<32x128xf32>
    %317 = arith.truncf %315 : vector<32x32xf32> to vector<32x32xbf16>
    %cst_62 = arith.constant dense<0.000000e+00> : vector<32x128xf32>
    %318 = tpu.matmul %317, %7, %cst_62 {dimension_numbers = #tpu.dot_dimension_numbers<[1], [0], [0], [1], [0, 0, 1, 1], [], []>} : vector<32x32xbf16>, vector<32x128xbf16>, vector<32x128xf32> -> vector<32x128xf32>
    %319 = arith.addf %316, %318 : vector<32x128xf32>
    %320 = vector.extract_strided_slice %319 {offsets = [0, 0], sizes = [32, 32], strides = [1, 1]} : vector<32x128xf32> to vector<32x32xf32>
    %321 = arith.negf %320 : vector<32x32xf32>
    %322 = math.exp %321 : vector<32x32xf32>
    %cst_63 = arith.constant 1.000000e+00 : f32
    %323 = vector.broadcast %cst_63 : f32 to vector<32x32xf32>
    %324 = arith.addf %323, %322 : vector<32x32xf32>
    %325 = arith.divf %323, %324 : vector<32x32xf32>
    %326 = vector.extract_strided_slice %319 {offsets = [0, 32], sizes = [32, 32], strides = [1, 1]} : vector<32x128xf32> to vector<32x32xf32>
    %327 = arith.negf %326 : vector<32x32xf32>
    %328 = math.exp %327 : vector<32x32xf32>
    %cst_64 = arith.constant 1.000000e+00 : f32
    %329 = vector.broadcast %cst_64 : f32 to vector<32x32xf32>
    %330 = arith.addf %329, %328 : vector<32x32xf32>
    %331 = arith.divf %329, %330 : vector<32x32xf32>
    %332 = vector.extract_strided_slice %319 {offsets = [0, 64], sizes = [32, 32], strides = [1, 1]} : vector<32x128xf32> to vector<32x32xf32>
    %333 = math.tanh %332 : vector<32x32xf32>
    %334 = vector.extract_strided_slice %319 {offsets = [0, 96], sizes = [32, 32], strides = [1, 1]} : vector<32x128xf32> to vector<32x32xf32>
    %335 = arith.negf %334 : vector<32x32xf32>
    %336 = math.exp %335 : vector<32x32xf32>
    %cst_65 = arith.constant 1.000000e+00 : f32
    %337 = vector.broadcast %cst_65 : f32 to vector<32x32xf32>
    %338 = arith.addf %337, %336 : vector<32x32xf32>
    %339 = arith.divf %337, %338 : vector<32x32xf32>
    %340 = arith.mulf %331, %313 : vector<32x32xf32>
    %341 = arith.mulf %325, %333 : vector<32x32xf32>
    %342 = arith.addf %340, %341 : vector<32x32xf32>
    %343 = math.tanh %342 : vector<32x32xf32>
    %344 = arith.mulf %339, %343 : vector<32x32xf32>
    %c0_66 = arith.constant 0 : index
    %c0_67 = arith.constant 0 : index
    %345 = vector.load %arg3[%c0_66, %c0_67] : memref<32x32xf32, #tpu.memory_space<vmem>>, vector<32x32xf32>
    tpu.vector_store %arg3[%c0_66, %c0_67], %344 {strides = array<i32>} : memref<32x32xf32, #tpu.memory_space<vmem>>, vector<32x32xf32>,
    return
  }
}

</mosaic_0001>

<bundles_post_ra>
// kernel: pattern_lstm.1
= control target key start
LH: loop header
LB: loop body
LE: loop exit
PB: predicated region body
PF: predicated region fallthrough
CT: control target
= control target key end

     0   :  { %vm169_vm0 = vcmask 1040384   ;;  %s3962_s0 = inlined_call_operand.vmem [shape: f32[384,34], index: 0, kind: input, shape index: {}]   ;;  %s3963_s1 = inlined_call_operand.vmem [shape: f32[34,128], index: 1, kind: input, shape index: {}]   ;;  %s3964_s2 = inlined_call_operand.vmem [shape: f32[32,128], index: 2, kind: input, shape index: {}]   ;;  %s3965_s3 = inlined_call_operand.hbm [shape: f32[32,32], index: 3, kind: output, shape index: {}]  }
   0x1   :  { %v92_v0 = vld [vmem:[%s3963_s1 + $0x20] sm:$0x3]  ;;  %v90_v2 = vld [vmem:[%s3963_s1 + $0x10] sm:$0xff]  ;;  %v91_v3 = vld [vmem:[%s3963_s1 + $0x18] sm:$0xff] }
   0x2   :  { %v95_v1 = vpack.c.bf16 %v92_v0, %v92_v0 }
   0x4   :  { %v171_v4 = vsel %vm169_vm0, %v95_v1, 0 }
   0x5   :  { %8 = vsyncpa [#allocation4], 0  ;;  %178 = vmatpush.bf16.msra.mxu0 %v171_v4  ;;  %v94_v5 = vpack.c.bf16 %v91_v3, %v90_v2  ;;  %2712 = vmatpush.bf16.msra.mxu1 %v171_v4  ;;  %v88_v6 = vld [vmem:[%s3963_s1] sm:$0xff]  ;;  %v89_v7 = vld [vmem:[%s3963_s1 + $0x8] sm:$0xff]  ;;  %vm96_vm1 = vcmask 277504   ;;  %s3137_s29 = smov 64  }
   0x6   :  { %2713 = vmatpush.bf16.msra.mxu2 %v171_v4  ;;  %2714 = vmatpush.bf16.msra.mxu3 %v171_v4  ;;  %v93_v8 = vpack.c.bf16 %v89_v7, %v88_v6  ;;  %v16_v9 = vld [vmem:[%s3962_s0] sm:$0xff]  ;;  %v17_v10 = vld [vmem:[%s3962_s0 + $0x8] sm:$0xff]  ;;  %v18_v12 = vld [vmem:[%s3962_s0 + $0x10] sm:$0xff]  ;;  %s3138_s30 = smov 96   ;;  %s3139_s8 = smov 32  }
   0x7   :  { %v64_v11 = vpack.c.bf16 %v17_v10, %v16_v9  ;;  %v19_v13 = vld [vmem:[%s3962_s0 + $0x18] sm:$0xff]  ;;  %s2606_s22 = sshll.u32 %s3965_s3, 4  ;;  %s3142_s23 = smov 8   ;;  %s2607_s22 = int_to_ptr.hbm [resolvable:$true] %s2606_s22 }
   0x8   :  { %v65_v14 = vpack.c.bf16 %v19_v13, %v18_v12 }
   0x9   :  { %179 = vmatpush.bf16.msra.mxu0 %v94_v5  ;;  %2715 = vmatpush.bf16.msra.mxu1 %v94_v5 }
   0xa   :  { %2716 = vmatpush.bf16.msra.mxu2 %v94_v5  ;;  %2717 = vmatpush.bf16.msra.mxu3 %v94_v5 }
   0xd   :  { %180 = vmatpush.bf16.msra.mxu0 %v93_v8  ;;  %2718 = vmatpush.bf16.msra.mxu1 %v93_v8 }
   0xe   :  { %2719 = vmatpush.bf16.msra.mxu2 %v93_v8  ;;  %2720 = vmatpush.bf16.msra.mxu3 %v93_v8 }
  0x10   :  { %2618 = vmatmul.msk.bf16.vlgmr.msra.gmra.mxu0 %vm96_vm1, %v64_v11 }
  0x20   :  { %2619 = vmatmul.msk.bf16.gmra.mxu0 %vm96_vm1, %v65_v14 }
  0x8d   :  { %v182_v15 = vpop.f32.mrf.mxu0 }
  0x8e   :  { %2727 = vtanh.f32 %v182_v15  ;;  %v2642_v23 = vmul.f32 -1.442695, %v182_v15 }
  0x94   :  { %v2728_v16 = vpop.eup %2727 }
  0x95   :  { %444 = vrot.lane.b32.xlu0 %v2728_v16, %s3137_s29  ;;  %v184_v17 = vpop.f32.mrf.mxu0 }
  0x96   :  { %2729 = vtanh.f32 %v184_v17  ;;  %v2643_v24 = vmul.f32 -1.442695, %v184_v17 }
  0x9c   :  { %v2730_v18 = vpop.eup %2729 }
  0x9d   :  { %446 = vrot.lane.b32.xlu0 %v2730_v18, %s3137_s29  ;;  %v187_v19 = vpop.f32.mrf.mxu0 }
  0x9e   :  { %2731 = vtanh.f32 %v187_v19  ;;  %v2644_v27 = vmul.f32 -1.442695, %v187_v19 }
  0xa4   :  { %v2732_v20 = vpop.eup %2731 }
  0xa5   :  { %448 = vrot.lane.b32.xlu1 %v2732_v20, %s3137_s29  ;;  %v189_v21 = vpop.f32.mrf.mxu0 }
  0xa6   :  { %2733 = vtanh.f32 %v189_v21  ;;  %v2645_v31 = vmul.f32 -1.442695, %v189_v21 }
  0xa7   :  { %2735 = vpow2.f32 %v2642_v23  ;;  %v40_v23 = vld [vmem:[%s3962_s0 + $0xc0] sm:$0xff] }
  0xa8   :  { %2737 = vpow2.f32 %v2643_v24  ;;  %v41_v24 = vld [vmem:[%s3962_s0 + $0xc8] sm:$0xff] }
  0xac   :  { %v2734_v22 = vpop.eup %2733 }
  0xad   :  { %450 = vrot.lane.b32.xlu1 %v2734_v22, %s3137_s29  ;;  %v2736_v25 = vpop.eup %2735 }
  0xae   :  { %v372_v26 = vadd.f32 1.0, %v2736_v25  ;;  %v2738_v28 = vpop.eup %2737  ;;  %v76_v25 = vpack.c.bf16 %v41_v24, %v40_v23 }
  0xaf   :  { %v373_v29 = vadd.f32 1.0, %v2738_v28 }
  0xb0   :  { %2739 = vrcp.f32 %v372_v26  ;;  %v387_v44 = vand.u32 2147483648, %v372_v26  ;;  %vm381_vm3 = vweird.f32 %v372_v26  ;;  %v385_v45 = vand.u32 2147483647, %v372_v26  ;;  %2630 = vmatmul.msk.bf16.vlgmr.msra.gmra.mxu1 %vm96_vm1, %v76_v25 }
  0xb1   :  { %2741 = vpow2.f32 %v2644_v27  ;;  %v402_v56 = vand.u32 2147483648, %v373_v29  ;;  %vm396_vm7 = vweird.f32 %v373_v29  ;;  %v400_v57 = vand.u32 2147483647, %v373_v29 }
  0xb2   :  { %2743 = vrcp.f32 %v373_v29  ;;  %v388_v49 = vor.u32 1.1754944e-38, %v387_v44  ;;  %vm386_vm5 = vcmp.eq.f32.partialorder %v385_v45, 8.507059e+37 }
  0xb3   :  { %2745 = vpow2.f32 %v2645_v31  ;;  %v403_v61 = vor.u32 1.1754944e-38, %v402_v56  ;;  %vm401_vm9 = vcmp.eq.f32.partialorder %v400_v57, 8.507059e+37  ;;  %v42_v31 = vld [vmem:[%s3962_s0 + $0xd0] sm:$0xff]  ;;  %v23_v56 = vld [vmem:[%s3962_s0 + $0x38] sm:$0xff] }
  0xb6   :  { %v2740_v30 = vpop.eup %2739 }
  0xb7   :  { %v2742_v32 = vpop.eup %2741  ;;  %v377_v33 = vmul.f32 %v2740_v30, %v372_v26  ;;  %vm382_vm2 = vweird.f32 %v2740_v30 }
  0xb8   :  { %v374_v34 = vadd.f32 1.0, %v2742_v32  ;;  %v2744_v36 = vpop.eup %2743  ;;  %vm383_vm4 = vmor %vm381_vm3, %vm382_vm2  ;;  %v43_v32 = vld [vmem:[%s3962_s0 + $0xd8] sm:$0xff]  ;;  %vm496_vm3 = vcmask 261120  }
  0xb9   :  { %v378_v35 = vsub.f32 1.0, %v377_v33  ;;  %v2746_v37 = vpop.eup %2745  ;;  %v392_v39 = vmul.f32 %v2744_v36, %v373_v29  ;;  %vm397_vm6 = vweird.f32 %v2744_v36  ;;  %v77_v33 = vpack.c.bf16 %v43_v32, %v42_v31 }
  0xba   :  { %2747 = vrcp.f32 %v374_v34  ;;  %v3196_v40 = vadd.f32 1.0, %v2746_v37  ;;  %vm398_vm8 = vmor %vm396_vm7, %vm397_vm6  ;;  %v417_v4 = vand.u32 2147483648, %v374_v34  ;;  %vm411_vm11 = vweird.f32 %v374_v34 }
  0xbb   :  { %v379_v38 = vmul.f32 %v2740_v30, %v378_v35  ;;  %v393_v42 = vsub.f32 1.0, %v392_v39  ;;  %v415_v5 = vand.u32 2147483647, %v374_v34  ;;  %v353_v35 = vld [vmem:[%s3964_s2 + $0x18] sm:$0xff] }
  0xbc   :  { %2749 = vrcp.f32 %v3196_v40  ;;  %v418_v8 = vor.u32 1.1754944e-38, %v417_v4  ;;  %v432_v14 = vand.u32 2147483648, %v3196_v40  ;;  %vm426_vm15 = vweird.f32 %v3196_v40 }
  0xbd   :  { %v380_v41 = vadd.f32 %v2740_v30, %v379_v38  ;;  %v394_v47 = vmul.f32 %v2744_v36, %v393_v42  ;;  %vm416_vm13 = vcmp.eq.f32.partialorder %v415_v5, 8.507059e+37  ;;  %v430_v15 = vand.u32 2147483647, %v3196_v40  ;;  %v351_v38 = vld [vmem:[%s3964_s2 + $0x8] sm:$0xff] }
  0xbe   :  { %v433_v17 = vor.u32 1.1754944e-38, %v432_v14 }
  0xbf   :  { %v384_v46 = vsel %vm383_vm4, %v2740_v30, %v380_v41  ;;  %v395_v53 = vadd.f32 %v2744_v36, %v394_v47  ;;  %vm431_vm2 = vcmp.eq.f32.partialorder %v430_v15, 8.507059e+37  ;;  %v45_v41 = vld [vmem:[%s3962_s0 + $0xe8] sm:$0xff]  ;;  %v46_v47 = vld [vmem:[%s3962_s0 + $0xf0] sm:$0xff] }
  0xc0   :  { %v2748_v43 = vpop.eup %2747  ;;  %v3199_v51 = vsel %vm386_vm5, %v388_v49, %v384_v46  ;;  %2631 = vmatmul.msk.bf16.gmra.mxu1 %vm96_vm1, %v77_v33 }
  0xc1   :  { %v407_v48 = vmul.f32 %v2748_v43, %v374_v34  ;;  %v399_v58 = vsel %vm398_vm8, %v2744_v36, %v395_v53  ;;  %vm412_vm10 = vweird.f32 %v2748_v43  ;;  %v352_v34 = vld [vmem:[%s3964_s2 + $0x10] sm:$0xff]  ;;  %v350_v36 = vld [vmem:[%s3964_s2] sm:$0xff]  ;;  %v21_v53 = vld [vmem:[%s3962_s0 + $0x28] sm:$0xff]  ;;  %s3141_s2 = smov 128  }
  0xc2   :  { %v2750_v55 = vpop.eup %2749  ;;  %v404_v63 = vsel %vm401_vm9, %v403_v61, %v399_v58  ;;  %vm413_vm12 = vmor %vm411_vm11, %vm412_vm10  ;;  %v3247_v37 = vpack.c.bf16 %v353_v35, %v352_v34  ;;  %v3253_v39 = vpack.c.bf16 %v351_v38, %v350_v36 }
  0xc3   :  { %v408_v54 = vsub.f32 1.0, %v407_v48  ;;  %v422_v60 = vmul.f32 %v2750_v55, %v3196_v40  ;;  %vm427_vm14 = vweird.f32 %v2750_v55  ;;  %v44_v40 = vld [vmem:[%s3962_s0 + $0xe0] sm:$0xff]  ;;  %v47_v48 = vld [vmem:[%s3962_s0 + $0xf8] sm:$0xff] }
  0xc4   :  { %vm428_vm0 = vmor %vm426_vm15, %vm427_vm14  ;;  %509 = vmatpush.bf16.msrb.mxu1 %v3247_v37  ;;  %714 = vmatpush.bf16.msrb.mxu2 %v3247_v37  ;;  %v78_v42 = vpack.c.bf16 %v45_v41, %v44_v40 }
  0xc5   :  { %v409_v59 = vmul.f32 %v2748_v43, %v408_v54  ;;  %v423_v3 = vsub.f32 1.0, %v422_v60  ;;  %903 = vmatpush.bf16.msrb.mxu3 %v3247_v37 }
  0xc7   :  { %v410_v2 = vadd.f32 %v2748_v43, %v409_v59  ;;  %v424_v7 = vmul.f32 %v2750_v55, %v423_v3 }
  0xc8   :  { %510 = vmatpush.bf16.msrb.mxu1 %v3253_v39  ;;  %715 = vmatpush.bf16.msrb.mxu2 %v3253_v39 }
  0xc9   :  { %v414_v6 = vsel %vm413_vm12, %v2748_v43, %v410_v2  ;;  %v425_v13 = vadd.f32 %v2750_v55, %v424_v7  ;;  %904 = vmatpush.bf16.msrb.mxu3 %v3253_v39 }
  0xca   :  { %v419_v10 = vsel %vm416_vm13, %v418_v8, %v414_v6 }
  0xcb   :  { %v429_v16 = vsel %vm428_vm0, %v2750_v55, %v425_v13  ;;  %v22_v55 = vld [vmem:[%s3962_s0 + $0x30] sm:$0xff] }
  0xcc   :  { %v434_v19 = vsel %vm431_vm2, %v433_v17, %v429_v16  ;;  %1092 = vmatpush.bf16.msra.mxu1 %v3247_v37  ;;  %v67_v57 = vpack.c.bf16 %v23_v56, %v22_v55 }
  0xd0   :  { %1093 = vmatpush.bf16.msra.mxu1 %v3253_v39 }
  0xd1   :  { %2632 = vmatmul.msk.bf16.gmra.mxu1 %vm96_vm1, %v78_v42 }
 0x107   :  { %v445_v50 = vpop.permute.xlu0 %444 }
 0x108   :  { %v3202_v52 = vmul.f32 %v445_v50, %v3199_v51  ;;  %v79_v50 = vpack.c.bf16 %v47_v48, %v46_v47 }
 0x10a   :  { %2751 = vtanh.f32 %v3202_v52  ;;  %2633 = vmatmul.msk.bf16.gmra.mxu1 %vm96_vm1, %v79_v50 }
 0x10f   :  { %v447_v62 = vpop.permute.xlu0 %446 }
 0x110   :  { %v2752_v0 = vpop.eup %2751  ;;  %v3206_v1 = vmul.f32 %v447_v62, %v404_v63 }
 0x111   :  { %468 = vrot.lane.b32.xlu2 %v2752_v0, %s3138_s30 }
 0x112   :  { %2753 = vtanh.f32 %v3206_v1 }
 0x117   :  { %v449_v9 = vpop.permute.xlu1 %448 }
 0x118   :  { %v2754_v11 = vpop.eup %2753  ;;  %v3210_v12 = vmul.f32 %v449_v9, %v419_v10 }
 0x119   :  { %470 = vrot.lane.b32.xlu2 %v2754_v11, %s3138_s30 }
 0x11a   :  { %2755 = vtanh.f32 %v3210_v12 }
 0x11f   :  { %v451_v18 = vpop.permute.xlu1 %450 }
 0x120   :  { %v2756_v20 = vpop.eup %2755  ;;  %v3217_v21 = vmul.f32 %v451_v18, %v434_v19 }
 0x121   :  { %472 = vrot.lane.b32.xlu0 %v2756_v20, %s3138_s30 }
 0x122   :  { %2757 = vtanh.f32 %v3217_v21 }
 0x128   :  { %v2758_v22 = vpop.eup %2757 }
 0x129   :  { %474 = vrot.lane.b32.xlu1 %v2758_v22, %s3138_s30 }
 0x12d   :  { %v3294_v59 = vpop.f32.mrf.mxu1 }
 0x135   :  { %v3296_v60 = vpop.f32.mrf.mxu1 }
 0x13d   :  { %v3299_v62 = vpop.f32.mrf.mxu1 }
 0x16b   :  { %v469_v26 = vpop.permute.xlu2 %468 }
 0x16c   :  { %v480_v28 = vmul.f32 %v469_v26, %v3199_v51  ;;  %v20_v51 = vld [vmem:[%s3962_s0 + $0x20] sm:$0xff] }
 0x16d   :  { %v66_v54 = vpack.c.bf16 %v21_v53, %v20_v51 }
 0x16f   :  { %2620 = vmatmul.msk.bf16.gmra.mxu0 %vm96_vm1, %v66_v54 }
 0x173   :  { %v471_v27 = vpop.permute.xlu2 %470 }
 0x174   :  { %v481_v29 = vmul.f32 %v471_v27, %v404_v63  ;;  %v3301_v63 = vpop.f32.mrf.mxu1 }
 0x176   :  { %v488_v30 = vpack.c.bf16 %v481_v29, %v480_v28 }
 0x178   :  { %492 = vrot.lane.b32.xlu2 %v488_v30, %s3139_s8 }
 0x17c   :  { %v3303_v0 = vpop.f32.mrf.mxu1 }
 0x17f   :  { %2621 = vmatmul.msk.bf16.gmra.mxu0 %vm96_vm1, %v67_v57 }
 0x184   :  { %v3305_v2 = vpop.f32.mrf.mxu1 }
 0x18c   :  { %v3307_v3 = vpop.f32.mrf.mxu1 }
 0x193   :  { %v473_v43 = vpop.permute.xlu0 %472 }
 0x194   :  { %v482_v45 = vmul.f32 %v473_v43, %v419_v10  ;;  %v3309_v4 = vpop.f32.mrf.mxu1 }
 0x19b   :  { %v475_v44 = vpop.permute.xlu1 %474 }
 0x19c   :  { %v483_v46 = vmul.f32 %v475_v44, %v434_v19 }
 0x19e   :  { %v489_v49 = vpack.c.bf16 %v483_v46, %v482_v45 }
 0x1a0   :  { %494 = vrot.lane.b32.xlu0 %v489_v49, %s3139_s8 }
 0x1d2   :  { %v493_v58 = vpop.permute.xlu2 %492 }
 0x1d3   :  { %2646 = vmatmul.msk.bf16.vlgmr.msrb.gmra.mxu1 %vm496_vm3, %v493_v58 }
 0x1d4   :  { %1659 = vmatpush.bf16.msrb.mxu1 %v3247_v37 }
 0x1d8   :  { %1660 = vmatpush.bf16.msrb.mxu1 %v3253_v39 }
 0x1ec   :  { %v192_v5 = vpop.f32.mrf.mxu0 }
 0x1f4   :  { %v194_v8 = vpop.f32.mrf.mxu0 }
 0x1fc   :  { %v197_v15 = vpop.f32.mrf.mxu0 }
 0x204   :  { %v199_v19 = vpop.f32.mrf.mxu0 }
 0x212   :  { %v495_v61 = vpop.permute.xlu0 %494 }
 0x213   :  { %2647 = vmatmul.msk.bf16.gmra.mxu1 %vm496_vm3, %v495_v61 }
 0x250   :  { %v512_v6 = vpop.f32.mrf.mxu1 }
 0x251   :  { %v522_v7 = vadd.f32 %v512_v6, %v192_v5 }
 0x253   :  { %2759 = vtanh.f32 %v522_v7  ;;  %v2648_v25 = vmul.f32 -1.442695, %v522_v7 }
 0x258   :  { %v514_v9 = vpop.f32.mrf.mxu1 }
 0x259   :  { %v2760_v10 = vpop.eup %2759  ;;  %v523_v11 = vadd.f32 %v514_v9, %v194_v8 }
 0x25a   :  { %630 = vrot.lane.b32.xlu1 %v2760_v10, %s3137_s29 }
 0x25b   :  { %2761 = vtanh.f32 %v523_v11  ;;  %v2649_v14 = vmul.f32 -1.442695, %v523_v11 }
 0x25d   :  { %2763 = vpow2.f32 %v2649_v14 }
 0x261   :  { %v2762_v13 = vpop.eup %2761 }
 0x262   :  { %632 = vrot.lane.b32.xlu2 %v2762_v13, %s3137_s29 }
 0x263   :  { %v2764_v18 = vpop.eup %2763 }
 0x264   :  { %v539_v24 = vadd.f32 1.0, %v2764_v18 }
 0x266   :  { %v568_v34 = vand.u32 2147483648, %v539_v24  ;;  %vm562_vm5 = vweird.f32 %v539_v24  ;;  %v566_v35 = vand.u32 2147483647, %v539_v24 }
 0x268   :  { %v569_v38 = vor.u32 1.1754944e-38, %v568_v34  ;;  %vm567_vm7 = vcmp.eq.f32.partialorder %v566_v35, 8.507059e+37 }
 0x26a   :  { %610 = vrot.lane.b32.xlu2 %v3202_v52, %s3139_s8 }
 0x290   :  { %v517_v16 = vpop.f32.mrf.mxu1 }
 0x291   :  { %v524_v17 = vadd.f32 %v517_v16, %v197_v15 }
 0x293   :  { %2765 = vtanh.f32 %v524_v17  ;;  %v2650_v53 = vmul.f32 -1.442695, %v524_v17 }
 0x298   :  { %v519_v20 = vpop.f32.mrf.mxu1 }
 0x299   :  { %v2766_v22 = vpop.eup %2765  ;;  %v525_v23 = vadd.f32 %v519_v20, %v199_v19 }
 0x29a   :  { %634 = vrot.lane.b32.xlu0 %v2766_v22, %s3137_s29 }
 0x29b   :  { %2767 = vtanh.f32 %v525_v23  ;;  %v2651_v54 = vmul.f32 -1.442695, %v525_v23 }
 0x29c   :  { %2769 = vrcp.f32 %v539_v24 }
 0x29d   :  { %2771 = vpow2.f32 %v2648_v25 }
 0x2a1   :  { %v2768_v26 = vpop.eup %2767 }
 0x2a2   :  { %612 = vrot.lane.b32.xlu0 %v3206_v1, %s3139_s8  ;;  %636 = vrot.lane.b32.xlu1 %v2768_v26, %s3137_s29  ;;  %v2770_v52 = vpop.eup %2769 }
 0x2a3   :  { %v2772_v27 = vpop.eup %2771  ;;  %v558_v28 = vmul.f32 %v2770_v52, %v539_v24  ;;  %vm563_vm4 = vweird.f32 %v2770_v52 }
 0x2a4   :  { %v538_v29 = vadd.f32 1.0, %v2772_v27  ;;  %vm564_vm6 = vmor %vm562_vm5, %vm563_vm4 }
 0x2a5   :  { %v559_v30 = vsub.f32 1.0, %v558_v28 }
 0x2a6   :  { %2773 = vrcp.f32 %v538_v29  ;;  %v553_v45 = vand.u32 2147483648, %v538_v29  ;;  %vm547_vm9 = vweird.f32 %v538_v29  ;;  %v551_v46 = vand.u32 2147483647, %v538_v29 }
 0x2a7   :  { %v560_v31 = vmul.f32 %v2770_v52, %v559_v30  ;;  %2775 = vpow2.f32 %v2650_v53 }
 0x2a8   :  { %v554_v48 = vor.u32 1.1754944e-38, %v553_v45  ;;  %vm552_vm11 = vcmp.eq.f32.partialorder %v551_v46, 8.507059e+37  ;;  %2777 = vpow2.f32 %v2651_v54 }
 0x2a9   :  { %v561_v32 = vadd.f32 %v2770_v52, %v560_v31 }
 0x2aa   :  { %614 = vrot.lane.b32.xlu0 %v3210_v12, %s3139_s8 }
 0x2ab   :  { %v565_v1 = vsel %vm564_vm6, %v2770_v52, %v561_v32 }
 0x2ac   :  { %v2774_v33 = vpop.eup %2773  ;;  %v3321_v41 = vsel %vm567_vm7, %v569_v38, %v565_v1 }
 0x2ad   :  { %v543_v36 = vmul.f32 %v2774_v33, %v538_v29  ;;  %vm548_vm8 = vweird.f32 %v2774_v33  ;;  %v2776_v55 = vpop.eup %2775 }
 0x2ae   :  { %vm549_vm10 = vmor %vm547_vm9, %vm548_vm8  ;;  %v540_v56 = vadd.f32 1.0, %v2776_v55  ;;  %v2778_v57 = vpop.eup %2777 }
 0x2af   :  { %v544_v42 = vsub.f32 1.0, %v543_v36  ;;  %v541_v58 = vadd.f32 1.0, %v2778_v57  ;;  %v49_v57 = vld [vmem:[%s3962_s0 + $0x108] sm:$0xff] }
 0x2b0   :  { %2779 = vrcp.f32 %v540_v56  ;;  %vm577_vm13 = vweird.f32 %v540_v56  ;;  %v581_v13 = vand.u32 2147483647, %v540_v56 }
 0x2b1   :  { %v545_v43 = vmul.f32 %v2774_v33, %v544_v42  ;;  %2781 = vrcp.f32 %v541_v58  ;;  %v598_v22 = vand.u32 2147483648, %v541_v58  ;;  %vm592_vm2 = vweird.f32 %v541_v58 }
 0x2b2   :  { %vm582_vm15 = vcmp.eq.f32.partialorder %v581_v13, 8.507059e+37  ;;  %v596_v23 = vand.u32 2147483647, %v541_v58  ;;  %v26_v13 = vld [vmem:[%s3962_s0 + $0x50] sm:$0xff] }
 0x2b3   :  { %v546_v44 = vadd.f32 %v2774_v33, %v545_v43  ;;  %v599_v26 = vor.u32 1.1754944e-38, %v598_v22 }
 0x2b4   :  { %vm597_vm5 = vcmp.eq.f32.partialorder %v596_v23, 8.507059e+37 }
 0x2b5   :  { %v550_v47 = vsel %vm549_vm10, %v2774_v33, %v546_v44 }
 0x2b6   :  { %v3325_v49 = vsel %vm552_vm11, %v554_v48, %v550_v47  ;;  %v2780_v61 = vpop.eup %2779 }
 0x2b7   :  { %v573_v5 = vmul.f32 %v2780_v61, %v540_v56  ;;  %v2782_v7 = vpop.eup %2781  ;;  %vm578_vm12 = vweird.f32 %v2780_v61 }
 0x2b8   :  { %v588_v9 = vmul.f32 %v2782_v7, %v541_v58  ;;  %vm579_vm14 = vmor %vm577_vm13, %vm578_vm12  ;;  %vm593_vm0 = vweird.f32 %v2782_v7 }
 0x2b9   :  { %v574_v6 = vsub.f32 1.0, %v573_v5  ;;  %vm594_vm4 = vmor %vm592_vm2, %vm593_vm0  ;;  %v24_v5 = vld [vmem:[%s3962_s0 + $0x40] sm:$0xff] }
 0x2ba   :  { %v589_v11 = vsub.f32 1.0, %v588_v9 }
 0x2bb   :  { %v575_v8 = vmul.f32 %v2780_v61, %v574_v6  ;;  %v25_v6 = vld [vmem:[%s3962_s0 + $0x48] sm:$0xff] }
 0x2bc   :  { %v633_v40 = vpop.permute.xlu2 %632  ;;  %v590_v15 = vmul.f32 %v2782_v7, %v589_v11 }
 0x2bd   :  { %v643_v12 = vmul.f32 %v633_v40, %v3321_v41  ;;  %v576_v10 = vadd.f32 %v2780_v61, %v575_v8 }
 0x2be   :  { %v591_v20 = vadd.f32 %v2782_v7, %v590_v15 }
 0x2bf   :  { %652 = vrot.lane.b32.xlu2 %v643_v12, %s3139_s8  ;;  %v580_v14 = vsel %vm579_vm14, %v2780_v61, %v576_v10 }
 0x2c0   :  { %v595_v25 = vsel %vm594_vm4, %v2782_v7, %v591_v20  ;;  %v68_v7 = vpack.c.bf16 %v25_v6, %v24_v5 }
 0x2c1   :  { %v600_v27 = vsel %vm597_vm5, %v599_v26, %v595_v25 }
 0x2c2   :  { %2622 = vmatmul.msk.bf16.gmra.mxu0 %vm96_vm1, %v68_v7 }
 0x2c4   :  { %v611_v24 = vpop.permute.xlu2 %610 }
 0x2c5   :  { %v622_v34 = vmul.f32 %v611_v24, %v3325_v49 }
 0x2cc   :  { %v631_v50 = vpop.permute.xlu1 %630 }
 0x2cd   :  { %v642_v51 = vmul.f32 %v631_v50, %v3325_v49 }
 0x2cf   :  { %650 = vrot.lane.b32.xlu1 %v642_v51, %s3139_s8 }
 0x2d7   :  { %616 = vrot.lane.b32.xlu1 %v3217_v21, %s3139_s8  ;;  %v583_v21 = vand.u32 2147483648, %v540_v56  ;;  %v48_v56 = vld [vmem:[%s3962_s0 + $0x100] sm:$0xff] }
 0x2d8   :  { %v80_v58 = vpack.c.bf16 %v49_v57, %v48_v56 }
 0x2d9   :  { %v584_v16 = vor.u32 1.1754944e-38, %v583_v21 }
 0x2da   :  { %2634 = vmatmul.msk.bf16.vlgmr.msra.gmra.mxu2 %vm96_vm1, %v80_v58 }
 0x2db   :  { %v3331_v18 = vsel %vm582_vm15, %v584_v16, %v580_v14  ;;  %1281 = vmatpush.bf16.msra.mxu2 %v3247_v37  ;;  %v27_v14 = vld [vmem:[%s3962_s0 + $0x58] sm:$0xff] }
 0x2dc   :  { %v69_v15 = vpack.c.bf16 %v27_v14, %v26_v13 }
 0x2de   :  { %2623 = vmatmul.msk.bf16.gmra.mxu0 %vm96_vm1, %v69_v15 }
 0x2df   :  { %1282 = vmatpush.bf16.msra.mxu2 %v3253_v39 }
 0x30c   :  { %v635_v17 = vpop.permute.xlu0 %634 }
 0x30d   :  { %v644_v19 = vmul.f32 %v635_v17, %v3331_v18 }
 0x30f   :  { %654 = vrot.lane.b32.xlu2 %v644_v19, %s3139_s8 }
 0x314   :  { %v637_v52 = vpop.permute.xlu1 %636  ;;  %v613_v28 = vpop.permute.xlu0 %612 }
 0x315   :  { %v645_v29 = vmul.f32 %v637_v52, %v600_v27  ;;  %v623_v30 = vmul.f32 %v613_v28, %v3321_v41 }
 0x317   :  { %656 = vrot.lane.b32.xlu0 %v645_v29, %s3139_s8 }
 0x319   :  { %v653_v31 = vpop.permute.xlu2 %652 }
 0x31a   :  { %v3337_v32 = vadd.f32 %v653_v31, %v623_v30 }
 0x31c   :  { %2783 = vtanh.f32 %v3337_v32  ;;  %v615_v38 = vpop.permute.xlu0 %614 }
 0x31d   :  { %v624_v40 = vmul.f32 %v615_v38, %v3331_v18 }
 0x322   :  { %v2784_v33 = vpop.eup %2783 }
 0x323   :  { %676 = vrot.lane.b32.xlu2 %v2784_v33, %s3137_s29 }
 0x33f   :  { %v202_v23 = vpop.f32.mrf.mxu0 }
 0x341   :  { %v651_v35 = vpop.permute.xlu1 %650 }
 0x342   :  { %v3342_v1 = vadd.f32 %v651_v35, %v622_v34 }
 0x344   :  { %2785 = vtanh.f32 %v3342_v1 }
 0x347   :  { %v204_v26 = vpop.f32.mrf.mxu0 }
 0x349   :  { %v617_v44 = vpop.permute.xlu1 %616 }
 0x34a   :  { %v2786_v36 = vpop.eup %2785  ;;  %v625_v45 = vmul.f32 %v617_v44, %v600_v27 }
 0x34b   :  { %674 = vrot.lane.b32.xlu1 %v2786_v36, %s3137_s29 }
 0x35d   :  { %v3393_v17 = vpop.f32.mrf.mxu2 }
 0x365   :  { %v3396_v19 = vpop.f32.mrf.mxu2 }
 0x369   :  { %v655_v12 = vpop.permute.xlu2 %654 }
 0x36a   :  { %v3347_v42 = vadd.f32 %v655_v12, %v624_v40  ;;  %v207_v12 = vpop.f32.mrf.mxu0 }
 0x36c   :  { %2787 = vtanh.f32 %v3347_v42 }
 0x372   :  { %v2788_v43 = vpop.eup %2787 }
 0x373   :  { %678 = vrot.lane.b32.xlu0 %v2788_v43, %s3137_s29 }
 0x37d   :  { %v677_v50 = vpop.permute.xlu2 %676 }
 0x37e   :  { %v687_v53 = vmul.f32 %v677_v50, %v3321_v41  ;;  %v50_v41 = vld [vmem:[%s3962_s0 + $0x110] sm:$0xff]  ;;  %v209_v50 = vpop.f32.mrf.mxu0 }
 0x389   :  { %v657_v46 = vpop.permute.xlu0 %656 }
 0x38a   :  { %v3351_v47 = vadd.f32 %v657_v46, %v625_v45 }
 0x38c   :  { %2789 = vtanh.f32 %v3351_v47 }
 0x392   :  { %v2790_v48 = vpop.eup %2789 }
 0x393   :  { %680 = vrot.lane.b32.xlu1 %v2790_v48, %s3137_s29 }
 0x3bd   :  { %v675_v51 = vpop.permute.xlu1 %674 }
 0x3be   :  { %v686_v54 = vmul.f32 %v675_v51, %v3325_v49  ;;  %v51_v49 = vld [vmem:[%s3962_s0 + $0x118] sm:$0xff] }
 0x3bf   :  { %v81_v61 = vpack.c.bf16 %v51_v49, %v50_v41 }
 0x3c0   :  { %v694_v55 = vpack.c.bf16 %v687_v53, %v686_v54 }
 0x3c1   :  { %2635 = vmatmul.msk.bf16.gmra.mxu2 %vm96_vm1, %v81_v61 }
 0x3c2   :  { %698 = vrot.lane.b32.xlu2 %v694_v55, %s3139_s8 }
 0x3e5   :  { %v679_v8 = vpop.permute.xlu0 %678 }
 0x3e6   :  { %v688_v10 = vmul.f32 %v679_v8, %v3331_v18 }
 0x405   :  { %v681_v9 = vpop.permute.xlu1 %680 }
 0x406   :  { %v689_v11 = vmul.f32 %v681_v9, %v600_v27 }
 0x408   :  { %v695_v21 = vpack.c.bf16 %v689_v11, %v688_v10 }
 0x40a   :  { %700 = vrot.lane.b32.xlu0 %v695_v21, %s3139_s8 }
 0x41c   :  { %v699_v16 = vpop.permute.xlu2 %698 }
 0x41d   :  { %2652 = vmatmul.msk.bf16.vlgmr.msrb.gmra.mxu2 %vm496_vm3, %v699_v16 }
 0x41e   :  { %1848 = vmatpush.bf16.msrb.mxu2 %v3247_v37 }
 0x422   :  { %1849 = vmatpush.bf16.msrb.mxu2 %v3253_v39 }
 0x444   :  { %v3398_v20 = vpop.f32.mrf.mxu2 }
 0x44c   :  { %v3400_v22 = vpop.f32.mrf.mxu2 }
 0x47c   :  { %v701_v18 = vpop.permute.xlu0 %700 }
 0x47d   :  { %2653 = vmatmul.msk.bf16.gmra.mxu2 %vm496_vm3, %v701_v18 }
 0x4a0   :  { %v717_v24 = vpop.f32.mrf.mxu2 }
 0x4a1   :  { %v727_v25 = vadd.f32 %v717_v24, %v202_v23 }
 0x4a3   :  { %2791 = vtanh.f32 %v727_v25  ;;  %v2654_v33 = vmul.f32 -1.442695, %v727_v25 }
 0x4a8   :  { %v719_v52 = vpop.f32.mrf.mxu2 }
 0x4a9   :  { %v2792_v27 = vpop.eup %2791  ;;  %v728_v28 = vadd.f32 %v719_v52, %v204_v26 }
 0x4aa   :  { %819 = vrot.lane.b32.xlu1 %v2792_v27, %s3137_s29 }
 0x4ab   :  { %2793 = vtanh.f32 %v728_v28  ;;  %v2655_v30 = vmul.f32 -1.442695, %v728_v28 }
 0x4ad   :  { %2795 = vpow2.f32 %v2655_v30 }
 0x4ae   :  { %2797 = vpow2.f32 %v2654_v33 }
 0x4b1   :  { %v2794_v29 = vpop.eup %2793 }
 0x4b2   :  { %821 = vrot.lane.b32.xlu2 %v2794_v29, %s3137_s29 }
 0x4b3   :  { %v2796_v31 = vpop.eup %2795 }
 0x4b4   :  { %v744_v34 = vadd.f32 1.0, %v2796_v31  ;;  %v2798_v35 = vpop.eup %2797 }
 0x4b5   :  { %v743_v38 = vadd.f32 1.0, %v2798_v35 }
 0x4b6   :  { %2799 = vrcp.f32 %v744_v34  ;;  %v773_v56 = vand.u32 2147483648, %v744_v34  ;;  %vm767_vm7 = vweird.f32 %v744_v34  ;;  %v771_v58 = vand.u32 2147483647, %v744_v34 }
 0x4b7   :  { %2801 = vrcp.f32 %v743_v38  ;;  %v758_v11 = vand.u32 2147483648, %v743_v38  ;;  %vm752_vm11 = vweird.f32 %v743_v38  ;;  %v756_v21 = vand.u32 2147483647, %v743_v38 }
 0x4b8   :  { %v774_v61 = vor.u32 1.1754944e-38, %v773_v56  ;;  %vm772_vm9 = vcmp.eq.f32.partialorder %v771_v58, 8.507059e+37 }
 0x4b9   :  { %v759_v14 = vor.u32 1.1754944e-38, %v758_v11  ;;  %vm757_vm13 = vcmp.eq.f32.partialorder %v756_v21, 8.507059e+37 }
 0x4bc   :  { %v2800_v36 = vpop.eup %2799 }
 0x4bd   :  { %v763_v40 = vmul.f32 %v2800_v36, %v744_v34  ;;  %v2802_v48 = vpop.eup %2801  ;;  %vm768_vm6 = vweird.f32 %v2800_v36 }
 0x4be   :  { %v748_v57 = vmul.f32 %v2802_v48, %v743_v38  ;;  %vm769_vm8 = vmor %vm767_vm7, %vm768_vm6  ;;  %vm753_vm10 = vweird.f32 %v2802_v48 }
 0x4bf   :  { %v764_v44 = vsub.f32 1.0, %v763_v40  ;;  %vm754_vm12 = vmor %vm752_vm11, %vm753_vm10 }
 0x4c0   :  { %v749_v5 = vsub.f32 1.0, %v748_v57 }
 0x4c1   :  { %v765_v46 = vmul.f32 %v2800_v36, %v764_v44 }
 0x4c2   :  { %v750_v9 = vmul.f32 %v2802_v48, %v749_v5 }
 0x4c3   :  { %v766_v53 = vadd.f32 %v2800_v36, %v765_v46 }
 0x4c4   :  { %v751_v10 = vadd.f32 %v2802_v48, %v750_v9 }
 0x4c5   :  { %v770_v41 = vsel %vm769_vm8, %v2800_v36, %v766_v53 }
 0x4c6   :  { %v3405_v6 = vsel %vm772_vm9, %v774_v61, %v770_v41  ;;  %v755_v13 = vsel %vm754_vm12, %v2802_v48, %v751_v10 }
 0x4c7   :  { %v3410_v16 = vsel %vm757_vm13, %v759_v14, %v755_v13  ;;  %v812_v41 = vmul.f32 %v3405_v6, %v3337_v32  ;;  %v52_v32 = vld [vmem:[%s3962_s0 + $0x120] sm:$0xff]  ;;  %v53_v13 = vld [vmem:[%s3962_s0 + $0x128] sm:$0xff] }
 0x4c8   :  { %v82_v14 = vpack.c.bf16 %v53_v13, %v52_v32 }
 0x4ca   :  { %2636 = vmatmul.msk.bf16.vlgmr.msra.gmra.mxu3 %vm96_vm1, %v82_v14 }
 0x4cb   :  { %1470 = vmatpush.bf16.msra.mxu3 %v3247_v37 }
 0x4cf   :  { %1471 = vmatpush.bf16.msra.mxu3 %v3253_v39 }
 0x500   :  { %v722_v43 = vpop.f32.mrf.mxu2 }
 0x501   :  { %v729_v45 = vadd.f32 %v722_v43, %v207_v12  ;;  %v811_v12 = vmul.f32 %v3410_v16, %v3342_v1 }
 0x503   :  { %2803 = vtanh.f32 %v729_v45  ;;  %v2656_v23 = vmul.f32 -1.442695, %v729_v45 }
 0x508   :  { %v724_v51 = vpop.f32.mrf.mxu2 }
 0x509   :  { %v2804_v54 = vpop.eup %2803  ;;  %v730_v55 = vadd.f32 %v724_v51, %v209_v50 }
 0x50a   :  { %823 = vrot.lane.b32.xlu0 %v2804_v54, %s3137_s29 }
 0x50b   :  { %2805 = vtanh.f32 %v730_v55  ;;  %v2657_v24 = vmul.f32 -1.442695, %v730_v55 }
 0x50c   :  { %v822_v49 = vpop.permute.xlu2 %821  ;;  %2807 = vpow2.f32 %v2656_v23  ;;  %v54_v23 = vld [vmem:[%s3962_s0 + $0x130] sm:$0xff] }
 0x50d   :  { %v832_v7 = vmul.f32 %v822_v49, %v3405_v6  ;;  %2809 = vpow2.f32 %v2657_v24  ;;  %v55_v24 = vld [vmem:[%s3962_s0 + $0x138] sm:$0xff] }
 0x511   :  { %v2806_v8 = vpop.eup %2805 }
 0x512   :  { %841 = vrot.lane.b32.xlu0 %v832_v7, %s3139_s8  ;;  %825 = vrot.lane.b32.xlu1 %v2806_v8, %s3137_s29  ;;  %v2808_v25 = vpop.eup %2807 }
 0x513   :  { %v745_v26 = vadd.f32 1.0, %v2808_v25  ;;  %v2810_v52 = vpop.eup %2809 }
 0x514   :  { %v746_v27 = vadd.f32 1.0, %v2810_v52 }
 0x515   :  { %2811 = vrcp.f32 %v745_v26  ;;  %v788_v38 = vand.u32 2147483648, %v745_v26  ;;  %vm782_vm15 = vweird.f32 %v745_v26  ;;  %v786_v40 = vand.u32 2147483647, %v745_v26 }
 0x516   :  { %2813 = vrcp.f32 %v746_v27  ;;  %v803_v55 = vand.u32 2147483648, %v746_v27  ;;  %vm797_vm5 = vweird.f32 %v746_v27  ;;  %v801_v1 = vand.u32 2147483647, %v746_v27 }
 0x517   :  { %v789_v48 = vor.u32 1.1754944e-38, %v788_v38  ;;  %vm787_vm2 = vcmp.eq.f32.partialorder %v786_v40, 8.507059e+37  ;;  %v61_v38 = vld [vmem:[%s3962_s0 + $0x168] sm:$0xff] }
 0x518   :  { %v804_v58 = vor.u32 1.1754944e-38, %v803_v55  ;;  %vm802_vm7 = vcmp.eq.f32.partialorder %v801_v1, 8.507059e+37 }
 0x51b   :  { %v2812_v28 = vpop.eup %2811 }
 0x51c   :  { %v820_v15 = vpop.permute.xlu1 %819  ;;  %v778_v29 = vmul.f32 %v2812_v28, %v745_v26  ;;  %v2814_v31 = vpop.eup %2813  ;;  %vm783_vm14 = vweird.f32 %v2812_v28  ;;  %v83_v26 = vpack.c.bf16 %v55_v24, %v54_v23 }
 0x51d   :  { %v831_v18 = vmul.f32 %v820_v15, %v3410_v16  ;;  %v793_v34 = vmul.f32 %v2814_v31, %v746_v27  ;;  %vm784_vm0 = vmor %vm782_vm15, %vm783_vm14  ;;  %vm798_vm4 = vweird.f32 %v2814_v31 }
 0x51e   :  { %v779_v30 = vsub.f32 1.0, %v778_v29  ;;  %vm799_vm6 = vmor %vm797_vm5, %vm798_vm4  ;;  %2637 = vmatmul.msk.bf16.gmra.mxu3 %vm96_vm1, %v83_v26 }
 0x51f   :  { %839 = vrot.lane.b32.xlu2 %v831_v18, %s3139_s8  ;;  %v794_v36 = vsub.f32 1.0, %v793_v34 }
 0x520   :  { %v780_v33 = vmul.f32 %v2812_v28, %v779_v30  ;;  %v56_v30 = vld [vmem:[%s3962_s0 + $0x140] sm:$0xff] }
 0x521   :  { %v795_v45 = vmul.f32 %v2814_v31, %v794_v36  ;;  %v60_v36 = vld [vmem:[%s3962_s0 + $0x160] sm:$0xff] }
 0x522   :  { %v781_v35 = vadd.f32 %v2812_v28, %v780_v33  ;;  %v86_v40 = vpack.c.bf16 %v61_v38, %v60_v36 }
 0x523   :  { %v796_v54 = vadd.f32 %v2814_v31, %v795_v45  ;;  %v28_v45 = vld [vmem:[%s3962_s0 + $0x60] sm:$0xff] }
 0x524   :  { %v785_v44 = vsel %vm784_vm0, %v2812_v28, %v781_v35 }
 0x525   :  { %v3419_v51 = vsel %vm787_vm2, %v789_v48, %v785_v44  ;;  %v800_v56 = vsel %vm799_vm6, %v2814_v31, %v796_v54  ;;  %v57_v31 = vld [vmem:[%s3962_s0 + $0x148] sm:$0xff] }
 0x526   :  { %v805_v5 = vsel %vm802_vm7, %v804_v58, %v800_v56  ;;  %v84_v34 = vpack.c.bf16 %v57_v31, %v56_v30  ;;  %v29_v48 = vld [vmem:[%s3962_s0 + $0x68] sm:$0xff]  ;;  %v31_v58 = vld [vmem:[%s3962_s0 + $0x78] sm:$0xff] }
 0x527   :  { %v814_v10 = vmul.f32 %v805_v5, %v3351_v47  ;;  %v813_v47 = vmul.f32 %v3419_v51, %v3347_v42 }
 0x52e   :  { %2638 = vmatmul.msk.bf16.gmra.mxu3 %vm96_vm1, %v84_v34 }
 0x579   :  { %v840_v43 = vpop.permute.xlu2 %839 }
 0x57a   :  { %v3416_v46 = vadd.f32 %v840_v43, %v811_v12  ;;  %v62_v12 = vld [vmem:[%s3962_s0 + $0x170] sm:$0xff]  ;;  %v63_v43 = vld [vmem:[%s3962_s0 + $0x178] sm:$0xff] }
 0x57b   :  { %v87_v44 = vpack.c.bf16 %v63_v43, %v62_v12 }
 0x57c   :  { %2815 = vtanh.f32 %v3416_v46  ;;  %v824_v50 = vpop.permute.xlu0 %823 }
 0x57d   :  { %v833_v53 = vmul.f32 %v824_v50, %v3419_v51  ;;  %v70_v50 = vpack.c.bf16 %v29_v48, %v28_v45 }
 0x57f   :  { %843 = vrot.lane.b32.xlu1 %v833_v53, %s3139_s8  ;;  %2624 = vmatmul.msk.bf16.gmra.mxu0 %vm96_vm1, %v70_v50 }
 0x582   :  { %v2816_v57 = vpop.eup %2815 }
 0x583   :  { %863 = vrot.lane.b32.xlu0 %v2816_v57, %s3137_s29  ;;  %v30_v57 = vld [vmem:[%s3962_s0 + $0x70] sm:$0xff] }
 0x584   :  { %v842_v49 = vpop.permute.xlu0 %841  ;;  %v826_v61 = vpop.permute.xlu1 %825 }
 0x585   :  { %v3426_v7 = vadd.f32 %v842_v49, %v812_v41  ;;  %v834_v8 = vmul.f32 %v826_v61, %v805_v5  ;;  %v71_v41 = vpack.c.bf16 %v31_v58, %v30_v57 }
 0x587   :  { %2817 = vtanh.f32 %v3426_v7  ;;  %845 = vrot.lane.b32.xlu2 %v834_v8, %s3139_s8 }
 0x58d   :  { %v2818_v9 = vpop.eup %2817 }
 0x58e   :  { %865 = vrot.lane.b32.xlu1 %v2818_v9, %s3137_s29 }
 0x58f   :  { %2625 = vmatmul.msk.bf16.gmra.mxu0 %vm96_vm1, %v71_v41 }
 0x5e1   :  { %v846_v11 = vpop.permute.xlu2 %845 }
 0x5e2   :  { %v3432_v21 = vadd.f32 %v846_v11, %v814_v10 }
 0x5e4   :  { %2819 = vtanh.f32 %v3432_v21 }
 0x5ea   :  { %v2820_v15 = vpop.eup %2819 }
 0x5eb   :  { %869 = vrot.lane.b32.xlu0 %v2820_v15, %s3137_s29 }
 0x5f1   :  { %v844_v18 = vpop.permute.xlu1 %843 }
 0x5f2   :  { %v3453_v25 = vadd.f32 %v844_v18, %v813_v47 }
 0x5f4   :  { %2821 = vtanh.f32 %v3453_v25 }
 0x5f5   :  { %v864_v42 = vpop.permute.xlu0 %863 }
 0x5f6   :  { %v875_v28 = vmul.f32 %v864_v42, %v3410_v16  ;;  %v58_v16 = vld [vmem:[%s3962_s0 + $0x150] sm:$0xff] }
 0x5fa   :  { %v2822_v52 = vpop.eup %2821 }
 0x5fb   :  { %867 = vrot.lane.b32.xlu2 %v2822_v52, %s3137_s29 }
 0x5fc   :  { %v212_v23 = vpop.f32.mrf.mxu0 }
 0x600   :  { %v866_v27 = vpop.permute.xlu1 %865 }
 0x601   :  { %v876_v29 = vmul.f32 %v866_v27, %v3405_v6  ;;  %v59_v6 = vld [vmem:[%s3962_s0 + $0x158] sm:$0xff] }
 0x602   :  { %v85_v35 = vpack.c.bf16 %v59_v6, %v58_v16 }
 0x603   :  { %v883_v33 = vpack.c.bf16 %v876_v29, %v875_v28 }
 0x604   :  { %2639 = vmatmul.msk.bf16.gmra.mxu3 %vm96_vm1, %v85_v35  ;;  %v214_v52 = vpop.f32.mrf.mxu0 }
 0x605   :  { %887 = vrot.lane.b32.xlu1 %v883_v33, %s3139_s8 }
 0x60c   :  { %v217_v30 = vpop.f32.mrf.mxu0 }
 0x614   :  { %2640 = vmatmul.msk.bf16.gmra.mxu3 %vm96_vm1, %v86_v40  ;;  %v219_v34 = vpop.f32.mrf.mxu0 }
 0x624   :  { %2641 = vmatmul.msk.bf16.gmra.mxu3 %vm96_vm1, %v87_v44 }
 0x655   :  { %v868_v53 = vpop.permute.xlu2 %867 }
 0x656   :  { %v877_v55 = vmul.f32 %v868_v53, %v3419_v51  ;;  %v3508_v51 = vpop.f32.mrf.mxu3 }
 0x65d   :  { %v870_v54 = vpop.permute.xlu0 %869 }
 0x65e   :  { %v878_v1 = vmul.f32 %v870_v54, %v805_v5  ;;  %v3510_v61 = vpop.f32.mrf.mxu3 }
 0x660   :  { %v884_v56 = vpack.c.bf16 %v878_v1, %v877_v55 }
 0x662   :  { %889 = vrot.lane.b32.xlu2 %v884_v56, %s3139_s8 }
 0x666   :  { %v3512_v5 = vpop.f32.mrf.mxu3 }
 0x66e   :  { %v3514_v8 = vpop.f32.mrf.mxu3 }
 0x676   :  { %v3516_v9 = vpop.f32.mrf.mxu3 }
 0x677   :  { %v888_v49 = vpop.permute.xlu1 %887 }
 0x678   :  { %2658 = vmatmul.msk.bf16.vlgmr.msrb.gmra.mxu3 %vm496_vm3, %v888_v49 }
 0x679   :  { %2037 = vmatpush.bf16.msrb.mxu3 %v3247_v37 }
 0x67d   :  { %2038 = vmatpush.bf16.msrb.mxu3 %v3253_v39 }
 0x67e   :  { %v3518_v10 = vpop.f32.mrf.mxu3 }
 0x687   :  { %v3521_v32 = vpop.f32.mrf.mxu3 }
 0x68f   :  { %v3523_v13 = vpop.f32.mrf.mxu3 }
 0x697   :  { %v3525_v14 = vpop.f32.mrf.mxu3 }
 0x69f   :  { %v3527_v15 = vpop.f32.mrf.mxu3 }
 0x6a7   :  { %v3529_v47 = vpop.f32.mrf.mxu3 }
 0x6af   :  { %v3531_v18 = vpop.f32.mrf.mxu3 }
 0x6bc   :  { %v890_v11 = vpop.permute.xlu2 %889 }
 0x6bd   :  { %2659 = vmatmul.msk.bf16.gmra.mxu3 %vm496_vm3, %v890_v11 }
 0x6fb   :  { %v906_v24 = vpop.f32.mrf.mxu3 }
 0x6fc   :  { %v916_v26 = vadd.f32 %v906_v24, %v212_v23 }
 0x6fe   :  { %2823 = vtanh.f32 %v916_v26  ;;  %v2660_v36 = vmul.f32 -1.442695, %v916_v26 }
 0x703   :  { %v908_v42 = vpop.f32.mrf.mxu3 }
 0x704   :  { %v2824_v27 = vpop.eup %2823  ;;  %v917_v28 = vadd.f32 %v908_v42, %v214_v52 }
 0x705   :  { %1008 = vrot.lane.b32.xlu0 %v2824_v27, %s3137_s29 }
 0x706   :  { %2825 = vtanh.f32 %v917_v28  ;;  %v2661_v40 = vmul.f32 -1.442695, %v917_v28 }
 0x70c   :  { %v2826_v29 = vpop.eup %2825 }
 0x70d   :  { %1010 = vrot.lane.b32.xlu1 %v2826_v29, %s3137_s29 }
 0x740   :  { %v911_v31 = vpop.f32.mrf.mxu3 }
 0x741   :  { %v918_v33 = vadd.f32 %v911_v31, %v217_v30 }
 0x743   :  { %2827 = vtanh.f32 %v918_v33  ;;  %v2662_v24 = vmul.f32 -1.442695, %v918_v33 }
 0x748   :  { %v913_v16 = vpop.f32.mrf.mxu3 }
 0x749   :  { %v2828_v6 = vpop.eup %2827  ;;  %v919_v35 = vadd.f32 %v913_v16, %v219_v34 }
 0x74a   :  { %1012 = vrot.lane.b32.xlu2 %v2828_v6, %s3137_s29 }
 0x74b   :  { %2829 = vtanh.f32 %v919_v35 }
 0x74c   :  { %2831 = vpow2.f32 %v2660_v36 }
 0x74d   :  { %2833 = vpow2.f32 %v2661_v40 }
 0x751   :  { %v2830_v38 = vpop.eup %2829 }
 0x752   :  { %1014 = vrot.lane.b32.xlu0 %v2830_v38, %s3137_s29  ;;  %v2832_v12 = vpop.eup %2831 }
 0x753   :  { %v932_v43 = vadd.f32 1.0, %v2832_v12  ;;  %v2834_v44 = vpop.eup %2833 }
 0x754   :  { %v933_v45 = vadd.f32 1.0, %v2834_v44 }
 0x755   :  { %2835 = vrcp.f32 %v932_v43  ;;  %v947_v58 = vand.u32 2147483648, %v932_v43  ;;  %vm941_vm9 = vweird.f32 %v932_v43  ;;  %v945_v41 = vand.u32 2147483647, %v932_v43 }
 0x756   :  { %2837 = vrcp.f32 %v933_v45  ;;  %v962_v28 = vand.u32 2147483648, %v933_v45  ;;  %vm956_vm13 = vweird.f32 %v933_v45  ;;  %v960_v29 = vand.u32 2147483647, %v933_v45 }
 0x757   :  { %v948_v23 = vor.u32 1.1754944e-38, %v947_v58  ;;  %vm946_vm11 = vcmp.eq.f32.partialorder %v945_v41, 8.507059e+37  ;;  %2839 = vpow2.f32 %v2662_v24 }
 0x758   :  { %v963_v31 = vor.u32 1.1754944e-38, %v962_v28  ;;  %vm961_vm15 = vcmp.eq.f32.partialorder %v960_v29, 8.507059e+37 }
 0x75b   :  { %v2836_v48 = vpop.eup %2835 }
 0x75c   :  { %v937_v50 = vmul.f32 %v2836_v48, %v932_v43  ;;  %v2838_v54 = vpop.eup %2837  ;;  %vm942_vm8 = vweird.f32 %v2836_v48  ;;  %v2663_v43 = vmul.f32 -1.442695, %v919_v35 }
 0x75d   :  { %v952_v1 = vmul.f32 %v2838_v54, %v933_v45  ;;  %vm943_vm10 = vmor %vm941_vm9, %vm942_vm8  ;;  %vm957_vm12 = vweird.f32 %v2838_v54  ;;  %v2840_v6 = vpop.eup %2839 }
 0x75e   :  { %v938_v53 = vsub.f32 1.0, %v937_v50  ;;  %vm958_vm14 = vmor %vm956_vm13, %vm957_vm12  ;;  %v934_v36 = vadd.f32 1.0, %v2840_v6 }
 0x75f   :  { %v953_v57 = vsub.f32 1.0, %v952_v1 }
 0x760   :  { %v939_v55 = vmul.f32 %v2836_v48, %v938_v53  ;;  %2841 = vrcp.f32 %v934_v36  ;;  %vm971_vm2 = vweird.f32 %v934_v36  ;;  %v975_v50 = vand.u32 2147483647, %v934_v36 }
 0x761   :  { %v954_v11 = vmul.f32 %v2838_v54, %v953_v57  ;;  %2843 = vpow2.f32 %v2663_v43 }
 0x762   :  { %v940_v56 = vadd.f32 %v2836_v48, %v939_v55  ;;  %vm976_vm5 = vcmp.eq.f32.partialorder %v975_v50, 8.507059e+37 }
 0x763   :  { %v955_v27 = vadd.f32 %v2838_v54, %v954_v11 }
 0x764   :  { %v944_v49 = vsel %vm943_vm10, %v2836_v48, %v940_v56  ;;  %v977_v48 = vand.u32 2147483648, %v934_v36 }
 0x765   :  { %v3537_v52 = vsel %vm946_vm11, %v948_v23, %v944_v49  ;;  %v959_v30 = vsel %vm958_vm14, %v2838_v54, %v955_v27 }
 0x766   :  { %v3541_v16 = vsel %vm961_vm15, %v963_v31, %v959_v30  ;;  %v2842_v38 = vpop.eup %2841  ;;  %v978_v55 = vor.u32 1.1754944e-38, %v977_v48 }
 0x767   :  { %v967_v40 = vmul.f32 %v2842_v38, %v934_v36  ;;  %vm972_vm0 = vweird.f32 %v2842_v38  ;;  %v2844_v53 = vpop.eup %2843  ;;  %v1001_v31 = vmul.f32 %v3541_v16, %v3426_v7  ;;  %v1000_v36 = vmul.f32 %v3537_v52, %v3416_v46 }
 0x768   :  { %vm973_vm4 = vmor %vm971_vm2, %vm972_vm0  ;;  %v935_v1 = vadd.f32 1.0, %v2844_v53 }
 0x769   :  { %v968_v12 = vsub.f32 1.0, %v967_v40 }
 0x76a   :  { %2845 = vrcp.f32 %v935_v1  ;;  %v992_v24 = vand.u32 2147483648, %v935_v1  ;;  %vm986_vm7 = vweird.f32 %v935_v1 }
 0x76b   :  { %v969_v44 = vmul.f32 %v2842_v38, %v968_v12 }
 0x76c   :  { %v993_v27 = vor.u32 1.1754944e-38, %v992_v24 }
 0x76d   :  { %v970_v45 = vadd.f32 %v2842_v38, %v969_v44 }
 0x76f   :  { %v974_v54 = vsel %vm973_vm4, %v2842_v38, %v970_v45 }
 0x770   :  { %v979_v57 = vsel %vm976_vm5, %v978_v55, %v974_v54  ;;  %v2846_v35 = vpop.eup %2845 }
 0x771   :  { %v982_v41 = vmul.f32 %v2846_v35, %v935_v1  ;;  %vm987_vm6 = vweird.f32 %v2846_v35  ;;  %v1002_v7 = vmul.f32 %v979_v57, %v3453_v25 }
 0x772   :  { %vm988_vm8 = vmor %vm986_vm7, %vm987_vm6 }
 0x773   :  { %v983_v49 = vsub.f32 1.0, %v982_v41 }
 0x775   :  { %v984_v11 = vmul.f32 %v2846_v35, %v983_v49 }
 0x777   :  { %v1009_v26 = vpop.permute.xlu0 %1008  ;;  %v985_v23 = vadd.f32 %v2846_v35, %v984_v11  ;;  %v32_v11 = vld [vmem:[%s3962_s0 + $0x80] sm:$0xff] }
 0x778   :  { %v1020_v42 = vmul.f32 %v1009_v26, %v3537_v52  ;;  %v990_v26 = vand.u32 2147483647, %v935_v1 }
 0x77a   :  { %1028 = vrot.lane.b32.xlu1 %v1020_v42, %s3139_s8  ;;  %v989_v42 = vsel %vm988_vm8, %v2846_v35, %v985_v23  ;;  %vm991_vm9 = vcmp.eq.f32.partialorder %v990_v26, 8.507059e+37 }
 0x77b   :  { %v994_v29 = vsel %vm991_vm9, %v993_v27, %v989_v42 }
 0x77c   :  { %v1003_v46 = vmul.f32 %v994_v29, %v3432_v21 }
 0x77f   :  { %v1011_v34 = vpop.permute.xlu1 %1010 }
 0x780   :  { %v1021_v33 = vmul.f32 %v1011_v34, %v3541_v16 }
 0x782   :  { %1030 = vrot.lane.b32.xlu2 %v1021_v33, %s3139_s8 }
 0x7a4   :  { %v1013_v56 = vpop.permute.xlu2 %1012 }
 0x7a5   :  { %v1022_v58 = vmul.f32 %v1013_v56, %v979_v57 }
 0x7a7   :  { %1032 = vrot.lane.b32.xlu0 %v1022_v58, %s3139_s8 }
 0x7c4   :  { %v1015_v28 = vpop.permute.xlu0 %1014 }
 0x7c5   :  { %v1023_v30 = vmul.f32 %v1015_v28, %v994_v29 }
 0x7c7   :  { %1034 = vrot.lane.b32.xlu1 %v1023_v30, %s3139_s8 }
 0x7dc   :  { %v1031_v34 = vpop.permute.xlu2 %1030 }
 0x7dd   :  { %v3549_v33 = vadd.f32 %v1031_v34, %v1001_v31 }
 0x7df   :  { %2847 = vtanh.f32 %v3549_v33 }
 0x7e5   :  { %v2848_v6 = vpop.eup %2847 }
 0x7e6   :  { %1054 = vrot.lane.b32.xlu0 %v2848_v6, %s3137_s29 }
 0x7ec   :  { %v1029_v38 = vpop.permute.xlu1 %1028 }
 0x7ed   :  { %v3555_v40 = vadd.f32 %v1029_v38, %v1000_v36 }
 0x7ef   :  { %2849 = vtanh.f32 %v3555_v40 }
 0x7f5   :  { %v2850_v12 = vpop.eup %2849 }
 0x7f6   :  { %1052 = vrot.lane.b32.xlu2 %v2850_v12, %s3137_s29 }
 0x819   :  { %v1033_v43 = vpop.permute.xlu0 %1032 }
 0x81a   :  { %v3560_v44 = vadd.f32 %v1033_v43, %v1002_v7 }
 0x81c   :  { %2851 = vtanh.f32 %v3560_v44 }
 0x822   :  { %v2852_v45 = vpop.eup %2851 }
 0x823   :  { %1056 = vrot.lane.b32.xlu1 %v2852_v45, %s3137_s29 }
 0x839   :  { %v1035_v48 = vpop.permute.xlu1 %1034 }
 0x83a   :  { %v3565_v50 = vadd.f32 %v1035_v48, %v1003_v46 }
 0x83c   :  { %2853 = vtanh.f32 %v3565_v50 }
 0x842   :  { %v2854_v53 = vpop.eup %2853 }
 0x843   :  { %1058 = vrot.lane.b32.xlu2 %v2854_v53, %s3137_s29 }
 0x850   :  { %v1053_v54 = vpop.permute.xlu2 %1052 }
 0x851   :  { %v1064_v55 = vmul.f32 %v1053_v54, %v3537_v52  ;;  %v33_v52 = vld [vmem:[%s3962_s0 + $0x88] sm:$0xff] }
 0x852   :  { %v72_v23 = vpack.c.bf16 %v33_v52, %v32_v11 }
 0x854   :  { %2626 = vmatmul.msk.bf16.gmra.mxu0 %vm96_vm1, %v72_v23 }
 0x858   :  { %v1055_v25 = vpop.permute.xlu0 %1054 }
 0x859   :  { %v1065_v1 = vmul.f32 %v1055_v25, %v3541_v16  ;;  %v34_v16 = vld [vmem:[%s3962_s0 + $0x90] sm:$0xff] }
 0x85b   :  { %v1072_v56 = vpack.c.bf16 %v1065_v1, %v1064_v55 }
 0x85d   :  { %1076 = vrot.lane.b32.xlu0 %v1072_v56, %s3139_s8 }
 0x895   :  { %v1057_v58 = vpop.permute.xlu1 %1056 }
 0x896   :  { %v1066_v21 = vmul.f32 %v1057_v58, %v979_v57  ;;  %v35_v57 = vld [vmem:[%s3962_s0 + $0x98] sm:$0xff] }
 0x897   :  { %v73_v24 = vpack.c.bf16 %v35_v57, %v34_v16 }
 0x899   :  { %2627 = vmatmul.msk.bf16.gmra.mxu0 %vm96_vm1, %v73_v24 }
 0x89d   :  { %v1059_v35 = vpop.permute.xlu2 %1058 }
 0x89e   :  { %v1067_v41 = vmul.f32 %v1059_v35, %v994_v29 }
 0x8a0   :  { %v1073_v49 = vpack.c.bf16 %v1067_v41, %v1066_v21 }
 0x8a2   :  { %1078 = vrot.lane.b32.xlu1 %v1073_v49, %s3139_s8 }
 0x8cf   :  { %v1077_v26 = vpop.permute.xlu0 %1076 }
 0x8d0   :  { %2664 = vmatmul.msk.bf16.vlgmr.msra.gmra.mxu1 %vm496_vm3, %v1077_v26 }
 0x8d1   :  { %2226 = vmatpush.bf16.msra.mxu1 %v3247_v37  ;;  %v222_v27 = vpop.f32.mrf.mxu0 }
 0x8d5   :  { %2227 = vmatpush.bf16.msra.mxu1 %v3253_v39 }
 0x8d9   :  { %v224_v30 = vpop.f32.mrf.mxu0 }
 0x914   :  { %v1079_v42 = vpop.permute.xlu1 %1078 }
 0x915   :  { %2665 = vmatmul.msk.bf16.gmra.mxu1 %vm496_vm3, %v1079_v42 }
 0x916   :  { %v227_v43 = vpop.f32.mrf.mxu0 }
 0x91e   :  { %v229_v53 = vpop.f32.mrf.mxu0 }
 0x94d   :  { %v1095_v28 = vpop.f32.mrf.mxu1 }
 0x94e   :  { %v1105_v29 = vadd.f32 %v1095_v28, %v222_v27 }
 0x950   :  { %2855 = vtanh.f32 %v1105_v29  ;;  %v2666_v38 = vmul.f32 -1.442695, %v1105_v29 }
 0x955   :  { %v1097_v31 = vpop.f32.mrf.mxu1 }
 0x956   :  { %v2856_v34 = vpop.eup %2855  ;;  %v1106_v6 = vadd.f32 %v1097_v31, %v224_v30 }
 0x957   :  { %1197 = vrot.lane.b32.xlu2 %v2856_v34, %s3137_s29 }
 0x958   :  { %2857 = vtanh.f32 %v1106_v6  ;;  %v2667_v35 = vmul.f32 -1.442695, %v1106_v6 }
 0x959   :  { %2859 = vpow2.f32 %v2666_v38 }
 0x95e   :  { %v2858_v36 = vpop.eup %2857 }
 0x95f   :  { %1199 = vrot.lane.b32.xlu0 %v2858_v36, %s3137_s29  ;;  %v2860_v12 = vpop.eup %2859 }
 0x960   :  { %v1121_v7 = vadd.f32 1.0, %v2860_v12 }
 0x962   :  { %2861 = vrcp.f32 %v1121_v7  ;;  %v1136_v49 = vand.u32 2147483648, %v1121_v7  ;;  %vm1130_vm11 = vweird.f32 %v1121_v7  ;;  %v1134_v11 = vand.u32 2147483647, %v1121_v7 }
 0x964   :  { %v1137_v16 = vor.u32 1.1754944e-38, %v1136_v49  ;;  %vm1135_vm13 = vcmp.eq.f32.partialorder %v1134_v11, 8.507059e+37 }
 0x968   :  { %v2862_v48 = vpop.eup %2861 }
 0x969   :  { %v1126_v1 = vmul.f32 %v2862_v48, %v1121_v7  ;;  %vm1131_vm10 = vweird.f32 %v2862_v48 }
 0x96a   :  { %vm1132_vm12 = vmor %vm1130_vm11, %vm1131_vm10 }
 0x96b   :  { %v1127_v56 = vsub.f32 1.0, %v1126_v1 }
 0x96d   :  { %v1128_v21 = vmul.f32 %v2862_v48, %v1127_v56 }
 0x96f   :  { %v1129_v41 = vadd.f32 %v2862_v48, %v1128_v21 }
 0x971   :  { %v1133_v23 = vsel %vm1132_vm12, %v2862_v48, %v1129_v41 }
 0x972   :  { %v3595_v26 = vsel %vm1135_vm13, %v1137_v16, %v1133_v23 }
 0x992   :  { %v1100_v45 = vpop.f32.mrf.mxu1 }
 0x993   :  { %v1107_v46 = vadd.f32 %v1100_v45, %v227_v43 }
 0x995   :  { %2863 = vtanh.f32 %v1107_v46 }
 0x99a   :  { %v1102_v54 = vpop.f32.mrf.mxu1 }
 0x99b   :  { %v2864_v25 = vpop.eup %2863  ;;  %v1108_v55 = vadd.f32 %v1102_v54, %v229_v53  ;;  %v2668_v54 = vmul.f32 -1.442695, %v1107_v46 }
 0x99c   :  { %1201 = vrot.lane.b32.xlu1 %v2864_v25, %s3137_s29 }
 0x99d   :  { %2865 = vtanh.f32 %v1108_v55  ;;  %v2669_v12 = vmul.f32 -1.442695, %v1108_v55 }
 0x99e   :  { %2867 = vpow2.f32 %v2667_v35 }
 0x9a3   :  { %v2866_v58 = vpop.eup %2865 }
 0x9a4   :  { %1203 = vrot.lane.b32.xlu2 %v2866_v58, %s3137_s29  ;;  %v2868_v52 = vpop.eup %2867 }
 0x9a5   :  { %v1122_v57 = vadd.f32 1.0, %v2868_v52 }
 0x9a7   :  { %2869 = vrcp.f32 %v1122_v57  ;;  %v1151_v34 = vand.u32 2147483648, %v1122_v57  ;;  %vm1145_vm15 = vweird.f32 %v1122_v57  ;;  %v1149_v6 = vand.u32 2147483647, %v1122_v57 }
 0x9a8   :  { %2871 = vpow2.f32 %v2669_v12  ;;  %v1189_v12 = vmul.f32 %v3595_v26, %v3555_v40 }
 0x9a9   :  { %v1152_v38 = vor.u32 1.1754944e-38, %v1151_v34  ;;  %vm1150_vm2 = vcmp.eq.f32.partialorder %v1149_v6, 8.507059e+37 }
 0x9ad   :  { %v2870_v27 = vpop.eup %2869 }
 0x9ae   :  { %v1141_v28 = vmul.f32 %v2870_v27, %v1122_v57  ;;  %vm1146_vm14 = vweird.f32 %v2870_v27  ;;  %v2872_v48 = vpop.eup %2871 }
 0x9af   :  { %vm1147_vm0 = vmor %vm1145_vm15, %vm1146_vm14  ;;  %v1124_v53 = vadd.f32 1.0, %v2872_v48 }
 0x9b0   :  { %v1142_v29 = vsub.f32 1.0, %v1141_v28 }
 0x9b1   :  { %v1198_v24 = vpop.permute.xlu2 %1197  ;;  %2873 = vrcp.f32 %v1124_v53  ;;  %v1181_v49 = vand.u32 2147483648, %v1124_v53  ;;  %vm1175_vm5 = vweird.f32 %v1124_v53  ;;  %v1179_v11 = vand.u32 2147483647, %v1124_v53 }
 0x9b2   :  { %v1209_v42 = vmul.f32 %v1198_v24, %v3595_v26  ;;  %v1143_v30 = vmul.f32 %v2870_v27, %v1142_v29  ;;  %2875 = vpow2.f32 %v2668_v54 }
 0x9b3   :  { %v1182_v16 = vor.u32 1.1754944e-38, %v1181_v49  ;;  %vm1180_vm7 = vcmp.eq.f32.partialorder %v1179_v11, 8.507059e+37 }
 0x9b4   :  { %1217 = vrot.lane.b32.xlu0 %v1209_v42, %s3139_s8  ;;  %v1144_v31 = vadd.f32 %v2870_v27, %v1143_v30 }
 0x9b6   :  { %v1148_v36 = vsel %vm1147_vm0, %v2870_v27, %v1144_v31 }
 0x9b7   :  { %v3599_v43 = vsel %vm1150_vm2, %v1152_v38, %v1148_v36  ;;  %v2874_v25 = vpop.eup %2873 }
 0x9b8   :  { %v2876_v1 = vpop.eup %2875  ;;  %v1171_v56 = vmul.f32 %v2874_v25, %v1124_v53  ;;  %vm1176_vm4 = vweird.f32 %v2874_v25  ;;  %v1190_v53 = vmul.f32 %v3599_v43, %v3549_v33 }
 0x9b9   :  { %v1123_v58 = vadd.f32 1.0, %v2876_v1  ;;  %vm1177_vm6 = vmor %vm1175_vm5, %vm1176_vm4 }
 0x9ba   :  { %v1172_v35 = vsub.f32 1.0, %v1171_v56 }
 0x9bb   :  { %2877 = vrcp.f32 %v1123_v58  ;;  %v1166_v29 = vand.u32 2147483648, %v1123_v58  ;;  %vm1160_vm9 = vweird.f32 %v1123_v58  ;;  %v1164_v30 = vand.u32 2147483647, %v1123_v58 }
 0x9bc   :  { %v1173_v55 = vmul.f32 %v2874_v25, %v1172_v35 }
 0x9bd   :  { %v1167_v34 = vor.u32 1.1754944e-38, %v1166_v29  ;;  %vm1165_vm11 = vcmp.eq.f32.partialorder %v1164_v30, 8.507059e+37  ;;  %v39_v29 = vld [vmem:[%s3962_s0 + $0xb8] sm:$0xff] }
 0x9be   :  { %v1174_v21 = vadd.f32 %v2874_v25, %v1173_v55 }
 0x9c0   :  { %v1178_v52 = vsel %vm1177_vm6, %v2874_v25, %v1174_v21 }
 0x9c1   :  { %v2878_v41 = vpop.eup %2877  ;;  %v1183_v57 = vsel %vm1180_vm7, %v1182_v16, %v1178_v52  ;;  %v37_v16 = vld [vmem:[%s3962_s0 + $0xa8] sm:$0xff] }
 0x9c2   :  { %v1156_v23 = vmul.f32 %v2878_v41, %v1123_v58  ;;  %vm1161_vm8 = vweird.f32 %v2878_v41  ;;  %v1192_v35 = vmul.f32 %v1183_v57, %v3565_v50  ;;  %v36_v50 = vld [vmem:[%s3962_s0 + $0xa0] sm:$0xff] }
 0x9c3   :  { %vm1162_vm10 = vmor %vm1160_vm9, %vm1161_vm8 }
 0x9c4   :  { %v1157_v42 = vsub.f32 1.0, %v1156_v23 }
 0x9c6   :  { %v1158_v27 = vmul.f32 %v2878_v41, %v1157_v42 }
 0x9c8   :  { %v1159_v28 = vadd.f32 %v2878_v41, %v1158_v27 }
 0x9ca   :  { %v1163_v31 = vsel %vm1162_vm10, %v2878_v41, %v1159_v28 }
 0x9cb   :  { %v1168_v36 = vsel %vm1165_vm11, %v1167_v34, %v1163_v31 }
 0x9cc   :  { %v1191_v40 = vmul.f32 %v1168_v36, %v3560_v44 }
 0x9d1   :  { %v1200_v7 = vpop.permute.xlu0 %1199 }
 0x9d2   :  { %v1210_v45 = vmul.f32 %v1200_v7, %v3599_v43 }
 0x9d4   :  { %1219 = vrot.lane.b32.xlu1 %v1210_v45, %s3139_s8 }
 0x9fe   :  { %v1204_v46 = vpop.permute.xlu2 %1203 }
 0x9ff   :  { %v1212_v24 = vmul.f32 %v1204_v46, %v1183_v57  ;;  %v74_v46 = vpack.c.bf16 %v37_v16, %v36_v50 }
 0xa01   :  { %1223 = vrot.lane.b32.xlu0 %v1212_v24, %s3139_s8  ;;  %2628 = vmatmul.msk.bf16.gmra.mxu0 %vm96_vm1, %v74_v46 }
 0xa0e   :  { %v1202_v6 = vpop.permute.xlu1 %1201 }
 0xa0f   :  { %v1211_v38 = vmul.f32 %v1202_v6, %v1168_v36 }
 0xa11   :  { %1221 = vrot.lane.b32.xlu2 %v1211_v38, %s3139_s8 }
 0xa26   :  { %v1218_v7 = vpop.permute.xlu0 %1217 }
 0xa27   :  { %v3607_v45 = vadd.f32 %v1218_v7, %v1189_v12 }
 0xa29   :  { %2879 = vtanh.f32 %v3607_v45 }
 0xa2f   :  { %v2880_v48 = vpop.eup %2879 }
 0xa30   :  { %1241 = vrot.lane.b32.xlu1 %v2880_v48, %s3137_s29 }
 0xa46   :  { %v1220_v54 = vpop.permute.xlu1 %1219 }
 0xa47   :  { %v3613_v25 = vadd.f32 %v1220_v54, %v1190_v53 }
 0xa49   :  { %2881 = vtanh.f32 %v3613_v25 }
 0xa4f   :  { %v2882_v1 = vpop.eup %2881 }
 0xa50   :  { %1243 = vrot.lane.b32.xlu2 %v2882_v1, %s3137_s29 }
 0xa6b   :  { %v1222_v56 = vpop.permute.xlu2 %1221 }
 0xa6c   :  { %v3618_v58 = vadd.f32 %v1222_v56, %v1191_v40 }
 0xa6e   :  { %2883 = vtanh.f32 %v3618_v58 }
 0xa73   :  { %v1224_v55 = vpop.permute.xlu0 %1223 }
 0xa74   :  { %v2884_v21 = vpop.eup %2883  ;;  %v3622_v33 = vadd.f32 %v1224_v55, %v1192_v35 }
 0xa75   :  { %1245 = vrot.lane.b32.xlu0 %v2884_v21, %s3137_s29 }
 0xa76   :  { %2885 = vtanh.f32 %v3622_v33 }
 0xa7c   :  { %v2886_v41 = vpop.eup %2885 }
 0xa7d   :  { %1247 = vrot.lane.b32.xlu1 %v2886_v41, %s3137_s29 }
 0xa7e   :  { %v232_v34 = vpop.f32.mrf.mxu0 }
 0xa86   :  { %v234_v38 = vpop.f32.mrf.mxu0 }
 0xaa2   :  { %v1242_v49 = vpop.permute.xlu1 %1241 }
 0xaa3   :  { %v1253_v11 = vmul.f32 %v1242_v49, %v3595_v26 }
 0xaaa   :  { %v1244_v44 = vpop.permute.xlu2 %1243 }
 0xaab   :  { %v1254_v52 = vmul.f32 %v1244_v44, %v3599_v43  ;;  %v38_v43 = vld [vmem:[%s3962_s0 + $0xb0] sm:$0xff]  ;;  %s3140_s0 = smov [#allocation3]  }
 0xaac   :  { %v75_v30 = vpack.c.bf16 %v39_v29, %v38_v43 }
 0xaad   :  { %v1261_v23 = vpack.c.bf16 %v1254_v52, %v1253_v11 }
 0xaae   :  { %2629 = vmatmul.msk.bf16.gmra.mxu0 %vm96_vm1, %v75_v30 }
 0xaaf   :  { %1265 = vrot.lane.b32.xlu2 %v1261_v23, %s3139_s8 }
 0xae7   :  { %v1246_v24 = vpop.permute.xlu0 %1245 }
 0xae8   :  { %v1255_v27 = vmul.f32 %v1246_v24, %v1168_v36 }
 0xaef   :  { %v1248_v42 = vpop.permute.xlu1 %1247 }
 0xaf0   :  { %v1256_v26 = vmul.f32 %v1248_v42, %v1183_v57 }
 0xaf2   :  { %v1262_v28 = vpack.c.bf16 %v1256_v26, %v1255_v27 }
 0xaf4   :  { %1267 = vrot.lane.b32.xlu0 %v1262_v28, %s3139_s8 }
 0xb09   :  { %v1266_v31 = vpop.permute.xlu2 %1265 }
 0xb0a   :  { %2670 = vmatmul.msk.bf16.vlgmr.msra.gmra.mxu2 %vm496_vm3, %v1266_v31 }
 0xb0b   :  { %2415 = vmatpush.bf16.msra.mxu2 %v3247_v37 }
 0xb0f   :  { %2416 = vmatpush.bf16.msra.mxu2 %v3253_v39 }
 0xb2b   :  { %v237_v21 = vpop.f32.mrf.mxu0 }
 0xb33   :  { %v239_v23 = vpop.f32.mrf.mxu0 }
 0xb66   :  { %v1268_v57 = vpop.permute.xlu0 %1267 }
 0xb67   :  { %2671 = vmatmul.msk.bf16.gmra.mxu2 %vm496_vm3, %v1268_v57 }
 0xb8d   :  { %v1284_v6 = vpop.f32.mrf.mxu2 }
 0xb8e   :  { %v1294_v36 = vadd.f32 %v1284_v6, %v232_v34 }
 0xb90   :  { %2887 = vtanh.f32 %v1294_v36  ;;  %v2672_v1 = vmul.f32 -1.442695, %v1294_v36 }
 0xb95   :  { %v1286_v12 = vpop.f32.mrf.mxu2 }
 0xb96   :  { %v2888_v7 = vpop.eup %2887  ;;  %v1295_v48 = vadd.f32 %v1286_v12, %v234_v38 }
 0xb97   :  { %1386 = vrot.lane.b32.xlu1 %v2888_v7, %s3137_s29 }
 0xb98   :  { %2889 = vtanh.f32 %v1295_v48  ;;  %v2673_v37 = vmul.f32 -1.442695, %v1295_v48 }
 0xb9a   :  { %2891 = vpow2.f32 %v2673_v37 }
 0xb9e   :  { %v2890_v53 = vpop.eup %2889 }
 0xb9f   :  { %1388 = vrot.lane.b32.xlu2 %v2890_v53, %s3137_s29 }
 0xba0   :  { %v2892_v39 = vpop.eup %2891 }
 0xba1   :  { %v1311_v54 = vadd.f32 1.0, %v2892_v39 }
 0xba3   :  { %2893 = vrcp.f32 %v1311_v54  ;;  %v1340_v42 = vand.u32 2147483648, %v1311_v54  ;;  %vm1334_vm12 = vweird.f32 %v1311_v54  ;;  %v1338_v27 = vand.u32 2147483647, %v1311_v54 }
 0xba4   :  { %2895 = vpow2.f32 %v2672_v1 }
 0xba5   :  { %v1341_v43 = vor.u32 1.1754944e-38, %v1340_v42  ;;  %vm1339_vm14 = vcmp.eq.f32.partialorder %v1338_v27, 8.507059e+37 }
 0xba9   :  { %v2894_v40 = vpop.eup %2893 }
 0xbaa   :  { %v2896_v56 = vpop.eup %2895  ;;  %v1330_v35 = vmul.f32 %v2894_v40, %v1311_v54  ;;  %vm1335_vm1 = vweird.f32 %v2894_v40 }
 0xbab   :  { %v1310_v55 = vadd.f32 1.0, %v2896_v56  ;;  %vm1336_vm13 = vmor %vm1334_vm12, %vm1335_vm1 }
 0xbac   :  { %v1331_v49 = vsub.f32 1.0, %v1330_v35 }
 0xbad   :  { %2897 = vrcp.f32 %v1310_v55  ;;  %v1325_v38 = vand.u32 2147483648, %v1310_v55  ;;  %vm1319_vm0 = vweird.f32 %v1310_v55  ;;  %v1323_v12 = vand.u32 2147483647, %v1310_v55 }
 0xbae   :  { %v1332_v11 = vmul.f32 %v2894_v40, %v1331_v49 }
 0xbaf   :  { %v1326_v48 = vor.u32 1.1754944e-38, %v1325_v38  ;;  %vm1324_vm4 = vcmp.eq.f32.partialorder %v1323_v12, 8.507059e+37 }
 0xbb0   :  { %v1333_v16 = vadd.f32 %v2894_v40, %v1332_v11 }
 0xbb2   :  { %v1337_v26 = vsel %vm1336_vm13, %v2894_v40, %v1333_v16 }
 0xbb3   :  { %v2898_v52 = vpop.eup %2897  ;;  %v3652_v30 = vsel %vm1339_vm14, %v1341_v43, %v1337_v26 }
 0xbb4   :  { %v1315_v28 = vmul.f32 %v2898_v52, %v1310_v55  ;;  %vm1320_vm15 = vweird.f32 %v2898_v52 }
 0xbb5   :  { %vm1321_vm2 = vmor %vm1319_vm0, %vm1320_vm15 }
 0xbb6   :  { %v1316_v57 = vsub.f32 1.0, %v1315_v28 }
 0xbb8   :  { %v1317_v6 = vmul.f32 %v2898_v52, %v1316_v57 }
 0xbba   :  { %v1318_v36 = vadd.f32 %v2898_v52, %v1317_v6 }
 0xbbc   :  { %v1322_v7 = vsel %vm1321_vm2, %v2898_v52, %v1318_v36 }
 0xbbd   :  { %v3657_v37 = vsel %vm1324_vm4, %v1326_v48, %v1322_v7 }
 0xbbe   :  { %v1378_v26 = vmul.f32 %v3657_v37, %v3607_v45  ;;  %v1379_v45 = vmul.f32 %v3652_v30, %v3613_v25 }
 0xbea   :  { %v1289_v41 = vpop.f32.mrf.mxu2 }
 0xbeb   :  { %v1296_v44 = vadd.f32 %v1289_v41, %v237_v21 }
 0xbed   :  { %2899 = vtanh.f32 %v1296_v44  ;;  %v2674_v54 = vmul.f32 -1.442695, %v1296_v44 }
 0xbf2   :  { %v1291_v50 = vpop.f32.mrf.mxu2 }
 0xbf3   :  { %v2900_v46 = vpop.eup %2899  ;;  %v1297_v24 = vadd.f32 %v1291_v50, %v239_v23 }
 0xbf4   :  { %1390 = vrot.lane.b32.xlu0 %v2900_v46, %s3137_s29 }
 0xbf5   :  { %2901 = vtanh.f32 %v1297_v24  ;;  %v2675_v1 = vmul.f32 -1.442695, %v1297_v24 }
 0xbf6   :  { %2903 = vpow2.f32 %v2674_v54 }
 0xbf7   :  { %2905 = vpow2.f32 %v2675_v1 }
 0xbf9   :  { %v1389_v29 = vpop.permute.xlu2 %1388 }
 0xbfa   :  { %v1399_v31 = vmul.f32 %v1389_v29, %v3652_v30 }
 0xbfb   :  { %v2902_v34 = vpop.eup %2901 }
 0xbfc   :  { %1408 = vrot.lane.b32.xlu0 %v1399_v31, %s3139_s8  ;;  %1392 = vrot.lane.b32.xlu1 %v2902_v34, %s3137_s29  ;;  %v2904_v40 = vpop.eup %2903 }
 0xbfd   :  { %v1312_v56 = vadd.f32 1.0, %v2904_v40  ;;  %v2906_v35 = vpop.eup %2905 }
 0xbfe   :  { %v1313_v55 = vadd.f32 1.0, %v2906_v35 }
 0xbff   :  { %2907 = vrcp.f32 %v1312_v56  ;;  %v1355_v46 = vand.u32 2147483648, %v1312_v56  ;;  %vm1349_vm6 = vweird.f32 %v1312_v56  ;;  %v1353_v44 = vand.u32 2147483647, %v1312_v56 }
 0xc00   :  { %2909 = vrcp.f32 %v1313_v55  ;;  %v1370_v6 = vand.u32 2147483648, %v1313_v55  ;;  %vm1364_vm10 = vweird.f32 %v1313_v55  ;;  %v1368_v36 = vand.u32 2147483647, %v1313_v55 }
 0xc01   :  { %v1356_v27 = vor.u32 1.1754944e-38, %v1355_v46  ;;  %vm1354_vm8 = vcmp.eq.f32.partialorder %v1353_v44, 8.507059e+37 }
 0xc02   :  { %v1371_v12 = vor.u32 1.1754944e-38, %v1370_v6  ;;  %vm1369_vm1 = vcmp.eq.f32.partialorder %v1368_v36, 8.507059e+37 }
 0xc05   :  { %v2908_v21 = vpop.eup %2907 }
 0xc06   :  { %v1345_v41 = vmul.f32 %v2908_v21, %v1312_v56  ;;  %v2910_v11 = vpop.eup %2909  ;;  %vm1350_vm5 = vweird.f32 %v2908_v21 }
 0xc07   :  { %v1360_v23 = vmul.f32 %v2910_v11, %v1313_v55  ;;  %vm1351_vm7 = vmor %vm1349_vm6, %vm1350_vm5  ;;  %vm1365_vm9 = vweird.f32 %v2910_v11 }
 0xc08   :  { %v1346_v49 = vsub.f32 1.0, %v1345_v41  ;;  %vm1366_vm11 = vmor %vm1364_vm10, %vm1365_vm9 }
 0xc09   :  { %v1387_v53 = vpop.permute.xlu1 %1386  ;;  %v1361_v16 = vsub.f32 1.0, %v1360_v23 }
 0xc0a   :  { %v1398_v39 = vmul.f32 %v1387_v53, %v3657_v37  ;;  %v1347_v52 = vmul.f32 %v2908_v21, %v1346_v49 }
 0xc0b   :  { %v1362_v42 = vmul.f32 %v2910_v11, %v1361_v16 }
 0xc0c   :  { %1406 = vrot.lane.b32.xlu2 %v1398_v39, %s3139_s8  ;;  %v1348_v50 = vadd.f32 %v2908_v21, %v1347_v52 }
 0xc0d   :  { %v1363_v34 = vadd.f32 %v2910_v11, %v1362_v42 }
 0xc0e   :  { %v1352_v24 = vsel %vm1351_vm7, %v2908_v21, %v1348_v50 }
 0xc0f   :  { %v1357_v29 = vsel %vm1354_vm8, %v1356_v27, %v1352_v24  ;;  %v1367_v38 = vsel %vm1366_vm11, %v2910_v11, %v1363_v34 }
 0xc10   :  { %v1372_v53 = vsel %vm1369_vm1, %v1371_v12, %v1367_v38  ;;  %v1380_v21 = vmul.f32 %v1357_v29, %v3618_v58 }
 0xc11   :  { %v1381_v56 = vmul.f32 %v1372_v53, %v3622_v33 }
 0xc66   :  { %v1407_v28 = vpop.permute.xlu2 %1406  ;;  %v1391_v43 = vpop.permute.xlu0 %1390 }
 0xc67   :  { %v3663_v31 = vadd.f32 %v1407_v28, %v1378_v26  ;;  %v1400_v57 = vmul.f32 %v1391_v43, %v1357_v29 }
 0xc69   :  { %2911 = vtanh.f32 %v3663_v31  ;;  %1410 = vrot.lane.b32.xlu1 %v1400_v57, %s3139_s8 }
 0xc6e   :  { %v1409_v7 = vpop.permute.xlu0 %1408  ;;  %v1393_v48 = vpop.permute.xlu1 %1392 }
 0xc6f   :  { %v2912_v39 = vpop.eup %2911  ;;  %v3669_v54 = vadd.f32 %v1409_v7, %v1379_v45  ;;  %v1401_v1 = vmul.f32 %v1393_v48, %v1372_v53 }
 0xc70   :  { %1430 = vrot.lane.b32.xlu0 %v2912_v39, %s3137_s29 }
 0xc71   :  { %2913 = vtanh.f32 %v3669_v54  ;;  %1412 = vrot.lane.b32.xlu2 %v1401_v1, %s3139_s8 }
 0xc77   :  { %v2914_v40 = vpop.eup %2913 }
 0xc78   :  { %1432 = vrot.lane.b32.xlu1 %v2914_v40, %s3137_s29 }
 0xccb   :  { %v1413_v25 = vpop.permute.xlu2 %1412 }
 0xccc   :  { %v3676_v35 = vadd.f32 %v1413_v25, %v1381_v56 }
 0xcce   :  { %2915 = vtanh.f32 %v3676_v35 }
 0xcd4   :  { %v2916_v55 = vpop.eup %2915 }
 0xcd5   :  { %1436 = vrot.lane.b32.xlu0 %v2916_v55, %s3137_s29 }
 0xcdb   :  { %v1411_v41 = vpop.permute.xlu1 %1410 }
 0xcdc   :  { %v3681_v49 = vadd.f32 %v1411_v41, %v1380_v21 }
 0xcde   :  { %2917 = vtanh.f32 %v3681_v49 }
 0xce2   :  { %v1431_v52 = vpop.permute.xlu0 %1430 }
 0xce3   :  { %v1442_v23 = vmul.f32 %v1431_v52, %v3657_v37 }
 0xce4   :  { %v2918_v11 = vpop.eup %2917 }
 0xce5   :  { %1434 = vrot.lane.b32.xlu2 %v2918_v11, %s3137_s29 }
 0xcea   :  { %v1433_v33 = vpop.permute.xlu1 %1432 }
 0xceb   :  { %v1443_v50 = vmul.f32 %v1433_v33, %v3652_v30 }
 0xced   :  { %v1450_v16 = vpack.c.bf16 %v1443_v50, %v1442_v23 }
 0xcef   :  { %1454 = vrot.lane.b32.xlu1 %v1450_v16, %s3139_s8 }
 0xd3f   :  { %v1435_v46 = vpop.permute.xlu2 %1434 }
 0xd40   :  { %v1444_v58 = vmul.f32 %v1435_v46, %v1357_v29 }
 0xd47   :  { %v1437_v44 = vpop.permute.xlu0 %1436 }
 0xd48   :  { %v1445_v24 = vmul.f32 %v1437_v44, %v1372_v53 }
 0xd4a   :  { %v1451_v42 = vpack.c.bf16 %v1445_v24, %v1444_v58 }
 0xd4c   :  { %1456 = vrot.lane.b32.xlu2 %v1451_v42, %s3139_s8 }
 0xd61   :  { %v1455_v27 = vpop.permute.xlu1 %1454 }
 0xd62   :  { %2676 = vmatmul.msk.bf16.vlgmr.msra.gmra.mxu3 %vm496_vm3, %v1455_v27 }
 0xda6   :  { %v1457_v26 = vpop.permute.xlu2 %1456 }
 0xda7   :  { %2677 = vmatmul.msk.bf16.gmra.mxu3 %vm496_vm3, %v1457_v26 }
 0xde5   :  { %v1473_v28 = vpop.f32.mrf.mxu3 }
 0xde6   :  { %v1483_v37 = vadd.f32 %v1473_v28, %v3294_v59 }
 0xde8   :  { %2919 = vtanh.f32 %v1483_v37  ;;  %v2678_v59 = vmul.f32 -1.442695, %v1483_v37 }
 0xded   :  { %v1475_v30 = vpop.f32.mrf.mxu3 }
 0xdee   :  { %v2920_v43 = vpop.eup %2919  ;;  %v1484_v57 = vadd.f32 %v1475_v30, %v3296_v60 }
 0xdef   :  { %1575 = vrot.lane.b32.xlu0 %v2920_v43, %s3137_s29 }
 0xdf0   :  { %2921 = vtanh.f32 %v1484_v57  ;;  %v2679_v45 = vmul.f32 -1.442695, %v1484_v57 }
 0xdf6   :  { %v2922_v29 = vpop.eup %2921 }
 0xdf7   :  { %1577 = vrot.lane.b32.xlu1 %v2922_v29, %s3137_s29 }
 0xe2a   :  { %v1478_v34 = vpop.f32.mrf.mxu3 }
 0xe2b   :  { %v1485_v6 = vadd.f32 %v1478_v34, %v3299_v62 }
 0xe2d   :  { %2923 = vtanh.f32 %v1485_v6  ;;  %v2680_v50 = vmul.f32 -1.442695, %v1485_v6 }
 0xe32   :  { %v1480_v36 = vpop.f32.mrf.mxu3 }
 0xe33   :  { %v2924_v38 = vpop.eup %2923  ;;  %v1486_v12 = vadd.f32 %v1480_v36, %v3301_v63 }
 0xe34   :  { %1579 = vrot.lane.b32.xlu2 %v2924_v38, %s3137_s29 }
 0xe35   :  { %2925 = vtanh.f32 %v1486_v12  ;;  %v2681_v36 = vmul.f32 -1.442695, %v1486_v12 }
 0xe36   :  { %2927 = vpow2.f32 %v2678_v59 }
 0xe37   :  { %2929 = vpow2.f32 %v2679_v45 }
 0xe3b   :  { %v2926_v60 = vpop.eup %2925 }
 0xe3c   :  { %1581 = vrot.lane.b32.xlu0 %v2926_v60, %s3137_s29  ;;  %v2928_v7 = vpop.eup %2927 }
 0xe3d   :  { %v1499_v48 = vadd.f32 1.0, %v2928_v7  ;;  %v2930_v53 = vpop.eup %2929 }
 0xe3e   :  { %v1500_v62 = vadd.f32 1.0, %v2930_v53 }
 0xe3f   :  { %2931 = vrcp.f32 %v1499_v48  ;;  %v1514_v41 = vand.u32 2147483648, %v1499_v48  ;;  %vm1508_vm13 = vweird.f32 %v1499_v48  ;;  %v1512_v11 = vand.u32 2147483647, %v1499_v48 }
 0xe40   :  { %2933 = vrcp.f32 %v1500_v62  ;;  %v1529_v24 = vand.u32 2147483648, %v1500_v62  ;;  %vm1523_vm2 = vweird.f32 %v1500_v62  ;;  %v1527_v42 = vand.u32 2147483647, %v1500_v62 }
 0xe41   :  { %v1515_v23 = vor.u32 1.1754944e-38, %v1514_v41  ;;  %vm1513_vm15 = vcmp.eq.f32.partialorder %v1512_v11, 8.507059e+37  ;;  %2935 = vpow2.f32 %v2680_v50 }
 0xe42   :  { %v1530_v26 = vor.u32 1.1754944e-38, %v1529_v24  ;;  %vm1528_vm5 = vcmp.eq.f32.partialorder %v1527_v42, 8.507059e+37 }
 0xe45   :  { %v2932_v39 = vpop.eup %2931 }
 0xe46   :  { %v1504_v1 = vmul.f32 %v2932_v39, %v1499_v48  ;;  %v2934_v63 = vpop.eup %2933  ;;  %vm1509_vm12 = vweird.f32 %v2932_v39 }
 0xe47   :  { %v1519_v25 = vmul.f32 %v2934_v63, %v1500_v62  ;;  %vm1510_vm14 = vmor %vm1508_vm13, %vm1509_vm12  ;;  %vm1524_vm0 = vweird.f32 %v2934_v63  ;;  %v2936_v43 = vpop.eup %2935 }
 0xe48   :  { %v1505_v40 = vsub.f32 1.0, %v1504_v1  ;;  %vm1525_vm4 = vmor %vm1523_vm2, %vm1524_vm0  ;;  %v1501_v57 = vadd.f32 1.0, %v2936_v43 }
 0xe49   :  { %v1520_v21 = vsub.f32 1.0, %v1519_v25 }
 0xe4a   :  { %v1506_v56 = vmul.f32 %v2932_v39, %v1505_v40  ;;  %2937 = vrcp.f32 %v1501_v57  ;;  %v1544_v60 = vand.u32 2147483648, %v1501_v57  ;;  %vm1538_vm7 = vweird.f32 %v1501_v57 }
 0xe4b   :  { %v1521_v33 = vmul.f32 %v2934_v63, %v1520_v21  ;;  %2939 = vpow2.f32 %v2681_v36  ;;  %v1542_v45 = vand.u32 2147483647, %v1501_v57 }
 0xe4c   :  { %v1507_v55 = vadd.f32 %v2932_v39, %v1506_v56  ;;  %v1545_v53 = vor.u32 1.1754944e-38, %v1544_v60 }
 0xe4d   :  { %v1522_v58 = vadd.f32 %v2934_v63, %v1521_v33  ;;  %vm1543_vm9 = vcmp.eq.f32.partialorder %v1542_v45, 8.507059e+37 }
 0xe4e   :  { %v1511_v52 = vsel %vm1510_vm14, %v2932_v39, %v1507_v55 }
 0xe4f   :  { %v3699_v16 = vsel %vm1513_vm15, %v1515_v23, %v1511_v52  ;;  %v1526_v27 = vsel %vm1525_vm4, %v2934_v63, %v1522_v58 }
 0xe50   :  { %v3703_v37 = vsel %vm1528_vm5, %v1530_v26, %v1526_v27  ;;  %v2938_v29 = vpop.eup %2937  ;;  %v1567_v42 = vmul.f32 %v3699_v16, %v3663_v31 }
 0xe51   :  { %v1534_v34 = vmul.f32 %v2938_v29, %v1501_v57  ;;  %vm1539_vm6 = vweird.f32 %v2938_v29  ;;  %v2940_v7 = vpop.eup %2939 }
 0xe52   :  { %vm1540_vm8 = vmor %vm1538_vm7, %vm1539_vm6  ;;  %v1502_v62 = vadd.f32 1.0, %v2940_v7 }
 0xe53   :  { %v1535_v6 = vsub.f32 1.0, %v1534_v34 }
 0xe54   :  { %2941 = vrcp.f32 %v1502_v62  ;;  %v1559_v21 = vand.u32 2147483648, %v1502_v62  ;;  %vm1553_vm11 = vweird.f32 %v1502_v62  ;;  %v1557_v41 = vand.u32 2147483647, %v1502_v62 }
 0xe55   :  { %v1536_v38 = vmul.f32 %v2938_v29, %v1535_v6 }
 0xe56   :  { %v1560_v52 = vor.u32 1.1754944e-38, %v1559_v21  ;;  %vm1558_vm12 = vcmp.eq.f32.partialorder %v1557_v41, 8.507059e+37 }
 0xe57   :  { %v1537_v59 = vadd.f32 %v2938_v29, %v1536_v38 }
 0xe59   :  { %v1541_v48 = vsel %vm1540_vm8, %v2938_v29, %v1537_v59 }
 0xe5a   :  { %v1546_v1 = vsel %vm1543_vm9, %v1545_v53, %v1541_v48  ;;  %v2942_v12 = vpop.eup %2941 }
 0xe5b   :  { %v1549_v63 = vmul.f32 %v2942_v12, %v1502_v62  ;;  %vm1554_vm10 = vweird.f32 %v2942_v12 }
 0xe5c   :  { %vm1555_vm1 = vmor %vm1553_vm11, %vm1554_vm10 }
 0xe5d   :  { %v1550_v56 = vsub.f32 1.0, %v1549_v63 }
 0xe5f   :  { %v1551_v25 = vmul.f32 %v2942_v12, %v1550_v56 }
 0xe61   :  { %v1576_v46 = vpop.permute.xlu0 %1575  ;;  %v1552_v55 = vadd.f32 %v2942_v12, %v1551_v25 }
 0xe62   :  { %v1587_v44 = vmul.f32 %v1576_v46, %v3699_v16  ;;  %v1568_v46 = vmul.f32 %v3703_v37, %v3669_v54  ;;  %v1569_v54 = vmul.f32 %v1546_v1, %v3681_v49 }
 0xe63   :  { %v1556_v11 = vsel %vm1555_vm1, %v2942_v12, %v1552_v55 }
 0xe64   :  { %1595 = vrot.lane.b32.xlu1 %v1587_v44, %s3139_s8  ;;  %v1561_v33 = vsel %vm1558_vm12, %v1560_v52, %v1556_v11 }
 0xe65   :  { %v1570_v31 = vmul.f32 %v1561_v33, %v3676_v35 }
 0xe69   :  { %v1578_v28 = vpop.permute.xlu1 %1577 }
 0xe6a   :  { %v1588_v30 = vmul.f32 %v1578_v28, %v3703_v37 }
 0xe6c   :  { %1597 = vrot.lane.b32.xlu2 %v1588_v30, %s3139_s8 }
 0xe8e   :  { %v1580_v39 = vpop.permute.xlu2 %1579 }
 0xe8f   :  { %v1589_v40 = vmul.f32 %v1580_v39, %v1546_v1 }
 0xe91   :  { %1599 = vrot.lane.b32.xlu0 %v1589_v40, %s3139_s8 }
 0xeae   :  { %v1582_v23 = vpop.permute.xlu0 %1581 }
 0xeaf   :  { %v1590_v50 = vmul.f32 %v1582_v23, %v1561_v33 }
 0xeb1   :  { %1601 = vrot.lane.b32.xlu1 %v1590_v50, %s3139_s8 }
 0xec6   :  { %v1598_v44 = vpop.permute.xlu2 %1597 }
 0xec7   :  { %v3711_v58 = vadd.f32 %v1598_v44, %v1568_v46 }
 0xec9   :  { %2943 = vtanh.f32 %v3711_v58 }
 0xecf   :  { %v2944_v24 = vpop.eup %2943 }
 0xed0   :  { %1621 = vrot.lane.b32.xlu0 %v2944_v24, %s3137_s29 }
 0xed6   :  { %v1596_v27 = vpop.permute.xlu1 %1595 }
 0xed7   :  { %v3717_v26 = vadd.f32 %v1596_v27, %v1567_v42 }
 0xed9   :  { %2945 = vtanh.f32 %v3717_v26 }
 0xedf   :  { %v2946_v28 = vpop.eup %2945 }
 0xee0   :  { %1619 = vrot.lane.b32.xlu2 %v2946_v28, %s3137_s29 }
 0xf03   :  { %v1600_v30 = vpop.permute.xlu0 %1599 }
 0xf04   :  { %v3722_v43 = vadd.f32 %v1600_v30, %v1569_v54 }
 0xf06   :  { %2947 = vtanh.f32 %v3722_v43 }
 0xf0c   :  { %v2948_v57 = vpop.eup %2947 }
 0xf0d   :  { %1623 = vrot.lane.b32.xlu1 %v2948_v57, %s3137_s29 }
 0xf23   :  { %v1602_v29 = vpop.permute.xlu1 %1601 }
 0xf24   :  { %v3727_v34 = vadd.f32 %v1602_v29, %v1570_v31 }
 0xf26   :  { %2949 = vtanh.f32 %v3727_v34 }
 0xf2c   :  { %v2950_v6 = vpop.eup %2949 }
 0xf2d   :  { %1625 = vrot.lane.b32.xlu2 %v2950_v6, %s3137_s29 }
 0xf3a   :  { %v1620_v36 = vpop.permute.xlu2 %1619 }
 0xf3b   :  { %v1631_v38 = vmul.f32 %v1620_v36, %v3699_v16 }
 0xf42   :  { %v1622_v49 = vpop.permute.xlu0 %1621 }
 0xf43   :  { %v1632_v59 = vmul.f32 %v1622_v49, %v3703_v37 }
 0xf45   :  { %v1639_v60 = vpack.c.bf16 %v1632_v59, %v1631_v38 }
 0xf47   :  { %1643 = vrot.lane.b32.xlu0 %v1639_v60, %s3139_s8 }
 0xf7f   :  { %v1624_v45 = vpop.permute.xlu1 %1623 }
 0xf80   :  { %v1633_v35 = vmul.f32 %v1624_v45, %v1546_v1 }
 0xf87   :  { %v1626_v7 = vpop.permute.xlu2 %1625 }
 0xf88   :  { %v1634_v48 = vmul.f32 %v1626_v7, %v1561_v33 }
 0xf8a   :  { %v1640_v53 = vpack.c.bf16 %v1634_v48, %v1633_v35 }
 0xf8c   :  { %1645 = vrot.lane.b32.xlu1 %v1640_v53, %s3139_s8 }
 0xfb9   :  { %v1644_v62 = vpop.permute.xlu0 %1643 }
 0xfba   :  { %2682 = vmatmul.msk.bf16.vlgmr.msrb.gmra.mxu1 %vm496_vm3, %v1644_v62 }
 0xffe   :  { %v1646_v39 = vpop.permute.xlu1 %1645 }
 0xfff   :  { %2683 = vmatmul.msk.bf16.gmra.mxu1 %vm496_vm3, %v1646_v39 }
0x1037   :  { %v1662_v40 = vpop.f32.mrf.mxu1 }
0x1038   :  { %v1672_v16 = vadd.f32 %v1662_v40, %v3303_v0 }
0x103a   :  { %2951 = vtanh.f32 %v1672_v16  ;;  %v2684_v56 = vmul.f32 -1.442695, %v1672_v16 }
0x103f   :  { %v1664_v37 = vpop.f32.mrf.mxu1 }
0x1040   :  { %v2952_v12 = vpop.eup %2951  ;;  %v1673_v63 = vadd.f32 %v1664_v37, %v3305_v2 }
0x1041   :  { %1764 = vrot.lane.b32.xlu2 %v2952_v12, %s3137_s29 }
0x1042   :  { %2953 = vtanh.f32 %v1673_v63  ;;  %v2685_v46 = vmul.f32 -1.442695, %v1673_v63 }
0x1043   :  { %2955 = vpow2.f32 %v2684_v56 }
0x1048   :  { %v2954_v1 = vpop.eup %2953 }
0x1049   :  { %1766 = vrot.lane.b32.xlu0 %v2954_v1, %s3137_s29  ;;  %v2956_v25 = vpop.eup %2955 }
0x104a   :  { %v1688_v55 = vadd.f32 1.0, %v2956_v25 }
0x104c   :  { %2957 = vrcp.f32 %v1688_v55  ;;  %vm1697_vm14 = vweird.f32 %v1688_v55  ;;  %v1701_v42 = vand.u32 2147483647, %v1688_v55 }
0x104e   :  { %vm1702_vm0 = vcmp.eq.f32.partialorder %v1701_v42, 8.507059e+37 }
0x1052   :  { %v2958_v0 = vpop.eup %2957 }
0x1053   :  { %v1693_v33 = vmul.f32 %v2958_v0, %v1688_v55  ;;  %vm1698_vm13 = vweird.f32 %v2958_v0 }
0x1054   :  { %vm1699_vm15 = vmor %vm1697_vm14, %vm1698_vm13 }
0x1055   :  { %v1694_v23 = vsub.f32 1.0, %v1693_v33 }
0x1057   :  { %v1695_v44 = vmul.f32 %v2958_v0, %v1694_v23 }
0x1059   :  { %v1696_v24 = vadd.f32 %v2958_v0, %v1695_v44 }
0x105b   :  { %v1700_v28 = vsel %vm1699_vm15, %v2958_v0, %v1696_v24 }
0x107c   :  { %v1667_v21 = vpop.f32.mrf.mxu1 }
0x107d   :  { %v1674_v41 = vadd.f32 %v1667_v21, %v3307_v3  ;;  %v1703_v3 = vand.u32 2147483648, %v1688_v55 }
0x107f   :  { %2959 = vtanh.f32 %v1674_v41  ;;  %v2686_v16 = vmul.f32 -1.442695, %v1674_v41 }
0x1084   :  { %v1669_v11 = vpop.f32.mrf.mxu1 }
0x1085   :  { %v2960_v52 = vpop.eup %2959  ;;  %v1675_v2 = vadd.f32 %v1669_v11, %v3309_v4  ;;  %v1704_v4 = vor.u32 1.1754944e-38, %v1703_v3 }
0x1086   :  { %1768 = vrot.lane.b32.xlu1 %v2960_v52, %s3137_s29 }
0x1087   :  { %2961 = vtanh.f32 %v1675_v2  ;;  %v3745_v57 = vsel %vm1702_vm0, %v1704_v4, %v1700_v28  ;;  %v2687_v35 = vmul.f32 -1.442695, %v1675_v2 }
0x1088   :  { %2963 = vpow2.f32 %v2685_v46 }
0x108d   :  { %v2962_v50 = vpop.eup %2961 }
0x108e   :  { %1770 = vrot.lane.b32.xlu2 %v2962_v50, %s3137_s29  ;;  %v2964_v27 = vpop.eup %2963 }
0x108f   :  { %v1689_v54 = vadd.f32 1.0, %v2964_v27 }
0x1091   :  { %2965 = vrcp.f32 %v1689_v54  ;;  %v1718_v59 = vand.u32 2147483648, %v1689_v54  ;;  %vm1712_vm4 = vweird.f32 %v1689_v54  ;;  %v1716_v60 = vand.u32 2147483647, %v1689_v54 }
0x1092   :  { %2967 = vpow2.f32 %v2687_v35 }
0x1093   :  { %v1719_v7 = vor.u32 1.1754944e-38, %v1718_v59  ;;  %vm1717_vm6 = vcmp.eq.f32.partialorder %v1716_v60, 8.507059e+37 }
0x1097   :  { %v2966_v29 = vpop.eup %2965 }
0x1098   :  { %v1708_v6 = vmul.f32 %v2966_v29, %v1689_v54  ;;  %vm1713_vm2 = vweird.f32 %v2966_v29  ;;  %v2968_v39 = vpop.eup %2967 }
0x1099   :  { %vm1714_vm5 = vmor %vm1712_vm4, %vm1713_vm2  ;;  %v1691_v40 = vadd.f32 1.0, %v2968_v39 }
0x109a   :  { %v1709_v36 = vsub.f32 1.0, %v1708_v6 }
0x109b   :  { %v1765_v30 = vpop.permute.xlu2 %1764  ;;  %2969 = vrcp.f32 %v1691_v40  ;;  %v1748_v0 = vand.u32 2147483648, %v1691_v40  ;;  %vm1742_vm8 = vweird.f32 %v1691_v40  ;;  %v1746_v11 = vand.u32 2147483647, %v1691_v40 }
0x109c   :  { %v1776_v31 = vmul.f32 %v1765_v30, %v3745_v57  ;;  %v1710_v49 = vmul.f32 %v2966_v29, %v1709_v36  ;;  %2971 = vpow2.f32 %v2686_v16 }
0x109d   :  { %v1749_v33 = vor.u32 1.1754944e-38, %v1748_v0  ;;  %vm1747_vm10 = vcmp.eq.f32.partialorder %v1746_v11, 8.507059e+37 }
0x109e   :  { %1784 = vrot.lane.b32.xlu0 %v1776_v31, %s3139_s8  ;;  %v1711_v38 = vadd.f32 %v2966_v29, %v1710_v49  ;;  %v1756_v31 = vmul.f32 %v3745_v57, %v3717_v26 }
0x10a0   :  { %v1715_v45 = vsel %vm1714_vm5, %v2966_v29, %v1711_v38 }
0x10a1   :  { %v3749_v53 = vsel %vm1717_vm6, %v1719_v7, %v1715_v45  ;;  %v2970_v37 = vpop.eup %2969 }
0x10a2   :  { %v2972_v12 = vpop.eup %2971  ;;  %v1738_v63 = vmul.f32 %v2970_v37, %v1691_v40  ;;  %vm1743_vm7 = vweird.f32 %v2970_v37  ;;  %v1757_v49 = vmul.f32 %v3749_v53, %v3711_v58 }
0x10a3   :  { %v1690_v1 = vadd.f32 1.0, %v2972_v12  ;;  %vm1744_vm9 = vmor %vm1742_vm8, %vm1743_vm7 }
0x10a4   :  { %v1739_v56 = vsub.f32 1.0, %v1738_v63 }
0x10a5   :  { %2973 = vrcp.f32 %v1690_v1  ;;  %v1733_v3 = vand.u32 2147483648, %v1690_v1  ;;  %vm1727_vm1 = vweird.f32 %v1690_v1  ;;  %v1731_v42 = vand.u32 2147483647, %v1690_v1 }
0x10a6   :  { %v1740_v25 = vmul.f32 %v2970_v37, %v1739_v56 }
0x10a7   :  { %v1734_v28 = vor.u32 1.1754944e-38, %v1733_v3  ;;  %vm1732_vm13 = vcmp.eq.f32.partialorder %v1731_v42, 8.507059e+37 }
0x10a8   :  { %v1741_v55 = vadd.f32 %v2970_v37, %v1740_v25 }
0x10aa   :  { %v1745_v52 = vsel %vm1744_vm9, %v2970_v37, %v1741_v55 }
0x10ab   :  { %v2974_v21 = vpop.eup %2973  ;;  %v1750_v23 = vsel %vm1747_vm10, %v1749_v33, %v1745_v52 }
0x10ac   :  { %v1723_v2 = vmul.f32 %v2974_v21, %v1690_v1  ;;  %vm1728_vm11 = vweird.f32 %v2974_v21  ;;  %v1759_v35 = vmul.f32 %v1750_v23, %v3727_v34 }
0x10ad   :  { %vm1729_vm12 = vmor %vm1727_vm1, %vm1728_vm11 }
0x10ae   :  { %v1724_v46 = vsub.f32 1.0, %v1723_v2 }
0x10b0   :  { %v1725_v44 = vmul.f32 %v2974_v21, %v1724_v46 }
0x10b2   :  { %v1726_v24 = vadd.f32 %v2974_v21, %v1725_v44 }
0x10b4   :  { %v1730_v27 = vsel %vm1729_vm12, %v2974_v21, %v1726_v24 }
0x10b5   :  { %v1735_v54 = vsel %vm1732_vm13, %v1734_v28, %v1730_v27 }
0x10b6   :  { %v1758_v26 = vmul.f32 %v1735_v54, %v3722_v43 }
0x10bb   :  { %v1767_v48 = vpop.permute.xlu0 %1766 }
0x10bc   :  { %v1777_v62 = vmul.f32 %v1767_v48, %v3749_v53 }
0x10be   :  { %1786 = vrot.lane.b32.xlu1 %v1777_v62, %s3139_s8 }
0x10e8   :  { %v1771_v41 = vpop.permute.xlu2 %1770 }
0x10e9   :  { %v1779_v50 = vmul.f32 %v1771_v41, %v1750_v23 }
0x10eb   :  { %1790 = vrot.lane.b32.xlu0 %v1779_v50, %s3139_s8 }
0x10f8   :  { %v1769_v4 = vpop.permute.xlu1 %1768 }
0x10f9   :  { %v1778_v30 = vmul.f32 %v1769_v4, %v1735_v54 }
0x10fb   :  { %1788 = vrot.lane.b32.xlu2 %v1778_v30, %s3139_s8 }
0x1110   :  { %v1785_v29 = vpop.permute.xlu0 %1784 }
0x1111   :  { %v3757_v6 = vadd.f32 %v1785_v29, %v1756_v31 }
0x1113   :  { %2975 = vtanh.f32 %v3757_v6 }
0x1119   :  { %v2976_v36 = vpop.eup %2975 }
0x111a   :  { %1808 = vrot.lane.b32.xlu1 %v2976_v36, %s3137_s29 }
0x1130   :  { %v1787_v38 = vpop.permute.xlu1 %1786 }
0x1131   :  { %v3763_v59 = vadd.f32 %v1787_v38, %v1757_v49 }
0x1133   :  { %2977 = vtanh.f32 %v3763_v59 }
0x1139   :  { %v2978_v60 = vpop.eup %2977 }
0x113a   :  { %1810 = vrot.lane.b32.xlu2 %v2978_v60, %s3137_s29 }
0x1155   :  { %v1789_v45 = vpop.permute.xlu2 %1788 }
0x1156   :  { %v3768_v7 = vadd.f32 %v1789_v45, %v1758_v26 }
0x1158   :  { %2979 = vtanh.f32 %v3768_v7 }
0x115d   :  { %v1791_v48 = vpop.permute.xlu0 %1790 }
0x115e   :  { %v2980_v62 = vpop.eup %2979  ;;  %v3772_v58 = vadd.f32 %v1791_v48, %v1759_v35 }
0x115f   :  { %1812 = vrot.lane.b32.xlu0 %v2980_v62, %s3137_s29 }
0x1160   :  { %2981 = vtanh.f32 %v3772_v58 }
0x1166   :  { %v2982_v39 = vpop.eup %2981 }
0x1167   :  { %1814 = vrot.lane.b32.xlu1 %v2982_v39, %s3137_s29 }
0x118c   :  { %v1809_v40 = vpop.permute.xlu1 %1808 }
0x118d   :  { %v1820_v16 = vmul.f32 %v1809_v40, %v3745_v57 }
0x1194   :  { %v1811_v43 = vpop.permute.xlu2 %1810 }
0x1195   :  { %v1821_v37 = vmul.f32 %v1811_v43, %v3749_v53 }
0x1197   :  { %v1828_v12 = vpack.c.bf16 %v1821_v37, %v1820_v16 }
0x1199   :  { %1832 = vrot.lane.b32.xlu2 %v1828_v12, %s3139_s8 }
0x11d1   :  { %v1813_v34 = vpop.permute.xlu0 %1812 }
0x11d2   :  { %v1822_v1 = vmul.f32 %v1813_v34, %v1735_v54 }
0x11d9   :  { %v1815_v63 = vpop.permute.xlu1 %1814 }
0x11da   :  { %v1823_v56 = vmul.f32 %v1815_v63, %v1750_v23 }
0x11dc   :  { %v1829_v25 = vpack.c.bf16 %v1823_v56, %v1822_v1 }
0x11de   :  { %1834 = vrot.lane.b32.xlu0 %v1829_v25, %s3139_s8 }
0x11f3   :  { %v1833_v55 = vpop.permute.xlu2 %1832 }
0x11f4   :  { %2688 = vmatmul.msk.bf16.vlgmr.msrb.gmra.mxu2 %vm496_vm3, %v1833_v55 }
0x1250   :  { %v1835_v21 = vpop.permute.xlu0 %1834 }
0x1251   :  { %2689 = vmatmul.msk.bf16.gmra.mxu2 %vm496_vm3, %v1835_v21 }
0x1277   :  { %v1851_v0 = vpop.f32.mrf.mxu2 }
0x1278   :  { %v1861_v57 = vadd.f32 %v1851_v0, %v3393_v17 }
0x127a   :  { %2983 = vtanh.f32 %v1861_v57  ;;  %v2690_v50 = vmul.f32 -1.442695, %v1861_v57 }
0x127f   :  { %v1853_v53 = vpop.f32.mrf.mxu2 }
0x1280   :  { %v2984_v11 = vpop.eup %2983  ;;  %v1862_v52 = vadd.f32 %v1853_v53, %v3396_v19 }
0x1281   :  { %1953 = vrot.lane.b32.xlu1 %v2984_v11, %s3137_s29 }
0x1282   :  { %2985 = vtanh.f32 %v1862_v52  ;;  %v2691_v33 = vmul.f32 -1.442695, %v1862_v52 }
0x1284   :  { %2987 = vpow2.f32 %v2691_v33 }
0x1288   :  { %v2986_v2 = vpop.eup %2985 }
0x1289   :  { %1955 = vrot.lane.b32.xlu2 %v2986_v2, %s3137_s29 }
0x128a   :  { %v2988_v41 = vpop.eup %2987 }
0x128b   :  { %v1878_v23 = vadd.f32 1.0, %v2988_v41 }
0x128d   :  { %2989 = vrcp.f32 %v1878_v23  ;;  %v1907_v29 = vand.u32 2147483648, %v1878_v23  ;;  %vm1901_vm15 = vweird.f32 %v1878_v23  ;;  %v1905_v36 = vand.u32 2147483647, %v1878_v23 }
0x128e   :  { %2991 = vpow2.f32 %v2690_v50 }
0x128f   :  { %vm1906_vm2 = vcmp.eq.f32.partialorder %v1905_v36, 8.507059e+37 }
0x1293   :  { %v2990_v46 = vpop.eup %2989 }
0x1294   :  { %v2992_v17 = vpop.eup %2991  ;;  %v1897_v44 = vmul.f32 %v2990_v46, %v1878_v23  ;;  %vm1902_vm14 = vweird.f32 %v2990_v46 }
0x1295   :  { %v1877_v24 = vadd.f32 1.0, %v2992_v17  ;;  %vm1903_vm0 = vmor %vm1901_vm15, %vm1902_vm14 }
0x1296   :  { %v1898_v42 = vsub.f32 1.0, %v1897_v44 }
0x1297   :  { %2993 = vrcp.f32 %v1877_v24  ;;  %v1892_v39 = vand.u32 2147483648, %v1877_v24  ;;  %vm1886_vm5 = vweird.f32 %v1877_v24  ;;  %v1890_v40 = vand.u32 2147483647, %v1877_v24 }
0x1298   :  { %v1899_v27 = vmul.f32 %v2990_v46, %v1898_v42 }
0x1299   :  { %v1893_v16 = vor.u32 1.1754944e-38, %v1892_v39  ;;  %vm1891_vm7 = vcmp.eq.f32.partialorder %v1890_v40, 8.507059e+37 }
0x129a   :  { %v1900_v54 = vadd.f32 %v2990_v46, %v1899_v27 }
0x129c   :  { %v1904_v49 = vsel %vm1903_vm0, %v2990_v46, %v1900_v54 }
0x129d   :  { %v2994_v28 = vpop.eup %2993 }
0x129e   :  { %v1882_v38 = vmul.f32 %v2994_v28, %v1877_v24  ;;  %vm1887_vm4 = vweird.f32 %v2994_v28 }
0x129f   :  { %vm1888_vm6 = vmor %vm1886_vm5, %vm1887_vm4 }
0x12a0   :  { %v1883_v35 = vsub.f32 1.0, %v1882_v38 }
0x12d4   :  { %v1856_v3 = vpop.f32.mrf.mxu2 }
0x12d5   :  { %v1863_v19 = vadd.f32 %v1856_v3, %v3398_v20  ;;  %v1908_v20 = vor.u32 1.1754944e-38, %v1907_v29 }
0x12d7   :  { %2995 = vtanh.f32 %v1863_v19  ;;  %v3790_v26 = vsel %vm1906_vm2, %v1908_v20, %v1904_v49  ;;  %v2692_v63 = vmul.f32 -1.442695, %v1863_v19 }
0x12dc   :  { %v1858_v4 = vpop.f32.mrf.mxu2 }
0x12dd   :  { %v2996_v30 = vpop.eup %2995  ;;  %v1864_v31 = vadd.f32 %v1858_v4, %v3400_v22  ;;  %v1884_v22 = vmul.f32 %v2994_v28, %v1883_v35 }
0x12de   :  { %1957 = vrot.lane.b32.xlu0 %v2996_v30, %s3137_s29 }
0x12df   :  { %2997 = vtanh.f32 %v1864_v31  ;;  %v1885_v62 = vadd.f32 %v2994_v28, %v1884_v22  ;;  %v2693_v1 = vmul.f32 -1.442695, %v1864_v31 }
0x12e0   :  { %2999 = vpow2.f32 %v2692_v63 }
0x12e1   :  { %v1889_v43 = vsel %vm1888_vm6, %v2994_v28, %v1885_v62  ;;  %3001 = vpow2.f32 %v2693_v1 }
0x12e2   :  { %v3795_v37 = vsel %vm1891_vm7, %v1893_v16, %v1889_v43 }
0x12e3   :  { %v1956_v60 = vpop.permute.xlu2 %1955  ;;  %v1945_v24 = vmul.f32 %v3795_v37, %v3757_v6  ;;  %v1946_v6 = vmul.f32 %v3790_v26, %v3763_v59 }
0x12e4   :  { %v1966_v45 = vmul.f32 %v1956_v60, %v3790_v26 }
0x12e5   :  { %v2998_v48 = vpop.eup %2997 }
0x12e6   :  { %1975 = vrot.lane.b32.xlu0 %v1966_v45, %s3139_s8  ;;  %1959 = vrot.lane.b32.xlu1 %v2998_v48, %s3137_s29  ;;  %v3000_v56 = vpop.eup %2999 }
0x12e7   :  { %v1879_v25 = vadd.f32 1.0, %v3000_v56  ;;  %v3002_v55 = vpop.eup %3001 }
0x12e8   :  { %v1880_v21 = vadd.f32 1.0, %v3002_v55 }
0x12e9   :  { %3003 = vrcp.f32 %v1879_v25  ;;  %v1922_v23 = vand.u32 2147483648, %v1879_v25  ;;  %vm1916_vm9 = vweird.f32 %v1879_v25  ;;  %v1920_v50 = vand.u32 2147483647, %v1879_v25 }
0x12ea   :  { %3005 = vrcp.f32 %v1880_v21  ;;  %v1937_v54 = vand.u32 2147483648, %v1880_v21  ;;  %vm1931_vm12 = vweird.f32 %v1880_v21  ;;  %v1935_v30 = vand.u32 2147483647, %v1880_v21 }
0x12eb   :  { %v1923_v44 = vor.u32 1.1754944e-38, %v1922_v23  ;;  %vm1921_vm11 = vcmp.eq.f32.partialorder %v1920_v50, 8.507059e+37 }
0x12ec   :  { %v1938_v29 = vor.u32 1.1754944e-38, %v1937_v54  ;;  %vm1936_vm14 = vcmp.eq.f32.partialorder %v1935_v30, 8.507059e+37 }
0x12ef   :  { %v3004_v0 = vpop.eup %3003 }
0x12f0   :  { %v1912_v57 = vmul.f32 %v3004_v0, %v1879_v25  ;;  %v3006_v11 = vpop.eup %3005  ;;  %vm1917_vm8 = vweird.f32 %v3004_v0 }
0x12f1   :  { %v1927_v2 = vmul.f32 %v3006_v11, %v1880_v21  ;;  %vm1918_vm10 = vmor %vm1916_vm9, %vm1917_vm8  ;;  %vm1932_vm1 = vweird.f32 %v3006_v11 }
0x12f2   :  { %v1913_v53 = vsub.f32 1.0, %v1912_v57  ;;  %vm1933_vm13 = vmor %vm1931_vm12, %vm1932_vm1 }
0x12f3   :  { %v1954_v12 = vpop.permute.xlu1 %1953  ;;  %v1928_v41 = vsub.f32 1.0, %v1927_v2 }
0x12f4   :  { %v1965_v34 = vmul.f32 %v1954_v12, %v3795_v37  ;;  %v1914_v52 = vmul.f32 %v3004_v0, %v1913_v53 }
0x12f5   :  { %v1929_v17 = vmul.f32 %v3006_v11, %v1928_v41 }
0x12f6   :  { %1973 = vrot.lane.b32.xlu2 %v1965_v34, %s3139_s8  ;;  %v1915_v33 = vadd.f32 %v3004_v0, %v1914_v52 }
0x12f7   :  { %v1930_v4 = vadd.f32 %v3006_v11, %v1929_v17 }
0x12f8   :  { %v1919_v46 = vsel %vm1918_vm10, %v3004_v0, %v1915_v33 }
0x12f9   :  { %v1924_v42 = vsel %vm1921_vm11, %v1923_v44, %v1919_v46  ;;  %v1934_v31 = vsel %vm1933_vm13, %v3006_v11, %v1930_v4 }
0x12fa   :  { %v1939_v49 = vsel %vm1936_vm14, %v1938_v29, %v1934_v31  ;;  %v1947_v39 = vmul.f32 %v1924_v42, %v3768_v7 }
0x12fb   :  { %v1948_v48 = vmul.f32 %v1939_v49, %v3772_v58 }
0x1350   :  { %v1958_v3 = vpop.permute.xlu0 %1957  ;;  %v1974_v19 = vpop.permute.xlu2 %1973 }
0x1351   :  { %v1967_v27 = vmul.f32 %v1958_v3, %v1924_v42  ;;  %v3801_v28 = vadd.f32 %v1974_v19, %v1945_v24 }
0x1353   :  { %3007 = vtanh.f32 %v3801_v28  ;;  %1977 = vrot.lane.b32.xlu1 %v1967_v27, %s3139_s8 }
0x1358   :  { %v1976_v36 = vpop.permute.xlu0 %1975  ;;  %v1960_v38 = vpop.permute.xlu1 %1959 }
0x1359   :  { %v3008_v20 = vpop.eup %3007  ;;  %v3807_v60 = vadd.f32 %v1976_v36, %v1946_v6  ;;  %v1968_v45 = vmul.f32 %v1960_v38, %v1939_v49 }
0x135a   :  { %1997 = vrot.lane.b32.xlu0 %v3008_v20, %s3137_s29 }
0x135b   :  { %3009 = vtanh.f32 %v3807_v60  ;;  %1979 = vrot.lane.b32.xlu2 %v1968_v45, %s3139_s8 }
0x1361   :  { %v3010_v35 = vpop.eup %3009 }
0x1362   :  { %1999 = vrot.lane.b32.xlu1 %v3010_v35, %s3137_s29 }
0x13b5   :  { %v1980_v59 = vpop.permute.xlu2 %1979 }
0x13b6   :  { %v3814_v22 = vadd.f32 %v1980_v59, %v1948_v48 }
0x13b8   :  { %3011 = vtanh.f32 %v3814_v22 }
0x13be   :  { %v3012_v62 = vpop.eup %3011 }
0x13bf   :  { %2003 = vrot.lane.b32.xlu0 %v3012_v62, %s3137_s29 }
0x13c5   :  { %v1978_v40 = vpop.permute.xlu1 %1977 }
0x13c6   :  { %v3819_v43 = vadd.f32 %v1978_v40, %v1947_v39 }
0x13c8   :  { %3013 = vtanh.f32 %v3819_v43 }
0x13cc   :  { %v1998_v12 = vpop.permute.xlu0 %1997 }
0x13cd   :  { %v2009_v34 = vmul.f32 %v1998_v12, %v3795_v37 }
0x13ce   :  { %v3014_v16 = vpop.eup %3013 }
0x13cf   :  { %2001 = vrot.lane.b32.xlu2 %v3014_v16, %s3137_s29 }
0x13d4   :  { %v2000_v58 = vpop.permute.xlu1 %1999 }
0x13d5   :  { %v2010_v63 = vmul.f32 %v2000_v58, %v3790_v26 }
0x13d7   :  { %v2017_v1 = vpack.c.bf16 %v2010_v63, %v2009_v34 }
0x13d9   :  { %2021 = vrot.lane.b32.xlu1 %v2017_v1, %s3139_s8 }
0x1429   :  { %v2002_v56 = vpop.permute.xlu2 %2001 }
0x142a   :  { %v2011_v7 = vmul.f32 %v2002_v56, %v1924_v42 }
0x1431   :  { %v2004_v25 = vpop.permute.xlu0 %2003 }
0x1432   :  { %v2012_v55 = vmul.f32 %v2004_v25, %v1939_v49 }
0x1434   :  { %v2018_v21 = vpack.c.bf16 %v2012_v55, %v2011_v7 }
0x1436   :  { %2023 = vrot.lane.b32.xlu2 %v2018_v21, %s3139_s8 }
0x144b   :  { %v2022_v0 = vpop.permute.xlu1 %2021 }
0x144c   :  { %2694 = vmatmul.msk.bf16.vlgmr.msrb.gmra.mxu3 %vm496_vm3, %v2022_v0 }
0x1490   :  { %v2024_v57 = vpop.permute.xlu2 %2023 }
0x1491   :  { %2695 = vmatmul.msk.bf16.gmra.mxu3 %vm496_vm3, %v2024_v57 }
0x14cf   :  { %v2040_v53 = vpop.f32.mrf.mxu3 }
0x14d0   :  { %v2050_v37 = vadd.f32 %v2040_v53, %v3508_v51 }
0x14d2   :  { %3015 = vtanh.f32 %v2050_v37  ;;  %v2696_v51 = vmul.f32 -1.442695, %v2050_v37 }
0x14d7   :  { %v2042_v26 = vpop.f32.mrf.mxu3 }
0x14d8   :  { %v3016_v11 = vpop.eup %3015  ;;  %v2051_v52 = vadd.f32 %v2042_v26, %v3510_v61 }
0x14d9   :  { %2142 = vrot.lane.b32.xlu0 %v3016_v11, %s3137_s29 }
0x14da   :  { %3017 = vtanh.f32 %v2051_v52  ;;  %v2697_v17 = vmul.f32 -1.442695, %v2051_v52 }
0x14e0   :  { %v3018_v2 = vpop.eup %3017 }
0x14e1   :  { %2144 = vrot.lane.b32.xlu1 %v3018_v2, %s3137_s29 }
0x1514   :  { %v2045_v33 = vpop.f32.mrf.mxu3 }
0x1515   :  { %v2052_v41 = vadd.f32 %v2045_v33, %v3512_v5 }
0x1517   :  { %3019 = vtanh.f32 %v2052_v41  ;;  %v2698_v20 = vmul.f32 -1.442695, %v2052_v41 }
0x151c   :  { %v2047_v23 = vpop.f32.mrf.mxu3 }
0x151d   :  { %v3020_v50 = vpop.eup %3019  ;;  %v2053_v46 = vadd.f32 %v2047_v23, %v3514_v8 }
0x151e   :  { %2146 = vrot.lane.b32.xlu2 %v3020_v50, %s3137_s29 }
0x151f   :  { %3021 = vtanh.f32 %v2053_v46  ;;  %v2699_v55 = vmul.f32 -1.442695, %v2053_v46 }
0x1520   :  { %3023 = vpow2.f32 %v2696_v51 }
0x1521   :  { %3025 = vpow2.f32 %v2697_v17 }
0x1525   :  { %v3022_v61 = vpop.eup %3021 }
0x1526   :  { %2148 = vrot.lane.b32.xlu0 %v3022_v61, %s3137_s29  ;;  %v3024_v44 = vpop.eup %3023 }
0x1527   :  { %v2066_v24 = vadd.f32 1.0, %v3024_v44  ;;  %v3026_v3 = vpop.eup %3025 }
0x1528   :  { %v2067_v5 = vadd.f32 1.0, %v3026_v3 }
0x1529   :  { %3027 = vrcp.f32 %v2066_v24  ;;  %v2081_v29 = vand.u32 2147483648, %v2066_v24  ;;  %vm2075_vm0 = vweird.f32 %v2066_v24  ;;  %v2079_v6 = vand.u32 2147483647, %v2066_v24 }
0x152a   :  { %3029 = vrcp.f32 %v2067_v5  ;;  %v2096_v62 = vand.u32 2147483648, %v2067_v5  ;;  %vm2090_vm6 = vweird.f32 %v2067_v5  ;;  %v2094_v39 = vand.u32 2147483647, %v2067_v5 }
0x152b   :  { %v2082_v38 = vor.u32 1.1754944e-38, %v2081_v29  ;;  %vm2080_vm4 = vcmp.eq.f32.partialorder %v2079_v6, 8.507059e+37  ;;  %3031 = vpow2.f32 %v2698_v20 }
0x152c   :  { %v2097_v16 = vor.u32 1.1754944e-38, %v2096_v62  ;;  %vm2095_vm8 = vcmp.eq.f32.partialorder %v2094_v39, 8.507059e+37 }
0x152f   :  { %v3028_v42 = vpop.eup %3027 }
0x1530   :  { %v2071_v19 = vmul.f32 %v3028_v42, %v2066_v24  ;;  %v3030_v8 = vpop.eup %3029  ;;  %vm2076_vm15 = vweird.f32 %v3028_v42 }
0x1531   :  { %v2086_v54 = vmul.f32 %v3030_v8, %v2067_v5  ;;  %vm2077_vm2 = vmor %vm2075_vm0, %vm2076_vm15  ;;  %vm2091_vm5 = vweird.f32 %v3030_v8  ;;  %v3032_v63 = vpop.eup %3031 }
0x1532   :  { %v2072_v27 = vsub.f32 1.0, %v2071_v19  ;;  %vm2092_vm7 = vmor %vm2090_vm6, %vm2091_vm5  ;;  %v2068_v1 = vadd.f32 1.0, %v3032_v63 }
0x1533   :  { %v2087_v31 = vsub.f32 1.0, %v2086_v54 }
0x1534   :  { %v2073_v4 = vmul.f32 %v3028_v42, %v2072_v27  ;;  %3033 = vrcp.f32 %v2068_v1  ;;  %v2111_v57 = vand.u32 2147483648, %v2068_v1  ;;  %vm2105_vm10 = vweird.f32 %v2068_v1 }
0x1535   :  { %v2088_v49 = vmul.f32 %v3030_v8, %v2087_v31  ;;  %3035 = vpow2.f32 %v2699_v55  ;;  %v2109_v53 = vand.u32 2147483647, %v2068_v1 }
0x1536   :  { %v2074_v30 = vadd.f32 %v3028_v42, %v2073_v4  ;;  %v2112_v11 = vor.u32 1.1754944e-38, %v2111_v57 }
0x1537   :  { %v2089_v59 = vadd.f32 %v3030_v8, %v2088_v49  ;;  %vm2110_vm1 = vcmp.eq.f32.partialorder %v2109_v53, 8.507059e+37 }
0x1538   :  { %v2078_v36 = vsel %vm2077_vm2, %v3028_v42, %v2074_v30 }
0x1539   :  { %v3837_v35 = vsel %vm2080_vm4, %v2082_v38, %v2078_v36  ;;  %v2093_v40 = vsel %vm2092_vm7, %v3030_v8, %v2089_v59 }
0x153a   :  { %v3841_v58 = vsel %vm2095_vm8, %v2097_v16, %v2093_v40  ;;  %v3034_v56 = vpop.eup %3033  ;;  %v2134_v30 = vmul.f32 %v3837_v35, %v3801_v28 }
0x153b   :  { %v2101_v25 = vmul.f32 %v3034_v56, %v2068_v1  ;;  %vm2106_vm9 = vweird.f32 %v3034_v56  ;;  %v3036_v37 = vpop.eup %3035  ;;  %v2135_v27 = vmul.f32 %v3841_v58, %v3807_v60 }
0x153c   :  { %vm2107_vm11 = vmor %vm2105_vm10, %vm2106_vm9  ;;  %v2069_v52 = vadd.f32 1.0, %v3036_v37 }
0x153d   :  { %v2102_v7 = vsub.f32 1.0, %v2101_v25 }
0x153e   :  { %3037 = vrcp.f32 %v2069_v52  ;;  %v2126_v17 = vand.u32 2147483648, %v2069_v52  ;;  %vm2120_vm13 = vweird.f32 %v2069_v52  ;;  %v2124_v44 = vand.u32 2147483647, %v2069_v52 }
0x153f   :  { %v2103_v21 = vmul.f32 %v3034_v56, %v2102_v7 }
0x1540   :  { %v2127_v3 = vor.u32 1.1754944e-38, %v2126_v17  ;;  %vm2125_vm15 = vcmp.eq.f32.partialorder %v2124_v44, 8.507059e+37 }
0x1541   :  { %v2104_v0 = vadd.f32 %v3034_v56, %v2103_v21 }
0x1543   :  { %v2108_v26 = vsel %vm2107_vm11, %v3034_v56, %v2104_v0 }
0x1544   :  { %v2113_v33 = vsel %vm2110_vm1, %v2112_v11, %v2108_v26  ;;  %v3038_v23 = vpop.eup %3037 }
0x1545   :  { %v2116_v50 = vmul.f32 %v3038_v23, %v2069_v52  ;;  %vm2121_vm12 = vweird.f32 %v3038_v23  ;;  %v2136_v60 = vmul.f32 %v2113_v33, %v3819_v43 }
0x1546   :  { %vm2122_vm14 = vmor %vm2120_vm13, %vm2121_vm12 }
0x1547   :  { %v2117_v46 = vsub.f32 1.0, %v2116_v50 }
0x1549   :  { %v2118_v51 = vmul.f32 %v3038_v23, %v2117_v46 }
0x154b   :  { %v2143_v45 = vpop.permute.xlu0 %2142  ;;  %v2119_v61 = vadd.f32 %v3038_v23, %v2118_v51 }
0x154c   :  { %v2154_v48 = vmul.f32 %v2143_v45, %v3837_v35 }
0x154d   :  { %v2123_v24 = vsel %vm2122_vm14, %v3038_v23, %v2119_v61 }
0x154e   :  { %2162 = vrot.lane.b32.xlu1 %v2154_v48, %s3139_s8  ;;  %v2128_v42 = vsel %vm2125_vm15, %v2127_v3, %v2123_v24 }
0x154f   :  { %v2137_v28 = vmul.f32 %v2128_v42, %v3814_v22 }
0x1553   :  { %v2145_v12 = vpop.permute.xlu1 %2144 }
0x1554   :  { %v2155_v34 = vmul.f32 %v2145_v12, %v3841_v58 }
0x1556   :  { %2164 = vrot.lane.b32.xlu2 %v2155_v34, %s3139_s8 }
0x1578   :  { %v2147_v2 = vpop.permute.xlu2 %2146 }
0x1579   :  { %v2156_v41 = vmul.f32 %v2147_v2, %v2113_v33 }
0x157b   :  { %2166 = vrot.lane.b32.xlu0 %v2156_v41, %s3139_s8 }
0x1598   :  { %v2149_v5 = vpop.permute.xlu0 %2148 }
0x1599   :  { %v2157_v19 = vmul.f32 %v2149_v5, %v2128_v42 }
0x159b   :  { %2168 = vrot.lane.b32.xlu1 %v2157_v19, %s3139_s8 }
0x15b0   :  { %v2165_v8 = vpop.permute.xlu2 %2164 }
0x15b1   :  { %v3849_v4 = vadd.f32 %v2165_v8, %v2135_v27 }
0x15b3   :  { %3039 = vtanh.f32 %v3849_v4 }
0x15b9   :  { %v3040_v54 = vpop.eup %3039 }
0x15ba   :  { %2188 = vrot.lane.b32.xlu0 %v3040_v54, %s3137_s29 }
0x15c0   :  { %v2163_v31 = vpop.permute.xlu1 %2162 }
0x15c1   :  { %v3855_v29 = vadd.f32 %v2163_v31, %v2134_v30 }
0x15c3   :  { %3041 = vtanh.f32 %v3855_v29 }
0x15c9   :  { %v3042_v6 = vpop.eup %3041 }
0x15ca   :  { %2186 = vrot.lane.b32.xlu2 %v3042_v6, %s3137_s29 }
0x15ed   :  { %v2167_v36 = vpop.permute.xlu0 %2166 }
0x15ee   :  { %v3860_v49 = vadd.f32 %v2167_v36, %v2136_v60 }
0x15f0   :  { %3043 = vtanh.f32 %v3860_v49 }
0x15f6   :  { %v3044_v38 = vpop.eup %3043 }
0x15f7   :  { %2190 = vrot.lane.b32.xlu1 %v3044_v38, %s3137_s29 }
0x160d   :  { %v2169_v20 = vpop.permute.xlu1 %2168 }
0x160e   :  { %v3865_v45 = vadd.f32 %v2169_v20, %v2137_v28 }
0x1610   :  { %3045 = vtanh.f32 %v3865_v45 }
0x1616   :  { %v3046_v48 = vpop.eup %3045 }
0x1617   :  { %2192 = vrot.lane.b32.xlu2 %v3046_v48, %s3137_s29 }
0x1624   :  { %v2187_v59 = vpop.permute.xlu2 %2186 }
0x1625   :  { %v2198_v62 = vmul.f32 %v2187_v59, %v3837_v35 }
0x162c   :  { %v2189_v43 = vpop.permute.xlu0 %2188 }
0x162d   :  { %v2199_v39 = vmul.f32 %v2189_v43, %v3841_v58 }
0x162f   :  { %v2206_v40 = vpack.c.bf16 %v2199_v39, %v2198_v62 }
0x1631   :  { %2210 = vrot.lane.b32.xlu0 %v2206_v40, %s3139_s8 }
0x1669   :  { %v2191_v16 = vpop.permute.xlu1 %2190 }
0x166a   :  { %v2200_v22 = vmul.f32 %v2191_v16, %v2113_v33 }
0x1671   :  { %v2193_v12 = vpop.permute.xlu2 %2192 }
0x1672   :  { %v2201_v34 = vmul.f32 %v2193_v12, %v2128_v42 }
0x1674   :  { %v2207_v63 = vpack.c.bf16 %v2201_v34, %v2200_v22 }
0x1676   :  { %2212 = vrot.lane.b32.xlu1 %v2207_v63, %s3139_s8 }
0x16a3   :  { %v2211_v1 = vpop.permute.xlu0 %2210 }
0x16a4   :  { %2700 = vmatmul.msk.bf16.vlgmr.msra.gmra.mxu1 %vm496_vm3, %v2211_v1 }
0x16e8   :  { %v2213_v56 = vpop.permute.xlu1 %2212 }
0x16e9   :  { %2701 = vmatmul.msk.bf16.gmra.mxu1 %vm496_vm3, %v2213_v56 }
0x1721   :  { %v2229_v25 = vpop.f32.mrf.mxu1 }
0x1722   :  { %v2239_v35 = vadd.f32 %v2229_v25, %v3516_v9 }
0x1724   :  { %3047 = vtanh.f32 %v2239_v35  ;;  %v2702_v0 = vmul.f32 -1.442695, %v2239_v35 }
0x1729   :  { %v2231_v58 = vpop.f32.mrf.mxu1 }
0x172a   :  { %v3048_v7 = vpop.eup %3047  ;;  %v2240_v55 = vadd.f32 %v2231_v58, %v3518_v10 }
0x172b   :  { %2331 = vrot.lane.b32.xlu2 %v3048_v7, %s3137_s29 }
0x172c   :  { %3049 = vtanh.f32 %v2240_v55  ;;  %v2703_v23 = vmul.f32 -1.442695, %v2240_v55 }
0x172d   :  { %3051 = vpow2.f32 %v2702_v0 }
0x1732   :  { %v3050_v21 = vpop.eup %3049 }
0x1733   :  { %2333 = vrot.lane.b32.xlu0 %v3050_v21, %s3137_s29  ;;  %v3052_v57 = vpop.eup %3051 }
0x1734   :  { %v2255_v53 = vadd.f32 1.0, %v3052_v57 }
0x1736   :  { %3053 = vrcp.f32 %v2255_v53  ;;  %vm2264_vm2 = vweird.f32 %v2255_v53  ;;  %v2268_v51 = vand.u32 2147483647, %v2255_v53 }
0x1738   :  { %vm2269_vm5 = vcmp.eq.f32.partialorder %v2268_v51, 8.507059e+37 }
0x173c   :  { %v3054_v9 = vpop.eup %3053 }
0x173d   :  { %v2260_v2 = vmul.f32 %v3054_v9, %v2255_v53  ;;  %vm2265_vm0 = vweird.f32 %v3054_v9 }
0x173e   :  { %vm2266_vm4 = vmor %vm2264_vm2, %vm2265_vm0 }
0x173f   :  { %v2261_v33 = vsub.f32 1.0, %v2260_v2 }
0x1741   :  { %v2262_v50 = vmul.f32 %v3054_v9, %v2261_v33 }
0x1743   :  { %v2263_v46 = vadd.f32 %v3054_v9, %v2262_v50 }
0x1745   :  { %v2267_v17 = vsel %vm2266_vm4, %v3054_v9, %v2263_v46 }
0x1766   :  { %v2234_v37 = vpop.f32.mrf.mxu1 }
0x1767   :  { %v2241_v26 = vadd.f32 %v2234_v37, %v3521_v32  ;;  %v2270_v32 = vand.u32 2147483648, %v2255_v53 }
0x1769   :  { %3055 = vtanh.f32 %v2241_v26  ;;  %v2704_v43 = vmul.f32 -1.442695, %v2241_v26 }
0x176e   :  { %v2236_v11 = vpop.f32.mrf.mxu1 }
0x176f   :  { %v3056_v52 = vpop.eup %3055  ;;  %v2242_v10 = vadd.f32 %v2236_v11, %v3523_v13  ;;  %v2271_v13 = vor.u32 1.1754944e-38, %v2270_v32 }
0x1770   :  { %2335 = vrot.lane.b32.xlu1 %v3056_v52, %s3137_s29 }
0x1771   :  { %3057 = vtanh.f32 %v2242_v10  ;;  %v3883_v24 = vsel %vm2269_vm5, %v2271_v13, %v2267_v17  ;;  %v2705_v36 = vmul.f32 -1.442695, %v2242_v10 }
0x1772   :  { %3059 = vpow2.f32 %v2703_v23  ;;  %v2323_v33 = vmul.f32 %v3883_v24, %v3855_v29 }
0x1777   :  { %v3058_v41 = vpop.eup %3057 }
0x1778   :  { %2337 = vrot.lane.b32.xlu2 %v3058_v41, %s3137_s29  ;;  %v3060_v61 = vpop.eup %3059 }
0x1779   :  { %v2256_v44 = vadd.f32 1.0, %v3060_v61 }
0x177b   :  { %3061 = vrcp.f32 %v2256_v44  ;;  %v2285_v30 = vand.u32 2147483648, %v2256_v44  ;;  %vm2279_vm7 = vweird.f32 %v2256_v44  ;;  %v2283_v31 = vand.u32 2147483647, %v2256_v44 }
0x177c   :  { %3063 = vpow2.f32 %v2705_v36 }
0x177d   :  { %v2286_v60 = vor.u32 1.1754944e-38, %v2285_v30  ;;  %vm2284_vm9 = vcmp.eq.f32.partialorder %v2283_v31, 8.507059e+37 }
0x1781   :  { %v3062_v42 = vpop.eup %3061 }
0x1782   :  { %v2275_v19 = vmul.f32 %v3062_v42, %v2256_v44  ;;  %vm2280_vm6 = vweird.f32 %v3062_v42  ;;  %v3064_v48 = vpop.eup %3063 }
0x1783   :  { %vm2281_vm8 = vmor %vm2279_vm7, %vm2280_vm6  ;;  %v2258_v59 = vadd.f32 1.0, %v3064_v48 }
0x1784   :  { %v2276_v27 = vsub.f32 1.0, %v2275_v19 }
0x1785   :  { %v2332_v3 = vpop.permute.xlu2 %2331  ;;  %3065 = vrcp.f32 %v2258_v59  ;;  %v2315_v1 = vand.u32 2147483648, %v2258_v59  ;;  %vm2309_vm11 = vweird.f32 %v2258_v59  ;;  %v2313_v56 = vand.u32 2147483647, %v2258_v59 }
0x1786   :  { %v2343_v5 = vmul.f32 %v2332_v3, %v3883_v24  ;;  %v2277_v8 = vmul.f32 %v3062_v42, %v2276_v27  ;;  %3067 = vpow2.f32 %v2704_v43 }
0x1787   :  { %v2316_v58 = vor.u32 1.1754944e-38, %v2315_v1  ;;  %vm2314_vm12 = vcmp.eq.f32.partialorder %v2313_v56, 8.507059e+37 }
0x1788   :  { %2351 = vrot.lane.b32.xlu0 %v2343_v5, %s3139_s8  ;;  %v2278_v54 = vadd.f32 %v3062_v42, %v2277_v8 }
0x178a   :  { %v2282_v6 = vsel %vm2281_vm8, %v3062_v42, %v2278_v54 }
0x178b   :  { %v3887_v28 = vsel %vm2284_vm9, %v2286_v60, %v2282_v6  ;;  %v3066_v62 = vpop.eup %3065 }
0x178c   :  { %v3068_v39 = vpop.eup %3067  ;;  %v2305_v40 = vmul.f32 %v3066_v62, %v2258_v59  ;;  %vm2310_vm10 = vweird.f32 %v3066_v62  ;;  %v2324_v46 = vmul.f32 %v3887_v28, %v3849_v4 }
0x178d   :  { %v2257_v16 = vadd.f32 1.0, %v3068_v39  ;;  %vm2311_vm1 = vmor %vm2309_vm11, %vm2310_vm10 }
0x178e   :  { %v2306_v12 = vsub.f32 1.0, %v2305_v40 }
0x178f   :  { %3069 = vrcp.f32 %v2257_v16  ;;  %v2300_v37 = vand.u32 2147483648, %v2257_v16  ;;  %vm2294_vm14 = vweird.f32 %v2257_v16  ;;  %v2298_v26 = vand.u32 2147483647, %v2257_v16 }
0x1790   :  { %v2307_v22 = vmul.f32 %v3066_v62, %v2306_v12 }
0x1791   :  { %v2301_v11 = vor.u32 1.1754944e-38, %v2300_v37  ;;  %vm2299_vm0 = vcmp.eq.f32.partialorder %v2298_v26, 8.507059e+37 }
0x1792   :  { %v2308_v34 = vadd.f32 %v3066_v62, %v2307_v22 }
0x1794   :  { %v2312_v25 = vsel %vm2311_vm1, %v3066_v62, %v2308_v34 }
0x1795   :  { %v3070_v63 = vpop.eup %3069  ;;  %v2317_v7 = vsel %vm2314_vm12, %v2316_v58, %v2312_v25 }
0x1796   :  { %v2290_v35 = vmul.f32 %v3070_v63, %v2257_v16  ;;  %vm2295_vm13 = vweird.f32 %v3070_v63  ;;  %v2326_v44 = vmul.f32 %v2317_v7, %v3865_v45 }
0x1797   :  { %vm2296_vm15 = vmor %vm2294_vm14, %vm2295_vm13 }
0x1798   :  { %v2291_v0 = vsub.f32 1.0, %v2290_v35 }
0x179a   :  { %v2292_v57 = vmul.f32 %v3070_v63, %v2291_v0 }
0x179c   :  { %v2293_v53 = vadd.f32 %v3070_v63, %v2292_v57 }
0x179e   :  { %v2297_v9 = vsel %vm2296_vm15, %v3070_v63, %v2293_v53 }
0x179f   :  { %v2302_v10 = vsel %vm2299_vm0, %v2301_v11, %v2297_v9 }
0x17a0   :  { %v2325_v29 = vmul.f32 %v2302_v10, %v3860_v49 }
0x17a5   :  { %v2334_v38 = vpop.permute.xlu0 %2333 }
0x17a6   :  { %v2344_v20 = vmul.f32 %v2334_v38, %v3887_v28 }
0x17a8   :  { %2353 = vrot.lane.b32.xlu1 %v2344_v20, %s3139_s8 }
0x17d2   :  { %v2338_v55 = vpop.permute.xlu2 %2337 }
0x17d3   :  { %v2346_v21 = vmul.f32 %v2338_v55, %v2317_v7 }
0x17d5   :  { %2357 = vrot.lane.b32.xlu0 %v2346_v21, %s3139_s8 }
0x17e2   :  { %v2336_v52 = vpop.permute.xlu1 %2335 }
0x17e3   :  { %v2345_v2 = vmul.f32 %v2336_v52, %v2302_v10 }
0x17e5   :  { %2355 = vrot.lane.b32.xlu2 %v2345_v2, %s3139_s8 }
0x17fa   :  { %v2352_v41 = vpop.permute.xlu0 %2351 }
0x17fb   :  { %v3895_v23 = vadd.f32 %v2352_v41, %v2323_v33 }
0x17fd   :  { %3071 = vtanh.f32 %v3895_v23 }
0x1803   :  { %v3072_v50 = vpop.eup %3071 }
0x1804   :  { %2375 = vrot.lane.b32.xlu1 %v3072_v50, %s3137_s29 }
0x181a   :  { %v2354_v32 = vpop.permute.xlu1 %2353 }
0x181b   :  { %v3901_v51 = vadd.f32 %v2354_v32, %v2324_v46 }
0x181d   :  { %3073 = vtanh.f32 %v3901_v51 }
0x1823   :  { %v3074_v61 = vpop.eup %3073 }
0x1824   :  { %2377 = vrot.lane.b32.xlu2 %v3074_v61, %s3137_s29 }
0x183f   :  { %v2356_v17 = vpop.permute.xlu2 %2355 }
0x1840   :  { %v3906_v13 = vadd.f32 %v2356_v17, %v2325_v29 }
0x1842   :  { %3075 = vtanh.f32 %v3906_v13 }
0x1847   :  { %v2358_v3 = vpop.permute.xlu0 %2357 }
0x1848   :  { %v3076_v5 = vpop.eup %3075  ;;  %v3910_v4 = vadd.f32 %v2358_v3, %v2326_v44 }
0x1849   :  { %2379 = vrot.lane.b32.xlu0 %v3076_v5, %s3137_s29 }
0x184a   :  { %3077 = vtanh.f32 %v3910_v4 }
0x1850   :  { %v3078_v42 = vpop.eup %3077 }
0x1851   :  { %2381 = vrot.lane.b32.xlu1 %v3078_v42, %s3137_s29 }
0x1876   :  { %v2376_v19 = vpop.permute.xlu1 %2375 }
0x1877   :  { %v2387_v27 = vmul.f32 %v2376_v19, %v3883_v24 }
0x187e   :  { %v2378_v49 = vpop.permute.xlu2 %2377 }
0x187f   :  { %v2388_v8 = vmul.f32 %v2378_v49, %v3887_v28 }
0x1881   :  { %v2395_v54 = vpack.c.bf16 %v2388_v8, %v2387_v27 }
0x1883   :  { %2399 = vrot.lane.b32.xlu2 %v2395_v54, %s3139_s8 }
0x18bb   :  { %v2380_v45 = vpop.permute.xlu0 %2379 }
0x18bc   :  { %v2389_v31 = vmul.f32 %v2380_v45, %v2302_v10 }
0x18c3   :  { %v2382_v30 = vpop.permute.xlu1 %2381 }
0x18c4   :  { %v2390_v6 = vmul.f32 %v2382_v30, %v2317_v7 }
0x18c6   :  { %v2396_v60 = vpack.c.bf16 %v2390_v6, %v2389_v31 }
0x18c8   :  { %2401 = vrot.lane.b32.xlu0 %v2396_v60, %s3139_s8 }
0x18dd   :  { %v2400_v36 = vpop.permute.xlu2 %2399 }
0x18de   :  { %2706 = vmatmul.msk.bf16.vlgmr.msra.gmra.mxu2 %vm496_vm3, %v2400_v36 }
0x193a   :  { %v2402_v38 = vpop.permute.xlu0 %2401 }
0x193b   :  { %2707 = vmatmul.msk.bf16.gmra.mxu2 %vm496_vm3, %v2402_v38 }
0x1961   :  { %v2418_v20 = vpop.f32.mrf.mxu2 }
0x1962   :  { %v2428_v24 = vadd.f32 %v2418_v20, %v3525_v14 }
0x1964   :  { %3079 = vtanh.f32 %v2428_v24  ;;  %v2708_v16 = vmul.f32 -1.442695, %v2428_v24 }
0x1969   :  { %v2420_v28 = vpop.f32.mrf.mxu2 }
0x196a   :  { %v3080_v48 = vpop.eup %3079  ;;  %v2429_v59 = vadd.f32 %v2420_v28, %v3527_v15 }
0x196b   :  { %2520 = vrot.lane.b32.xlu1 %v3080_v48, %s3137_s29 }
0x196c   :  { %3081 = vtanh.f32 %v2429_v59  ;;  %v2709_v62 = vmul.f32 -1.442695, %v2429_v59 }
0x196e   :  { %3083 = vpow2.f32 %v2709_v62 }
0x1972   :  { %v3082_v43 = vpop.eup %3081 }
0x1973   :  { %2522 = vrot.lane.b32.xlu2 %v3082_v43, %s3137_s29 }
0x1974   :  { %v3084_v39 = vpop.eup %3083 }
0x1975   :  { %v2445_v40 = vadd.f32 1.0, %v3084_v39 }
0x1977   :  { %3085 = vrcp.f32 %v2445_v40  ;;  %v2474_v21 = vand.u32 2147483648, %v2445_v40  ;;  %vm2468_vm4 = vweird.f32 %v2445_v40  ;;  %v2472_v0 = vand.u32 2147483647, %v2445_v40 }
0x1978   :  { %3087 = vpow2.f32 %v2708_v16 }
0x1979   :  { %vm2473_vm6 = vcmp.eq.f32.partialorder %v2472_v0, 8.507059e+37 }
0x197d   :  { %v3086_v12 = vpop.eup %3085 }
0x197e   :  { %v3088_v14 = vpop.eup %3087  ;;  %v2464_v22 = vmul.f32 %v3086_v12, %v2445_v40  ;;  %vm2469_vm2 = vweird.f32 %v3086_v12 }
0x197f   :  { %v2444_v34 = vadd.f32 1.0, %v3088_v14  ;;  %vm2470_vm5 = vmor %vm2468_vm4, %vm2469_vm2 }
0x1980   :  { %v2465_v1 = vsub.f32 1.0, %v2464_v22 }
0x1981   :  { %3089 = vrcp.f32 %v2444_v34  ;;  %v2459_v2 = vand.u32 2147483648, %v2444_v34  ;;  %vm2453_vm8 = vweird.f32 %v2444_v34  ;;  %v2457_v33 = vand.u32 2147483647, %v2444_v34 }
0x1982   :  { %v2466_v56 = vmul.f32 %v3086_v12, %v2465_v1 }
0x1983   :  { %v2460_v50 = vor.u32 1.1754944e-38, %v2459_v2  ;;  %vm2458_vm10 = vcmp.eq.f32.partialorder %v2457_v33, 8.507059e+37 }
0x1984   :  { %v2467_v58 = vadd.f32 %v3086_v12, %v2466_v56 }
0x1986   :  { %v2471_v57 = vsel %vm2470_vm5, %v3086_v12, %v2467_v58 }
0x1987   :  { %v3090_v25 = vpop.eup %3089 }
0x1988   :  { %v2449_v53 = vmul.f32 %v3090_v25, %v2444_v34  ;;  %vm2454_vm7 = vweird.f32 %v3090_v25 }
0x1989   :  { %vm2455_vm9 = vmor %vm2453_vm8, %vm2454_vm7 }
0x198a   :  { %v2450_v11 = vsub.f32 1.0, %v2449_v53 }
0x19be   :  { %v2423_v63 = vpop.f32.mrf.mxu2 }
0x19bf   :  { %v2430_v15 = vadd.f32 %v2423_v63, %v3529_v47  ;;  %v2475_v47 = vor.u32 1.1754944e-38, %v2474_v21 }
0x19c1   :  { %3091 = vtanh.f32 %v2430_v15  ;;  %v3928_v26 = vsel %vm2473_vm6, %v2475_v47, %v2471_v57  ;;  %v2710_v29 = vmul.f32 -1.442695, %v2430_v15 }
0x19c6   :  { %v2425_v35 = vpop.f32.mrf.mxu2 }
0x19c7   :  { %v3092_v7 = vpop.eup %3091  ;;  %v2431_v55 = vadd.f32 %v2425_v35, %v3531_v18  ;;  %v2451_v18 = vmul.f32 %v3090_v25, %v2450_v11 }
0x19c8   :  { %2524 = vrot.lane.b32.xlu0 %v3092_v7, %s3137_s29 }
0x19c9   :  { %3093 = vtanh.f32 %v2431_v55  ;;  %v2452_v10 = vadd.f32 %v3090_v25, %v2451_v18  ;;  %v2711_v17 = vmul.f32 -1.442695, %v2431_v55 }
0x19ca   :  { %3095 = vpow2.f32 %v2710_v29 }
0x19cb   :  { %v2456_v41 = vsel %vm2455_vm9, %v3090_v25, %v2452_v10  ;;  %3097 = vpow2.f32 %v2711_v17 }
0x19cc   :  { %v3933_v32 = vsel %vm2458_vm10, %v2460_v50, %v2456_v41 }
0x19cd   :  { %v2523_v37 = vpop.permute.xlu2 %2522  ;;  %v2512_v24 = vmul.f32 %v3933_v32, %v3895_v23  ;;  %v2513_v23 = vmul.f32 %v3928_v26, %v3901_v51 }
0x19ce   :  { %v2533_v9 = vmul.f32 %v2523_v37, %v3928_v26 }
0x19cf   :  { %v3094_v52 = vpop.eup %3093 }
0x19d0   :  { %2542 = vrot.lane.b32.xlu0 %v2533_v9, %s3139_s8  ;;  %2526 = vrot.lane.b32.xlu1 %v3094_v52, %s3137_s29  ;;  %v3096_v44 = vpop.eup %3095 }
0x19d1   :  { %v2446_v3 = vadd.f32 1.0, %v3096_v44  ;;  %v3098_v5 = vpop.eup %3097 }
0x19d2   :  { %v2447_v42 = vadd.f32 1.0, %v3098_v5 }
0x19d3   :  { %3099 = vrcp.f32 %v2446_v3  ;;  %v2489_v6 = vand.u32 2147483648, %v2446_v3  ;;  %vm2483_vm1 = vweird.f32 %v2446_v3  ;;  %v2487_v60 = vand.u32 2147483647, %v2446_v3 }
0x19d4   :  { %3101 = vrcp.f32 %v2447_v42  ;;  %v2504_v40 = vand.u32 2147483648, %v2447_v42  ;;  %vm2498_vm15 = vweird.f32 %v2447_v42  ;;  %v2502_v16 = vand.u32 2147483647, %v2447_v42 }
0x19d5   :  { %v2490_v20 = vor.u32 1.1754944e-38, %v2489_v6  ;;  %vm2488_vm13 = vcmp.eq.f32.partialorder %v2487_v60, 8.507059e+37 }
0x19d6   :  { %v2505_v14 = vor.u32 1.1754944e-38, %v2504_v40  ;;  %vm2503_vm2 = vcmp.eq.f32.partialorder %v2502_v16, 8.507059e+37 }
0x19d9   :  { %v3100_v19 = vpop.eup %3099 }
0x19da   :  { %v2479_v49 = vmul.f32 %v3100_v19, %v2446_v3  ;;  %v3102_v8 = vpop.eup %3101  ;;  %vm2484_vm11 = vweird.f32 %v3100_v19 }
0x19db   :  { %v2494_v45 = vmul.f32 %v3102_v8, %v2447_v42  ;;  %vm2485_vm12 = vmor %vm2483_vm1, %vm2484_vm11  ;;  %vm2499_vm14 = vweird.f32 %v3102_v8 }
0x19dc   :  { %v2480_v27 = vsub.f32 1.0, %v2479_v49  ;;  %vm2500_vm0 = vmor %vm2498_vm15, %vm2499_vm14 }
0x19dd   :  { %v2521_v46 = vpop.permute.xlu1 %2520  ;;  %v2495_v31 = vsub.f32 1.0, %v2494_v45 }
0x19de   :  { %v2532_v61 = vmul.f32 %v2521_v46, %v3933_v32  ;;  %v2481_v54 = vmul.f32 %v3100_v19, %v2480_v27 }
0x19df   :  { %v2496_v38 = vmul.f32 %v3102_v8, %v2495_v31 }
0x19e0   :  { %2540 = vrot.lane.b32.xlu2 %v2532_v61, %s3139_s8  ;;  %v2482_v30 = vadd.f32 %v3100_v19, %v2481_v54 }
0x19e1   :  { %v2497_v39 = vadd.f32 %v3102_v8, %v2496_v38 }
0x19e2   :  { %v2486_v36 = vsel %vm2485_vm12, %v3100_v19, %v2482_v30 }
0x19e3   :  { %v2491_v59 = vsel %vm2488_vm13, %v2490_v20, %v2486_v36  ;;  %v2501_v12 = vsel %vm2500_vm0, %v3102_v8, %v2497_v39 }
0x19e4   :  { %v2506_v63 = vsel %vm2503_vm2, %v2505_v14, %v2501_v12  ;;  %v2514_v55 = vmul.f32 %v2491_v59, %v3906_v13 }
0x19e5   :  { %v2515_v35 = vmul.f32 %v2506_v63, %v3910_v4 }
0x1a3a   :  { %v2541_v28 = vpop.permute.xlu2 %2540  ;;  %v2525_v48 = vpop.permute.xlu0 %2524 }
0x1a3b   :  { %v2552_v43 = vadd.f32 %v2541_v28, %v2512_v24  ;;  %v2534_v62 = vmul.f32 %v2525_v48, %v2491_v59 }
0x1a3d   :  { %3103 = vtanh.f32 %v2552_v43  ;;  %2544 = vrot.lane.b32.xlu1 %v2534_v62, %s3139_s8 }
0x1a42   :  { %v2543_v22 = vpop.permute.xlu0 %2542  ;;  %v2527_v34 = vpop.permute.xlu1 %2526 }
0x1a43   :  { %v3104_v1 = vpop.eup %3103  ;;  %v2553_v15 = vadd.f32 %v2543_v22, %v2513_v23  ;;  %v2535_v56 = vmul.f32 %v2527_v34, %v2506_v63 }
0x1a44   :  { %2564 = vrot.lane.b32.xlu0 %v3104_v1, %s3137_s29 }
0x1a45   :  { %3105 = vtanh.f32 %v2553_v15  ;;  %2546 = vrot.lane.b32.xlu2 %v2535_v56, %s3139_s8 }
0x1a4b   :  { %v3106_v25 = vpop.eup %3105 }
0x1a4c   :  { %2566 = vrot.lane.b32.xlu1 %v3106_v25, %s3137_s29 }
0x1a9f   :  { %v2547_v58 = vpop.permute.xlu2 %2546 }
0x1aa0   :  { %v2555_v7 = vadd.f32 %v2547_v58, %v2515_v35 }
0x1aa2   :  { %3107 = vtanh.f32 %v2555_v7 }
0x1aa8   :  { %v3108_v51 = vpop.eup %3107 }
0x1aa9   :  { %2570 = vrot.lane.b32.xlu0 %v3108_v51, %s3137_s29 }
0x1aaf   :  { %v2545_v21 = vpop.permute.xlu1 %2544 }
0x1ab0   :  { %v2554_v0 = vadd.f32 %v2545_v21, %v2514_v55 }
0x1ab2   :  { %3109 = vtanh.f32 %v2554_v0 }
0x1ab6   :  { %v2565_v57 = vpop.permute.xlu0 %2564 }
0x1ab7   :  { %v2576_v53 = vmul.f32 %v2565_v57, %v3933_v32 }
0x1ab8   :  { %v3110_v47 = vpop.eup %3109 }
0x1ab9   :  { %2584 = vrot.lane.b32.xlu1 %v2576_v53, %s3139_s8  ;;  %2568 = vrot.lane.b32.xlu2 %v3110_v47, %s3137_s29  ;;  %s2604_s29 = sshll.u32 %s3140_s0, 4  ;;  %s2605_s29 = int_to_ptr.vmem [resolvable:$true] %s2604_s29 }
0x1abe   :  { %v2567_v4 = vpop.permute.xlu1 %2566 }
0x1abf   :  { %v2577_v37 = vmul.f32 %v2567_v4, %v3928_v26 }
0x1ac1   :  { %2586 = vrot.lane.b32.xlu2 %v2577_v37, %s3139_s8 }
0x1b13   :  { %v2569_v9 = vpop.permute.xlu2 %2568 }
0x1b14   :  { %v2578_v11 = vmul.f32 %v2569_v9, %v2491_v59 }
0x1b16   :  { %2588 = vrot.lane.b32.xlu0 %v2578_v11, %s3139_s8 }
0x1b1b   :  { %v2587_v13 = vpop.permute.xlu2 %2586  ;;  %v2571_v52 = vpop.permute.xlu0 %2570 }
0x1b1c   :  { %2597 = vst.msk [vmem:[#allocation3 + $0x8] sm:$0xff] %vm496_vm3, %v2587_v13  ;;  %v2579_v18 = vmul.f32 %v2571_v52, %v2506_v63 }
0x1b1e   :  { %2590 = vrot.lane.b32.xlu1 %v2579_v18, %s3139_s8 }
0x1b2b   :  { %v2585_v10 = vpop.permute.xlu1 %2584 }
0x1b2c   :  { %2596 = vst.msk [vmem:[#allocation3] sm:$0xff] %vm496_vm3, %v2585_v10 }
0x1b88   :  { %v2589_v2 = vpop.permute.xlu0 %2588 }
0x1b89   :  { %2598 = vst.msk [vmem:[#allocation3 + $0x10] sm:$0xff] %vm496_vm3, %v2589_v2 }
0x1b90   :  { %v2591_v26 = vpop.permute.xlu1 %2590 }
0x1b91   :  { %2599 = vst.msk [vmem:[#allocation3 + $0x18] sm:$0xff] %vm496_vm3, %v2591_v26 }
0x1b92   :  { %2612 = dma.vmem_to_hbm [thread:$0]  %s2605_s29, 512, %s2607_s22, [#allocation4], %s3141_s2, %s3141_s2, %s3142_s23  }
0x1b93   :  { %3135 = dma.done.wait [#allocation4], 512  }
0x1b94   :  { %3136 = vsyncadd [#allocation4], 4294966784 }
0x1b95   :  { %2617 = vsyncpa [#allocation4], 1 }

</bundles_post_ra>
